<compile_context>
chip_gen: v7x
topology: tpu7x:2x2x1
jax: 0.10.0
libtpu: 0.0.40
codegen_flags: <defaults>
</compile_context>

<pallas_src>
import functools
import math

import jax
import jax.numpy as jnp
from jax import lax
from jax.experimental import pallas as pl
from jax.experimental.pallas import tpu as pltpu


# ----------------------------------------------------------------------------- #
# Hardware queries (best effort, conservative fallbacks)
# ----------------------------------------------------------------------------- #
@functools.lru_cache(maxsize=None)
def _tpu_info():
    try:
        return pltpu.get_tpu_info()
    except Exception:
        return None


def _vmem_limit_bytes():
    info = _tpu_info()
    try:
        cap = int(info.vmem_capacity_bytes)
    except Exception:
        return 48 * 2 ** 20            # safe everywhere (v7x physical VMEM = 64 MiB)
    if cap <= 0:
        return 48 * 2 ** 20
    # ~48 MiB on v7x (64 MiB physical), up to 96 MiB on v5e/v6e (128 MiB physical).
    return min(96 * 2 ** 20, max(32 * 2 ** 20, (3 * cap) // 4))


def _num_tensorcores():
    info = _tpu_info()
    for attr in ("num_cores", "core_count", "tensorcore_count"):
        try:
            v = int(getattr(info, attr))
            if v > 0:
                return v
        except Exception:
            pass
    return 1                           # conservative: never force a split on 1-TC chips


# ----------------------------------------------------------------------------- #
# Pallas matmul kernels with fused bias epilogue (hot path for every big conv)
# ----------------------------------------------------------------------------- #
def _matmul_bias_kernel_1step(a_ref, b_ref, bias_ref, o_ref):
    # Whole-K tile: single MXU pass, bias fused, bf16 store (no accumulator scratch).
    o_ref[...] = (jnp.dot(a_ref[...], b_ref[...],
                          preferred_element_type=jnp.float32)
                  + bias_ref[...]).astype(o_ref.dtype)


def _matmul_bias_kernel(a_ref, b_ref, bias_ref, o_ref, acc_ref):
    @pl.when(pl.program_id(2) == 0)
    def _():
        acc_ref[...] = jnp.zeros_like(acc_ref)

    acc_ref[...] += jnp.dot(a_ref[...], b_ref[...],
                            preferred_element_type=jnp.float32)

    @pl.when(pl.program_id(2) == pl.num_programs(2) - 1)
    def _():
        o_ref[...] = (acc_ref[...] + bias_ref[...]).astype(o_ref.dtype)


def _round_up(x, m):
    return ((x + m - 1) // m) * m


def _plan_tiles(Mp, Kp, Np, budget):
    """Prefer the fewest K steps (weight-DMA-bound regime), then the widest
    (HBM-contiguous) N tile, under a double-buffered VMEM budget."""
    tm = min(Mp, 256)

    def fits(tk, tn):
        a = 2 * tm * tk * 2            # double-buffered bf16 A tile
        b = 2 * tk * tn * 2            # double-buffered bf16 B tile (weight stream)
        o = 2 * tm * tn * 2            # double-buffered bf16 output tile
        acc = tm * tn * 4              # f32 accumulator scratch
        bias = 2 * tn * 4
        return a + b + o + acc + bias <= budget

    k_cands = [t for t in range(Kp, 127, -128) if Kp % t == 0]
    n_cands = [t for t in range(Np, 127, -128) if Np % t == 0]
    for tk in k_cands:
        for tn in n_cands:
            if fits(tk, tn):
                return tm, tk, tn
    return tm, 128, 128


def pallas_matmul_bias(a, w, bias):
    """a:(M,Kp) bf16, w:(Kp,Np) bf16, bias:(1,Np) f32 -> (Mp,Np) bf16 on the MXU."""
    M, Kp = a.shape
    Np = w.shape[1]
    Mp = _round_up(M, 16)                       # bf16 sublane packing: 16 rows / vreg
    vmem_limit = _vmem_limit_bytes()
    tm, tk, tn = _plan_tiles(Mp, Kp, Np, (3 * vmem_limit) // 4)
    Mp = _round_up(Mp, tm)

    # Dual-TensorCore chips (v7x): give each core a disjoint half of the weight
    # stream by ensuring the number of parallel (i, j) blocks divides evenly.
    cores = _num_tensorcores()
    if cores >= 2:
        while ((Mp // tm) * (Np // tn)) % cores != 0 and tn % 256 == 0:
            tn //= 2

    if Mp > M:
        a = jnp.pad(a, ((0, Mp - M), (0, 0)))
    gm, gn, gk = Mp // tm, Np // tn, Kp // tk

    cost = pl.CostEstimate(
        flops=2 * Mp * Kp * Np,
        transcendentals=0,
        bytes_accessed=gn * Mp * Kp * 2 + gm * Kp * Np * 2 + Mp * Np * 2 + Np * 4)

    if gk == 1:
        return pl.pallas_call(
            _matmul_bias_kernel_1step,
            out_shape=jax.ShapeDtypeStruct((Mp, Np), jnp.bfloat16),
            grid=(gm, gn),
            in_specs=[pl.BlockSpec((tm, Kp), lambda i, j: (i, 0)),
                      pl.BlockSpec((Kp, tn), lambda i, j: (0, j)),
                      pl.BlockSpec((1, tn), lambda i, j: (0, j))],
            out_specs=pl.BlockSpec((tm, tn), lambda i, j: (i, j)),
            compiler_params=pltpu.CompilerParams(
                dimension_semantics=("parallel", "parallel"),
                vmem_limit_bytes=vmem_limit),
            cost_estimate=cost,
        )(a, w, bias)

    return pl.pallas_call(
        _matmul_bias_kernel,
        out_shape=jax.ShapeDtypeStruct((Mp, Np), jnp.bfloat16),
        grid=(gm, gn, gk),
        in_specs=[pl.BlockSpec((tm, tk), lambda i, j, k: (i, k)),
                  pl.BlockSpec((tk, tn), lambda i, j, k: (k, j)),
                  pl.BlockSpec((1, tn), lambda i, j, k: (0, j))],
        out_specs=pl.BlockSpec((tm, tn), lambda i, j, k: (i, j)),
        scratch_shapes=[pltpu.VMEM((tm, tn), jnp.float32)],
        compiler_params=pltpu.CompilerParams(
            dimension_semantics=("parallel", "parallel", "arbitrary"),
            vmem_limit_bytes=vmem_limit),
        cost_estimate=cost,
    )(a, w, bias)


def conv_matmul(a, p, m):
    """a:(M,K) bf16 patches -> (M, Cout) with bias added."""
    M, K = a.shape
    Kp, Np, cout = m['Kp'], m['Np'], m['cout']
    if Kp > K:
        a = jnp.pad(a, ((0, 0), (0, Kp - K)))
    # Pallas only once the matmul is big enough to amortize the custom-call launch
    # and feed the MXU; GEMV-like shapes (tiny M) go to XLA dot, which fuses the
    # bias / following BN / ReLU and skips the launch overhead.
    if M >= 64 and cout >= 64 and K >= 128:
        out = pallas_matmul_bias(a, p['wm'], p['b'])
    else:
        out = jnp.dot(a, p['wm'], preferred_element_type=jnp.float32) + p['b']
    return out[:M, :cout]


# ----------------------------------------------------------------------------- #
# Conv / BN / pooling / resize glue (NHWC layout everywhere)
# ----------------------------------------------------------------------------- #
def _center_tap_as_1x1(p, m):
    """Slice the center tap of a 3x3 weight as a standalone 1x1 conv (same bias)."""
    cin, cout, kh, kw = m['cin'], m['cout'], m['kh'], m['kw']
    start = ((kh // 2) * kw + (kw // 2)) * cin
    wc = p['wm'][start:start + cin, :]           # (cin, Np) bf16, real weight rows
    Kp = _round_up(cin, 128)
    if Kp > cin:
        wc = jnp.pad(wc, ((0, Kp - cin), (0, 0)))
    p1 = {'wm': wc, 'b': p['b']}
    m1 = {'kh': 1, 'kw': 1, 'cin': cin, 'cout': cout, 'K': cin, 'Kp': Kp, 'Np': m['Np']}
    return p1, m1


def conv2d(x, p, m, stride=1, padding=0, dilation=1):
    """x: (N, H, W, Cin) -> (N, Ho, Wo, Cout)."""
    N, H, W, Cin = x.shape
    kh, kw = m['kh'], m['kw']

    # Degenerate atrous conv: stride 1, padding == dilation and dilation >= H, W means
    # every non-center tap samples zero padding, so the 3x3 conv IS a 1x1 conv with
    # the center weight slice (ASPP rates 6/12/18 and layer4 rates 2/4/8 at 2x2).
    if (kh == 3 and kw == 3 and stride == 1 and padding == dilation
            and dilation >= H and dilation >= W):
        p, m = _center_tap_as_1x1(p, m)
        kh, kw, padding, dilation = 1, 1, 0, 1

    xb = x.astype(jnp.bfloat16)
    if kh == 1 and kw == 1 and padding == 0 and dilation == 1:
        if stride != 1:
            xb = xb[:, ::stride, ::stride, :]
        Ho, Wo = xb.shape[1], xb.shape[2]
        a = xb.reshape(N * Ho * Wo, Cin)
    else:
        # TODO(synk): fold this kh*kw im2col gather into the A BlockSpec index_map on
        # a pre-padded NHWC input instead of materializing bf16 patches in HBM.
        xp = jnp.pad(xb, ((0, 0), (padding, padding), (padding, padding), (0, 0)))
        Ho = (H + 2 * padding - dilation * (kh - 1) - 1) // stride + 1
        Wo = (W + 2 * padding - dilation * (kw - 1) - 1) // stride + 1
        cols = []
        for i in range(kh):
            for j in range(kw):
                hs, ws = i * dilation, j * dilation
                cols.append(xp[:, hs:hs + stride * (Ho - 1) + 1:stride,
                               ws:ws + stride * (Wo - 1) + 1:stride, :])
        a = jnp.concatenate(cols, axis=-1).reshape(N * Ho * Wo, kh * kw * Cin)
    out = conv_matmul(a, p, m)
    return out.reshape(N, Ho, Wo, m['cout'])


def relu(x):
    return jnp.maximum(x, 0.0)


def batchnorm(x, p, eps=1e-5):
    # BN uses batch statistics (train-mode semantics of the fresh PyTorch module).
    x = x.astype(jnp.float32)
    mean = jnp.mean(x, axis=(0, 1, 2), keepdims=True)
    var = jnp.var(x, axis=(0, 1, 2), keepdims=True)
    return (x - mean) * lax.rsqrt(var + eps) * p['gamma'] + p['beta']


def maxpool_3x3_s2_p1(x):
    return lax.reduce_window(x, -jnp.inf, lax.max,
                             window_dimensions=(1, 3, 3, 1),
                             window_strides=(1, 2, 2, 1),
                             padding=((0, 0), (1, 1), (1, 1), (0, 0)))


def upsample_bilinear(x, scale):
    """PyTorch F.interpolate(mode='bilinear', align_corners=False), NHWC."""
    N, H, W, C = x.shape
    Ho, Wo = H * scale, W * scale

    def src(in_size, out_size):
        s = (jnp.arange(out_size, dtype=jnp.float32) + 0.5) / scale - 0.5
        s = jnp.clip(s, 0.0, in_size - 1)
        i0 = jnp.floor(s).astype(jnp.int32)
        i1 = jnp.minimum(i0 + 1, in_size - 1)
        return i0, i1, s - i0.astype(jnp.float32)

    h0, h1, fh = src(H, Ho)
    w0, w1, fw = src(W, Wo)
    r0 = x[:, h0, :, :]
    r1 = x[:, h1, :, :]
    rows = r0 * (1.0 - fh)[None, :, None, None] + r1 * fh[None, :, None, None]
    c0 = rows[:, :, w0, :]
    c1 = rows[:, :, w1, :]
    return c0 * (1.0 - fw)[None, None, :, None] + c1 * fw[None, None, :, None]


# ----------------------------------------------------------------------------- #
# Parameter initialization (arrays -> params tree, static shapes -> meta tree)
# ----------------------------------------------------------------------------- #
class _KeyGen:
    def __init__(self, seed):
        self._key = jax.random.PRNGKey(seed)

    def __call__(self):
        self._key, sub = jax.random.split(self._key)
        return sub


def conv_init(kg, cout, cin, kh, kw, bias=False):
    std = math.sqrt(2.0 / (kh * kw * cout))
    w = std * jax.random.normal(kg(), (cout, cin, kh, kw), dtype=jnp.float32)
    K = cin * kh * kw
    Kp = _round_up(K, 128)
    Np = _round_up(cout, 128)
    # Pre-transpose to (kh, kw, Cin, Cout), pre-pad to (Kp, Np), pre-cast to bf16.
    wm = jnp.transpose(w, (2, 3, 1, 0)).reshape(K, cout)
    wm = jnp.pad(wm, ((0, Kp - K), (0, Np - cout))).astype(jnp.bfloat16)
    if bias:
        bound = 1.0 / math.sqrt(cin * kh * kw)
        bvec = jax.random.uniform(kg(), (cout,), jnp.float32, -bound, bound)
    else:
        bvec = jnp.zeros((cout,), jnp.float32)
    b = jnp.pad(bvec, (0, Np - cout)).reshape(1, Np)
    params = {'wm': wm, 'b': b}
    meta = {'kh': kh, 'kw': kw, 'cin': cin, 'cout': cout, 'K': K, 'Kp': Kp, 'Np': Np}
    return params, meta


def bn_init(c):
    return {'gamma': jnp.ones((c,), jnp.float32),
            'beta': jnp.zeros((c,), jnp.float32)}


def bottleneck_init(kg, inplanes, planes, stride, rate, downsample):
    p, m = {}, {'stride': stride, 'rate': rate}
    p['conv1'], m['conv1'] = conv_init(kg, planes, inplanes, 1, 1)
    p['bn1'] = bn_init(planes)
    p['conv2'], m['conv2'] = conv_init(kg, planes, planes, 3, 3)
    p['bn2'] = bn_init(planes)
    p['conv3'], m['conv3'] = conv_init(kg, planes * 4, planes, 1, 1)
    p['bn3'] = bn_init(planes * 4)
    if downsample:
        p['ds_conv'], m['ds_conv'] = conv_init(kg, planes * 4, inplanes, 1, 1)
        p['ds_bn'] = bn_init(planes * 4)
    return p, m


def resnet_init(kg, n_channels, layers):
    p, m = {}, {}
    p['conv1'], m['conv1'] = conv_init(kg, 64, n_channels, 7, 7)
    p['bn1'] = bn_init(64)
    inplanes = 64

    def make_layer(planes, blocks, stride, rate):
        nonlocal inplanes
        bp, bm = [], []
        ds = (stride != 1) or (inplanes != planes * 4)
        pp, mm = bottleneck_init(kg, inplanes, planes, stride, rate, ds)
        bp.append(pp); bm.append(mm)
        inplanes = planes * 4
        for _ in range(1, blocks):
            pp, mm = bottleneck_init(kg, inplanes, planes, 1, 1, False)
            bp.append(pp); bm.append(mm)
        return bp, bm

    def make_mg_unit(planes, blocks, stride, rate):
        nonlocal inplanes
        bp, bm = [], []
        ds = (stride != 1) or (inplanes != planes * 4)
        pp, mm = bottleneck_init(kg, inplanes, planes, stride, blocks[0] * rate, ds)
        bp.append(pp); bm.append(mm)
        inplanes = planes * 4
        for i in range(1, len(blocks)):
            pp, mm = bottleneck_init(kg, inplanes, planes, 1, blocks[i] * rate, False)
            bp.append(pp); bm.append(mm)
        return bp, bm

    p['layer1'], m['layer1'] = make_layer(64, layers[0], 1, 1)
    p['layer2'], m['layer2'] = make_layer(128, layers[1], 2, 1)
    p['layer3'], m['layer3'] = make_layer(256, layers[2], 2, 1)
    p['layer4'], m['layer4'] = make_mg_unit(512, [1, 2, 4], 1, 2)
    return p, m


def deeplab_init(kg, n_channels=4, n_classes=1):
    p, m = {}, {}
    p['resnet'], m['resnet'] = resnet_init(kg, n_channels, [3, 8, 36])
    m['rates'] = [1, 6, 12, 18]
    for i in range(4):
        cp, cm = conv_init(kg, 256, 2048, 3, 3, bias=True)
        p[f'aspp{i + 1}'] = {'conv': cp, 'bn': bn_init(256)}
        m[f'aspp{i + 1}'] = {'conv': cm}
    p['image_pool_conv'], m['image_pool_conv'] = conv_init(kg, 256, 2048, 1, 1, bias=True)
    cp, cm = conv_init(kg, 256, 1280, 1, 1, bias=True)
    p['fc1'] = {'conv': cp, 'bn': bn_init(256)}
    m['fc1'] = {'conv': cm}
    pb, mb = conv_init(kg, 32, 256, 1, 1, bias=True)
    pc, mc = conv_init(kg, 32, 256, 1, 1, bias=True)
    pd, md = conv_init(kg, 256, 256, 1, 1, bias=True)
    p['pam'] = {'conv_b': pb, 'conv_c': pc, 'conv_d': pd,
                'alpha': jnp.zeros((1,), jnp.float32)}
    m['pam'] = {'conv_b': mb, 'conv_c': mc, 'conv_d': md}
    p['cam'] = {'beta': jnp.zeros((1,), jnp.float32)}
    rp, rm = conv_init(kg, 48, 256, 1, 1, bias=True)
    p['reduce_conv2'] = {'conv': rp, 'bn': bn_init(48)}
    m['reduce_conv2'] = {'conv': rm}
    c1p, c1m = conv_init(kg, 256, 304, 3, 3, bias=True)
    c2p, c2m = conv_init(kg, 256, 256, 3, 3, bias=True)
    c3p, c3m = conv_init(kg, n_classes, 256, 1, 1, bias=True)
    p['last_conv'] = {'conv1': c1p, 'bn1': bn_init(256),
                      'conv2': c2p, 'bn2': bn_init(256), 'conv3': c3p}
    m['last_conv'] = {'conv1': c1m, 'conv2': c2m, 'conv3': c3m}
    return p, m


# ----------------------------------------------------------------------------- #
# Forward pass (NHWC internally; NCHW at the module boundary)
# ----------------------------------------------------------------------------- #
def bottleneck_fwd(p, m, x):
    stride, rate = m['stride'], m['rate']
    out = conv2d(x, p['conv1'], m['conv1'])
    out = relu(batchnorm(out, p['bn1']))
    out = conv2d(out, p['conv2'], m['conv2'], stride=stride, padding=rate, dilation=rate)
    out = relu(batchnorm(out, p['bn2']))
    out = conv2d(out, p['conv3'], m['conv3'])
    out = batchnorm(out, p['bn3'])
    if 'ds_conv' in p:
        residual = batchnorm(conv2d(x, p['ds_conv'], m['ds_conv'], stride=stride),
                             p['ds_bn'])
    else:
        residual = x
    return relu(out + residual)


def resnet_fwd(p, m, x):
    x = conv2d(x, p['conv1'], m['conv1'], stride=2, padding=3)
    x = relu(batchnorm(x, p['bn1']))
    x = maxpool_3x3_s2_p1(x)
    for bp, bm in zip(p['layer1'], m['layer1']):
        x = bottleneck_fwd(bp, bm, x)
    conv2 = x
    for name in ('layer2', 'layer3', 'layer4'):
        for bp, bm in zip(p[name], m[name]):
            x = bottleneck_fwd(bp, bm, x)
    return x, conv2


def pam_fwd(p, m, x):
    B, H, W, C = x.shape
    fb = conv2d(x, p['conv_b'], m['conv_b']).reshape(B, H * W, -1)   # (B, HW, C//8)
    fc = conv2d(x, p['conv_c'], m['conv_c']).reshape(B, H * W, -1)
    attn = jax.nn.softmax(jnp.einsum('bpk,bqk->bpq', fb, fc), axis=-1)
    fd = conv2d(x, p['conv_d'], m['conv_d']).reshape(B, H * W, C)
    fe = jnp.einsum('bpq,bqc->bpc', attn, fd).reshape(B, H, W, C)
    return p['alpha'] * fe + x


def cam_fwd(p, x):
    B, H, W, C = x.shape
    xf = x.reshape(B, H * W, C)
    attn = jnp.einsum('bpc,bpd->bcd', xf, xf)                        # (B, C, C)
    attn_new = jnp.max(attn, axis=-1, keepdims=True) - attn
    attn = jax.nn.softmax(attn_new, axis=-1)
    fe = jnp.einsum('bcd,bpd->bpc', attn, xf).reshape(B, H, W, C)
    return p['beta'] * fe + x


def deeplab_fwd(p, m, x_nchw):
    x = jnp.transpose(x_nchw, (0, 2, 3, 1))          # NCHW -> NHWC (once)
    x, conv2 = resnet_fwd(p['resnet'], m['resnet'], x)

    aspp = []
    for i, rate in enumerate(m['rates']):
        a = conv2d(x, p[f'aspp{i + 1}']['conv'], m[f'aspp{i + 1}']['conv'],
                   padding=rate, dilation=rate)
        aspp.append(batchnorm(a, p[f'aspp{i + 1}']['bn']))

    x5 = jnp.max(x, axis=(1, 2), keepdims=True)                      # AdaptiveMaxPool2d(1)
    x5 = conv2d(x5, p['image_pool_conv'], m['image_pool_conv']).astype(jnp.float32)
    x5 = jnp.broadcast_to(
        x5, (x5.shape[0],) + aspp[3].shape[1:3] + (x5.shape[3],))    # nearest from 1x1

    x = jnp.concatenate(aspp + [x5], axis=-1)
    x = batchnorm(conv2d(x, p['fc1']['conv'], m['fc1']['conv']), p['fc1']['bn'])

    feat_p = pam_fwd(p['pam'], m['pam'], x)
    feat_c = cam_fwd(p['cam'], x)
    fusion = feat_p + feat_c

    x = upsample_bilinear(fusion, 4)
    low = batchnorm(conv2d(conv2, p['reduce_conv2']['conv'], m['reduce_conv2']['conv']),
                    p['reduce_conv2']['bn'])
    x = jnp.concatenate([x, low], axis=-1)

    lc, lm = p['last_conv'], m['last_conv']
    x = batchnorm(conv2d(x, lc['conv1'], lm['conv1'], padding=1), lc['bn1'])
    x = batchnorm(conv2d(x, lc['conv2'], lm['conv2'], padding=1), lc['bn2'])
    x = conv2d(x, lc['conv3'], lm['conv3']).astype(jnp.float32)
    x = upsample_bilinear(x, 4)
    x = jax.nn.sigmoid(x)
    return jnp.transpose(x, (0, 3, 1, 2))            # NHWC -> NCHW (once)


# ----------------------------------------------------------------------------- #
if __name__ == "__main__":
    kg = _KeyGen(42)
    params, meta = deeplab_init(kg, n_channels=4, n_classes=1)

    # batch=2, channels=4, spatial=32 (divisible by 16 as the architecture requires)
    x = jax.random.normal(jax.random.PRNGKey(0), (2, 4, 32, 32), dtype=jnp.float32)

    fwd = jax.jit(lambda p, xx: deeplab_fwd(p, meta, xx))
    out = fwd(params, x)
    jax.block_until_ready(out)

    assert out.shape == (2, 1, 32, 32), out.shape
    assert bool(jnp.all(jnp.isfinite(out)))
    print("KERNEL_OK")
</pallas_src>

<mosaic_0001>
module attributes {stable_mosaic.version = 11 : i64} {
  func.func @_matmul_bias_kernel_1step(%arg0: i32, %arg1: i32, %arg2: memref<256x256xbf16, #tpu.memory_space<vmem>>, %arg3: memref<256x128xbf16, #tpu.memory_space<vmem>>, %arg4: memref<1x128xf32, #tpu.memory_space<vmem>>, %arg5: memref<256x128xbf16, #tpu.memory_space<vmem>>) attributes {dimension_semantics = [#tpu.dimension_semantics<parallel>, #tpu.dimension_semantics<parallel>], iteration_bounds = array<i64: 2, 1>, scalar_prefetch = 0 : i64, scratch_operands = 0 : i64, tpu.core_type = #tpu.core_type<tc>, window_params = [{transform_indices = @transform_0, window_bounds = array<i64: 256, 256>}, {transform_indices = @transform_1, window_bounds = array<i64: 256, 128>}, {transform_indices = @transform_2, window_bounds = array<i64: 1, 128>}, {transform_indices = @transform_3, window_bounds = array<i64: 256, 128>}]} {
    %c0 = arith.constant 0 : index
    %c0_0 = arith.constant 0 : index
    %0 = vector.load %arg2[%c0, %c0_0] : memref<256x256xbf16, #tpu.memory_space<vmem>>, vector<256x256xbf16>
    %c0_1 = arith.constant 0 : index
    %c0_2 = arith.constant 0 : index
    %1 = vector.load %arg3[%c0_1, %c0_2] : memref<256x128xbf16, #tpu.memory_space<vmem>>, vector<256x128xbf16>
    %cst = arith.constant dense<0.000000e+00> : vector<256x128xf32>
    %2 = tpu.matmul %0, %1, %cst {dimension_numbers = #tpu.dot_dimension_numbers<[1], [0], [0], [1], [0, 0, 1, 1], [], []>} : vector<256x256xbf16>, vector<256x128xbf16>, vector<256x128xf32> -> vector<256x128xf32>
    %c0_3 = arith.constant 0 : index
    %c0_4 = arith.constant 0 : index
    %3 = vector.load %arg4[%c0_3, %c0_4] : memref<1x128xf32, #tpu.memory_space<vmem>>, vector<1x128xf32>
    %4 = vector.broadcast %3 : vector<1x128xf32> to vector<256x128xf32>
    %5 = arith.addf %2, %4 : vector<256x128xf32>
    %6 = arith.truncf %5 : vector<256x128xf32> to vector<256x128xbf16>
    %c0_5 = arith.constant 0 : index
    %c0_6 = arith.constant 0 : index
    %7 = vector.load %arg5[%c0_5, %c0_6] : memref<256x128xbf16, #tpu.memory_space<vmem>>, vector<256x128xbf16>
    tpu.vector_store %arg5[%c0_5, %c0_6], %6 {strides = array<i32>} : memref<256x128xbf16, #tpu.memory_space<vmem>>, vector<256x128xbf16>,
    return
  }
  func.func @transform_0(%arg0: i32, %arg1: i32) -> (i32, i32) {
    %c0_i32 = arith.constant 0 : i32
    %c0_i32_0 = arith.constant 0 : i32
    return %arg0, %c0_i32 : i32, i32
  }
  func.func @transform_1(%arg0: i32, %arg1: i32) -> (i32, i32) {
    %c0_i32 = arith.constant 0 : i32
    %c0_i32_0 = arith.constant 0 : i32
    return %c0_i32, %arg1 : i32, i32
  }
  func.func @transform_2(%arg0: i32, %arg1: i32) -> (i32, i32) {
    %c0_i32 = arith.constant 0 : i32
    %c0_i32_0 = arith.constant 0 : i32
    return %c0_i32, %arg1 : i32, i32
  }
  func.func @transform_3(%arg0: i32, %arg1: i32) -> (i32, i32) {
    %c0_i32 = arith.constant 0 : i32
    return %arg0, %arg1 : i32, i32
  }
}

module attributes {stable_mosaic.version = 11 : i64} {
  func.func @_matmul_bias_kernel_1step(%arg0: i32, %arg1: i32, %arg2: memref<128x640xbf16, #tpu.memory_space<vmem>>, %arg3: memref<640x128xbf16, #tpu.memory_space<vmem>>, %arg4: memref<1x128xf32, #tpu.memory_space<vmem>>, %arg5: memref<128x128xbf16, #tpu.memory_space<vmem>>) attributes {dimension_semantics = [#tpu.dimension_semantics<parallel>, #tpu.dimension_semantics<parallel>], iteration_bounds = array<i64: 1, 1>, scalar_prefetch = 0 : i64, scratch_operands = 0 : i64, tpu.core_type = #tpu.core_type<tc>, window_params = [{transform_indices = @transform_0, window_bounds = array<i64: 128, 640>}, {transform_indices = @transform_1, window_bounds = array<i64: 640, 128>}, {transform_indices = @transform_2, window_bounds = array<i64: 1, 128>}, {transform_indices = @transform_3, window_bounds = array<i64: 128, 128>}]} {
    %c0 = arith.constant 0 : index
    %c0_0 = arith.constant 0 : index
    %0 = vector.load %arg2[%c0, %c0_0] : memref<128x640xbf16, #tpu.memory_space<vmem>>, vector<128x640xbf16>
    %c0_1 = arith.constant 0 : index
    %c0_2 = arith.constant 0 : index
    %1 = vector.load %arg3[%c0_1, %c0_2] : memref<640x128xbf16, #tpu.memory_space<vmem>>, vector<640x128xbf16>
    %cst = arith.constant dense<0.000000e+00> : vector<128x128xf32>
    %2 = tpu.matmul %0, %1, %cst {dimension_numbers = #tpu.dot_dimension_numbers<[1], [0], [0], [1], [0, 0, 1, 1], [], []>} : vector<128x640xbf16>, vector<640x128xbf16>, vector<128x128xf32> -> vector<128x128xf32>
    %c0_3 = arith.constant 0 : index
    %c0_4 = arith.constant 0 : index
    %3 = vector.load %arg4[%c0_3, %c0_4] : memref<1x128xf32, #tpu.memory_space<vmem>>, vector<1x128xf32>
    %4 = vector.broadcast %3 : vector<1x128xf32> to vector<128x128xf32>
    %5 = arith.addf %2, %4 : vector<128x128xf32>
    %6 = arith.truncf %5 : vector<128x128xf32> to vector<128x128xbf16>
    %c0_5 = arith.constant 0 : index
    %c0_6 = arith.constant 0 : index
    %7 = vector.load %arg5[%c0_5, %c0_6] : memref<128x128xbf16, #tpu.memory_space<vmem>>, vector<128x128xbf16>
    tpu.vector_store %arg5[%c0_5, %c0_6], %6 {strides = array<i32>} : memref<128x128xbf16, #tpu.memory_space<vmem>>, vector<128x128xbf16>,
    return
  }
  func.func @transform_0(%arg0: i32, %arg1: i32) -> (i32, i32) {
    %c0_i32 = arith.constant 0 : i32
    %c0_i32_0 = arith.constant 0 : i32
    return %arg0, %c0_i32 : i32, i32
  }
  func.func @transform_1(%arg0: i32, %arg1: i32) -> (i32, i32) {
    %c0_i32 = arith.constant 0 : i32
    %c0_i32_0 = arith.constant 0 : i32
    return %c0_i32, %arg1 : i32, i32
  }
  func.func @transform_2(%arg0: i32, %arg1: i32) -> (i32, i32) {
    %c0_i32 = arith.constant 0 : i32
    %c0_i32_0 = arith.constant 0 : i32
    return %c0_i32, %arg1 : i32, i32
  }
  func.func @transform_3(%arg0: i32, %arg1: i32) -> (i32, i32) {
    %c0_i32 = arith.constant 0 : i32
    return %arg0, %arg1 : i32, i32
  }
}

module attributes {stable_mosaic.version = 11 : i64} {
  func.func @_matmul_bias_kernel_1step(%arg0: i32, %arg1: i32, %arg2: memref<128x256xbf16, #tpu.memory_space<vmem>>, %arg3: memref<256x128xbf16, #tpu.memory_space<vmem>>, %arg4: memref<1x128xf32, #tpu.memory_space<vmem>>, %arg5: memref<128x128xbf16, #tpu.memory_space<vmem>>) attributes {dimension_semantics = [#tpu.dimension_semantics<parallel>, #tpu.dimension_semantics<parallel>], iteration_bounds = array<i64: 1, 1>, scalar_prefetch = 0 : i64, scratch_operands = 0 : i64, tpu.core_type = #tpu.core_type<tc>, window_params = [{transform_indices = @transform_0, window_bounds = array<i64: 128, 256>}, {transform_indices = @transform_1, window_bounds = array<i64: 256, 128>}, {transform_indices = @transform_2, window_bounds = array<i64: 1, 128>}, {transform_indices = @transform_3, window_bounds = array<i64: 128, 128>}]} {
    %c0 = arith.constant 0 : index
    %c0_0 = arith.constant 0 : index
    %0 = vector.load %arg2[%c0, %c0_0] : memref<128x256xbf16, #tpu.memory_space<vmem>>, vector<128x256xbf16>
    %c0_1 = arith.constant 0 : index
    %c0_2 = arith.constant 0 : index
    %1 = vector.load %arg3[%c0_1, %c0_2] : memref<256x128xbf16, #tpu.memory_space<vmem>>, vector<256x128xbf16>
    %cst = arith.constant dense<0.000000e+00> : vector<128x128xf32>
    %2 = tpu.matmul %0, %1, %cst {dimension_numbers = #tpu.dot_dimension_numbers<[1], [0], [0], [1], [0, 0, 1, 1], [], []>} : vector<128x256xbf16>, vector<256x128xbf16>, vector<128x128xf32> -> vector<128x128xf32>
    %c0_3 = arith.constant 0 : index
    %c0_4 = arith.constant 0 : index
    %3 = vector.load %arg4[%c0_3, %c0_4] : memref<1x128xf32, #tpu.memory_space<vmem>>, vector<1x128xf32>
    %4 = vector.broadcast %3 : vector<1x128xf32> to vector<128x128xf32>
    %5 = arith.addf %2, %4 : vector<128x128xf32>
    %6 = arith.truncf %5 : vector<128x128xf32> to vector<128x128xbf16>
    %c0_5 = arith.constant 0 : index
    %c0_6 = arith.constant 0 : index
    %7 = vector.load %arg5[%c0_5, %c0_6] : memref<128x128xbf16, #tpu.memory_space<vmem>>, vector<128x128xbf16>
    tpu.vector_store %arg5[%c0_5, %c0_6], %6 {strides = array<i32>} : memref<128x128xbf16, #tpu.memory_space<vmem>>, vector<128x128xbf16>,
    return
  }
  func.func @transform_0(%arg0: i32, %arg1: i32) -> (i32, i32) {
    %c0_i32 = arith.constant 0 : i32
    %c0_i32_0 = arith.constant 0 : i32
    return %arg0, %c0_i32 : i32, i32
  }
  func.func @transform_1(%arg0: i32, %arg1: i32) -> (i32, i32) {
    %c0_i32 = arith.constant 0 : i32
    %c0_i32_0 = arith.constant 0 : i32
    return %c0_i32, %arg1 : i32, i32
  }
  func.func @transform_2(%arg0: i32, %arg1: i32) -> (i32, i32) {
    %c0_i32 = arith.constant 0 : i32
    %c0_i32_0 = arith.constant 0 : i32
    return %c0_i32, %arg1 : i32, i32
  }
  func.func @transform_3(%arg0: i32, %arg1: i32) -> (i32, i32) {
    %c0_i32 = arith.constant 0 : i32
    return %arg0, %arg1 : i32, i32
  }
}

module attributes {stable_mosaic.version = 11 : i64} {
  func.func @_matmul_bias_kernel_1step(%arg0: i32, %arg1: i32, %arg2: memref<128x2816xbf16, #tpu.memory_space<vmem>>, %arg3: memref<2816x256xbf16, #tpu.memory_space<vmem>>, %arg4: memref<1x256xf32, #tpu.memory_space<vmem>>, %arg5: memref<128x256xbf16, #tpu.memory_space<vmem>>) attributes {dimension_semantics = [#tpu.dimension_semantics<parallel>, #tpu.dimension_semantics<parallel>], iteration_bounds = array<i64: 1, 1>, scalar_prefetch = 0 : i64, scratch_operands = 0 : i64, tpu.core_type = #tpu.core_type<tc>, window_params = [{transform_indices = @transform_0, window_bounds = array<i64: 128, 2816>}, {transform_indices = @transform_1, window_bounds = array<i64: 2816, 256>}, {transform_indices = @transform_2, window_bounds = array<i64: 1, 256>}, {transform_indices = @transform_3, window_bounds = array<i64: 128, 256>}]} {
    %c0 = arith.constant 0 : index
    %c0_0 = arith.constant 0 : index
    %0 = vector.load %arg2[%c0, %c0_0] : memref<128x2816xbf16, #tpu.memory_space<vmem>>, vector<128x2816xbf16>
    %c0_1 = arith.constant 0 : index
    %c0_2 = arith.constant 0 : index
    %1 = vector.load %arg3[%c0_1, %c0_2] : memref<2816x256xbf16, #tpu.memory_space<vmem>>, vector<2816x256xbf16>
    %cst = arith.constant dense<0.000000e+00> : vector<128x256xf32>
    %2 = tpu.matmul %0, %1, %cst {dimension_numbers = #tpu.dot_dimension_numbers<[1], [0], [0], [1], [0, 0, 1, 1], [], []>} : vector<128x2816xbf16>, vector<2816x256xbf16>, vector<128x256xf32> -> vector<128x256xf32>
    %c0_3 = arith.constant 0 : index
    %c0_4 = arith.constant 0 : index
    %3 = vector.load %arg4[%c0_3, %c0_4] : memref<1x256xf32, #tpu.memory_space<vmem>>, vector<1x256xf32>
    %4 = vector.broadcast %3 : vector<1x256xf32> to vector<128x256xf32>
    %5 = arith.addf %2, %4 : vector<128x256xf32>
    %6 = arith.truncf %5 : vector<128x256xf32> to vector<128x256xbf16>
    %c0_5 = arith.constant 0 : index
    %c0_6 = arith.constant 0 : index
    %7 = vector.load %arg5[%c0_5, %c0_6] : memref<128x256xbf16, #tpu.memory_space<vmem>>, vector<128x256xbf16>
    tpu.vector_store %arg5[%c0_5, %c0_6], %6 {strides = array<i32>} : memref<128x256xbf16, #tpu.memory_space<vmem>>, vector<128x256xbf16>,
    return
  }
  func.func @transform_0(%arg0: i32, %arg1: i32) -> (i32, i32) {
    %c0_i32 = arith.constant 0 : i32
    %c0_i32_0 = arith.constant 0 : i32
    return %arg0, %c0_i32 : i32, i32
  }
  func.func @transform_1(%arg0: i32, %arg1: i32) -> (i32, i32) {
    %c0_i32 = arith.constant 0 : i32
    %c0_i32_0 = arith.constant 0 : i32
    return %c0_i32, %arg1 : i32, i32
  }
  func.func @transform_2(%arg0: i32, %arg1: i32) -> (i32, i32) {
    %c0_i32 = arith.constant 0 : i32
    %c0_i32_0 = arith.constant 0 : i32
    return %c0_i32, %arg1 : i32, i32
  }
  func.func @transform_3(%arg0: i32, %arg1: i32) -> (i32, i32) {
    %c0_i32 = arith.constant 0 : i32
    return %arg0, %arg1 : i32, i32
  }
}

module attributes {stable_mosaic.version = 11 : i64} {
  func.func @_matmul_bias_kernel_1step(%arg0: i32, %arg1: i32, %arg2: memref<128x2304xbf16, #tpu.memory_space<vmem>>, %arg3: memref<2304x256xbf16, #tpu.memory_space<vmem>>, %arg4: memref<1x256xf32, #tpu.memory_space<vmem>>, %arg5: memref<128x256xbf16, #tpu.memory_space<vmem>>) attributes {dimension_semantics = [#tpu.dimension_semantics<parallel>, #tpu.dimension_semantics<parallel>], iteration_bounds = array<i64: 1, 1>, scalar_prefetch = 0 : i64, scratch_operands = 0 : i64, tpu.core_type = #tpu.core_type<tc>, window_params = [{transform_indices = @transform_0, window_bounds = array<i64: 128, 2304>}, {transform_indices = @transform_1, window_bounds = array<i64: 2304, 256>}, {transform_indices = @transform_2, window_bounds = array<i64: 1, 256>}, {transform_indices = @transform_3, window_bounds = array<i64: 128, 256>}]} {
    %c0 = arith.constant 0 : index
    %c0_0 = arith.constant 0 : index
    %0 = vector.load %arg2[%c0, %c0_0] : memref<128x2304xbf16, #tpu.memory_space<vmem>>, vector<128x2304xbf16>
    %c0_1 = arith.constant 0 : index
    %c0_2 = arith.constant 0 : index
    %1 = vector.load %arg3[%c0_1, %c0_2] : memref<2304x256xbf16, #tpu.memory_space<vmem>>, vector<2304x256xbf16>
    %cst = arith.constant dense<0.000000e+00> : vector<128x256xf32>
    %2 = tpu.matmul %0, %1, %cst {dimension_numbers = #tpu.dot_dimension_numbers<[1], [0], [0], [1], [0, 0, 1, 1], [], []>} : vector<128x2304xbf16>, vector<2304x256xbf16>, vector<128x256xf32> -> vector<128x256xf32>
    %c0_3 = arith.constant 0 : index
    %c0_4 = arith.constant 0 : index
    %3 = vector.load %arg4[%c0_3, %c0_4] : memref<1x256xf32, #tpu.memory_space<vmem>>, vector<1x256xf32>
    %4 = vector.broadcast %3 : vector<1x256xf32> to vector<128x256xf32>
    %5 = arith.addf %2, %4 : vector<128x256xf32>
    %6 = arith.truncf %5 : vector<128x256xf32> to vector<128x256xbf16>
    %c0_5 = arith.constant 0 : index
    %c0_6 = arith.constant 0 : index
    %7 = vector.load %arg5[%c0_5, %c0_6] : memref<128x256xbf16, #tpu.memory_space<vmem>>, vector<128x256xbf16>
    tpu.vector_store %arg5[%c0_5, %c0_6], %6 {strides = array<i32>} : memref<128x256xbf16, #tpu.memory_space<vmem>>, vector<128x256xbf16>,
    return
  }
  func.func @transform_0(%arg0: i32, %arg1: i32) -> (i32, i32) {
    %c0_i32 = arith.constant 0 : i32
    %c0_i32_0 = arith.constant 0 : i32
    return %arg0, %c0_i32 : i32, i32
  }
  func.func @transform_1(%arg0: i32, %arg1: i32) -> (i32, i32) {
    %c0_i32 = arith.constant 0 : i32
    %c0_i32_0 = arith.constant 0 : i32
    return %c0_i32, %arg1 : i32, i32
  }
  func.func @transform_2(%arg0: i32, %arg1: i32) -> (i32, i32) {
    %c0_i32 = arith.constant 0 : i32
    %c0_i32_0 = arith.constant 0 : i32
    return %c0_i32, %arg1 : i32, i32
  }
  func.func @transform_3(%arg0: i32, %arg1: i32) -> (i32, i32) {
    %c0_i32 = arith.constant 0 : i32
    return %arg0, %arg1 : i32, i32
  }
}

</mosaic_0001>

<bundles_post_ra>
// kernel: _lambda_.9
= control target key start
LH: loop header
LB: loop body
LE: loop exit
PB: predicated region body
PF: predicated region fallthrough
CT: control target
= control target key end

     0   :  { %s1462_s12 = smov 0   ;;  %s1464_s13 = smov 0   ;;  %s1636_s0 = inlined_call_operand.vmem [shape: bf16[512,256], index: 0, kind: input, shape index: {}]   ;;  %s1637_s1 = inlined_call_operand.vmem [shape: bf16[256,128], index: 1, kind: input, shape index: {}]   ;;  %s1638_s2 = inlined_call_operand.vmem [shape: f32[1,128], index: 2, kind: input, shape index: {}]   ;;  %s1639_s3 = inlined_call_operand.vmem [shape: bf16[512,128], index: 3, kind: output, shape index: {}]  }
   0x1   :  { %s1466_s14 = smov 0  }
   0x2 LB: > { %s25_s15 = sadd.s32 1, %s1436_s13  ;;  %p985_p0 = scmp.ge.s32.totalorder %s1440_s14, 1  ;;  %s1440_s14 = sphi %s1466_s14, %s13_s14   ;;  %s1436_s13 = sphi %s1464_s13, %s1641_s13   ;;  %s1432_s12 = sphi %s1462_s12, %s1640_s12  }
   0x3   : > { %p27_p1 = scmp.ge.s32.totalorder %s25_s15, 2  ;;  %p170_p2 = scmp.lt.s32.totalorder %s1440_s14, 3 }
   0x5   : > { %s1643_s15 = smov (%p27_p1, %s25_s15), 0  ;;  %p171_p3 = pnand %p985_p0, %p170_p2 }
   0x6   : > { %v1354_v0 = vld [vmem:[%s1637_s1 + $0x40] sm:$0xff] (!%p171_p3)   ;;  %s986_s18 = sshll.u32 (!%p171_p3), %s1432_s12, 5  ;;  %v1356_v2 = vld [vmem:[%s1637_s1 + $0x48] sm:$0xff] (!%p171_p3)   ;;  %v1358_v4 = vld [vmem:[%s1637_s1 + $0x50] sm:$0xff] (!%p171_p3)  }
   0x7   : > { %174 = sbr.rel (%p171_p3) target bundleno = 317 (0x13d), region = 32  ;;  %v1355_v1 = vld [vmem:[%s1637_s1] sm:$0xff] (!%p171_p3)   ;;  %1202 = vmatprep.subr.bf16.mxu0 (!%p171_p3), %v1354_v0  ;;  %1314 = vmatprep.subr.bf16.mxu1 (!%p171_p3), %v1354_v0  ;;  %v1357_v3 = vld [vmem:[%s1637_s1 + $0x8] sm:$0xff] (!%p171_p3)   ;;  %p206_p4 = scmp.lt.s32.totalorder (!%p171_p3), %s986_s18, 63  ;;  %v1359_v5 = vld [vmem:[%s1637_s1 + $0x10] sm:$0xff] (!%p171_p3)  }
   0x8   : > { %1203 = vmatpush3.bf16.msra.mxu0 (!%p171_p3), %v1355_v1  ;;  %1322 = vmatpush3.bf16.msra.mxu1 (!%p171_p3), %v1355_v1  ;;  %v1360_v6 = vld [vmem:[%s1637_s1 + $0x58] sm:$0xff] (!%p171_p3)   ;;  %v1362_v8 = vld [vmem:[%s1637_s1 + $0x60] sm:$0xff] (!%p171_p3)   ;;  %v1364_v10 = vld [vmem:[%s1637_s1 + $0x68] sm:$0xff] (!%p171_p3)  }
   0x9   : > { %1204 = vmatprep.subr.bf16.mxu0 (!%p171_p3), %v1356_v2  ;;  %1315 = vmatprep.subr.bf16.mxu1 (!%p171_p3), %v1356_v2  ;;  %v1361_v7 = vld [vmem:[%s1637_s1 + $0x18] sm:$0xff] (!%p171_p3)   ;;  %v1363_v9 = vld [vmem:[%s1637_s1 + $0x20] sm:$0xff] (!%p171_p3)   ;;  %v1365_v13 = vld [vmem:[%s1637_s1 + $0x28] sm:$0xff] (!%p171_p3)  }
   0xa   : > { %v1366_v14 = vld [vmem:[%s1637_s1 + $0x70] sm:$0xff] (!%p171_p3)   ;;  %v1368_v16 = vld [vmem:[%s1637_s1 + $0x78] sm:$0xff] (!%p171_p3)   ;;  %v1571_v56 = vld [vmem:[%s1638_s2] ss:$0 sm:$0xff] (!%p171_p3) }
   0xb   : > { %v1367_v15 = vld [vmem:[%s1637_s1 + $0x30] sm:$0xff] (!%p171_p3)   ;;  %v1369_v17 = vld [vmem:[%s1637_s1 + $0x38] sm:$0xff] (!%p171_p3)  }
   0xc   : > { %1205 = vmatpush3.bf16.msra.mxu0 (!%p171_p3), %v1357_v3  ;;  %1323 = vmatpush3.bf16.msra.mxu1 (!%p171_p3), %v1357_v3 }
   0xd   : > { %1206 = vmatprep.subr.bf16.mxu0 (!%p171_p3), %v1358_v4  ;;  %1316 = vmatprep.subr.bf16.mxu1 (!%p171_p3), %v1358_v4 }
   0xe   : > { %s1645_s18 = smov (!%p206_p4, %s986_s18), 63 }
   0xf   : > { %s1074_s6 = sshll.u32 %s1645_s18, 3  ;;  %s990_s5 = sshll.u32 %s1645_s18, 2 }
  0x10   : > { %1207 = vmatpush3.bf16.msra.mxu0 %v1359_v5  ;;  %1324 = vmatpush3.bf16.msra.mxu1 %v1359_v5  ;;  %s1513_s11 = scalar_lea.vmem %s1636_s0, %s1074_s6  ;;  %s1581_s8 = scalar_lea.vmem %s1639_s3, %s990_s5 }
  0x11   : > { %1208 = vmatprep.subr.bf16.mxu0 %v1360_v6  ;;  %1317 = vmatprep.subr.bf16.mxu1 %v1360_v6  ;;  %v1372_v11 = vld [vmem:[%s1513_s11 + $0x4] ss:$8 sps:$4 sm:$0xff]   ;;  %v1370_v18 = vld [vmem:[%s1513_s11] ss:$8 sps:$4 sm:$0xff]   ;;  %v1376_v20 = vld [vmem:[%s1513_s11 + $0x14] ss:$8 sps:$4 sm:$0xff]  }
  0x12   : > { %v1375_v12 = vld [vmem:[%s1513_s11 + $0x84] ss:$8 sps:$4 sm:$0xff]   ;;  %588 = vmatprep.mubr.bf16.mxu0 %v1372_v11  ;;  %v1373_v19 = vld [vmem:[%s1513_s11 + $0x80] ss:$8 sps:$4 sm:$0xff]   ;;  %v1378_v21 = vld [vmem:[%s1513_s11 + $0x94] ss:$8 sps:$4 sm:$0xff]  }
  0x13   : > { %652 = vmatprep.mubr.bf16.mxu1 %v1375_v12  ;;  %v1380_v22 = vld [vmem:[%s1513_s11 + $0x10] ss:$8 sps:$4 sm:$0xff]   ;;  %v1382_v24 = vld [vmem:[%s1513_s11 + $0x24] ss:$8 sps:$4 sm:$0xff]   ;;  %v1386_v26 = vld [vmem:[%s1513_s11 + $0x20] ss:$8 sps:$4 sm:$0xff]  }
  0x14   : > { %1209 = vmatpush3.bf16.msra.mxu0 %v1361_v7  ;;  %1325 = vmatpush3.bf16.msra.mxu1 %v1361_v7  ;;  %v1381_v23 = vld [vmem:[%s1513_s11 + $0x90] ss:$8 sps:$4 sm:$0xff]   ;;  %v1384_v25 = vld [vmem:[%s1513_s11 + $0xa4] ss:$8 sps:$4 sm:$0xff]   ;;  %v1387_v27 = vld [vmem:[%s1513_s11 + $0xa0] ss:$8 sps:$4 sm:$0xff]  }
  0x15   : > { %1210 = vmatprep.subr.bf16.mxu0 %v1362_v8  ;;  %1318 = vmatprep.subr.bf16.mxu1 %v1362_v8  ;;  %v1388_v28 = vld [vmem:[%s1513_s11 + $0x34] ss:$8 sps:$4 sm:$0xff]   ;;  %v1392_v30 = vld [vmem:[%s1513_s11 + $0x30] ss:$8 sps:$4 sm:$0xff]   ;;  %v1394_v32 = vld [vmem:[%s1513_s11 + $0x44] ss:$8 sps:$4 sm:$0xff]  }
  0x16   : > { %v1390_v29 = vld [vmem:[%s1513_s11 + $0xb4] ss:$8 sps:$4 sm:$0xff]   ;;  %v1393_v31 = vld [vmem:[%s1513_s11 + $0xb0] ss:$8 sps:$4 sm:$0xff]   ;;  %v1396_v33 = vld [vmem:[%s1513_s11 + $0xc4] ss:$8 sps:$4 sm:$0xff]  }
  0x17   : > { %v1398_v34 = vld [vmem:[%s1513_s11 + $0x40] ss:$8 sps:$4 sm:$0xff]   ;;  %v1400_v36 = vld [vmem:[%s1513_s11 + $0x54] ss:$8 sps:$4 sm:$0xff]   ;;  %v1404_v38 = vld [vmem:[%s1513_s11 + $0x50] ss:$8 sps:$4 sm:$0xff]  }
  0x18   : > { %1211 = vmatpush3.bf16.msra.mxu0 %v1363_v9  ;;  %1326 = vmatpush3.bf16.msra.mxu1 %v1363_v9  ;;  %v1399_v35 = vld [vmem:[%s1513_s11 + $0xc0] ss:$8 sps:$4 sm:$0xff]   ;;  %v1402_v37 = vld [vmem:[%s1513_s11 + $0xd4] ss:$8 sps:$4 sm:$0xff]   ;;  %v1405_v39 = vld [vmem:[%s1513_s11 + $0xd0] ss:$8 sps:$4 sm:$0xff]  }
  0x19   : > { %1212 = vmatprep.subr.bf16.mxu0 %v1364_v10  ;;  %1319 = vmatprep.subr.bf16.mxu1 %v1364_v10  ;;  %v1406_v40 = vld [vmem:[%s1513_s11 + $0x64] ss:$8 sps:$4 sm:$0xff]   ;;  %v1410_v42 = vld [vmem:[%s1513_s11 + $0x60] ss:$8 sps:$4 sm:$0xff]   ;;  %v1412_v44 = vld [vmem:[%s1513_s11 + $0x74] ss:$8 sps:$4 sm:$0xff]  }
  0x1a   : > { %v1408_v41 = vld [vmem:[%s1513_s11 + $0xe4] ss:$8 sps:$4 sm:$0xff]   ;;  %v1411_v43 = vld [vmem:[%s1513_s11 + $0xe0] ss:$8 sps:$4 sm:$0xff]   ;;  %v1414_v45 = vld [vmem:[%s1513_s11 + $0xf4] ss:$8 sps:$4 sm:$0xff]  }
  0x1b   : > { %v1416_v46 = vld [vmem:[%s1513_s11 + $0x70] ss:$8 sps:$4 sm:$0xff]  }
  0x1c   : > { %1213 = vmatpush3.bf16.msra.mxu0 %v1365_v13  ;;  %1327 = vmatpush3.bf16.msra.mxu1 %v1365_v13  ;;  %v1417_v47 = vld [vmem:[%s1513_s11 + $0xf0] ss:$8 sps:$4 sm:$0xff]  }
  0x1d   : > { %1214 = vmatprep.subr.bf16.mxu0 %v1366_v14  ;;  %1320 = vmatprep.subr.bf16.mxu1 %v1366_v14 }
  0x20   : > { %1215 = vmatpush3.bf16.msra.mxu0 %v1367_v15  ;;  %1328 = vmatpush3.bf16.msra.mxu1 %v1367_v15 }
  0x21   : > { %1216 = vmatprep.subr.bf16.mxu0 %v1368_v16  ;;  %1321 = vmatprep.subr.bf16.mxu1 %v1368_v16 }
  0x24   : > { %1217 = vmatpush3.bf16.msra.mxu0 %v1369_v17  ;;  %1329 = vmatpush3.bf16.msra.mxu1 %v1369_v17 }
  0x27   : > { %589 = vmatmul.mubr.bf16.vlgmr.msra.gmra.mrb[0].mxu0 %v1370_v18  ;;  %653 = vmatmul.mubr.bf16.vlgmr.msra.gmra.mrb[0].mxu1 %v1373_v19 }
  0x28   : > { %596 = vmatprep.mubr.bf16.mxu0 %v1376_v20  ;;  %660 = vmatprep.mubr.bf16.mxu1 %v1378_v21 }
  0x2f   : > { %597 = vmatmul.mubr.bf16.gmra.mrb[4].mxu0 %v1380_v22  ;;  %661 = vmatmul.mubr.bf16.gmra.mrb[4].mxu1 %v1381_v23 }
  0x30   : > { %604 = vmatprep.mubr.bf16.mxu0 %v1382_v24  ;;  %668 = vmatprep.mubr.bf16.mxu1 %v1384_v25 }
  0x37   : > { %605 = vmatmul.mubr.bf16.gmra.mrb[8].mxu0 %v1386_v26  ;;  %669 = vmatmul.mubr.bf16.gmra.mrb[8].mxu1 %v1387_v27 }
  0x38   : > { %612 = vmatprep.mubr.bf16.mxu0 %v1388_v28  ;;  %676 = vmatprep.mubr.bf16.mxu1 %v1390_v29 }
  0x3f   : > { %613 = vmatmul.mubr.bf16.gmra.mrb[12].mxu0 %v1392_v30  ;;  %677 = vmatmul.mubr.bf16.gmra.mrb[12].mxu1 %v1393_v31 }
  0x40   : > { %620 = vmatprep.mubr.bf16.mxu0 %v1394_v32  ;;  %684 = vmatprep.mubr.bf16.mxu1 %v1396_v33 }
  0x47   : > { %621 = vmatmul.mubr.bf16.gmra.mrb[16].mxu0 %v1398_v34  ;;  %685 = vmatmul.mubr.bf16.gmra.mrb[16].mxu1 %v1399_v35 }
  0x48   : > { %628 = vmatprep.mubr.bf16.mxu0 %v1400_v36  ;;  %692 = vmatprep.mubr.bf16.mxu1 %v1402_v37 }
  0x4f   : > { %629 = vmatmul.mubr.bf16.gmra.mrb[20].mxu0 %v1404_v38  ;;  %693 = vmatmul.mubr.bf16.gmra.mrb[20].mxu1 %v1405_v39 }
  0x50   : > { %636 = vmatprep.mubr.bf16.mxu0 %v1406_v40  ;;  %700 = vmatprep.mubr.bf16.mxu1 %v1408_v41 }
  0x57   : > { %637 = vmatmul.mubr.bf16.gmra.mrb[24].mxu0 %v1410_v42  ;;  %701 = vmatmul.mubr.bf16.gmra.mrb[24].mxu1 %v1411_v43 }
  0x58   : > { %644 = vmatprep.mubr.bf16.mxu0 %v1412_v44  ;;  %708 = vmatprep.mubr.bf16.mxu1 %v1414_v45 }
  0x5f   : > { %645 = vmatmul.mubr.bf16.gmra.mrb[28].mxu0 %v1416_v46  ;;  %709 = vmatmul.mubr.bf16.gmra.mrb[28].mxu1 %v1417_v47 }
  0xfa   : > { %v1218_v48 = vpop.f32.mrb[0].mxu0  ;;  %v1266_v49 = vpop.f32.mrb[0].mxu1 }
  0xfb   : > { %v1219_v50 = vpop.f32.mrb[1].mxu0  ;;  %v1267_v51 = vpop.f32.mrb[1].mxu1 }
  0xfc   : > { %v1220_v52 = vadd.f32 %v1219_v50, %v1218_v48  ;;  %v1268_v53 = vadd.f32 %v1267_v51, %v1266_v49  ;;  %v1221_v54 = vpop.f32.mrb[2].mxu0  ;;  %v1269_v55 = vpop.f32.mrb[2].mxu1 }
  0xfd   : > { %v1222_v57 = vpop.f32.mrb[3].mxu0  ;;  %v1270_v58 = vpop.f32.mrb[3].mxu1 }
  0xfe   : > { %v1223_v59 = vadd.f32 %v1222_v57, %v1221_v54  ;;  %v1271_v60 = vadd.f32 %v1270_v58, %v1269_v55  ;;  %v591_v61 = vadd.f32 %v1220_v52, %v1571_v56  ;;  %v655_v62 = vadd.f32 %v1268_v53, %v1571_v56 }
 0x100   : > { %v594_v63 = vadd.f32 %v1223_v59, %v1571_v56  ;;  %v658_v0 = vadd.f32 %v1271_v60, %v1571_v56 }
 0x102   : > { %v1110_v1 = vpack.c.bf16 %v594_v63, %v591_v61  ;;  %v1150_v2 = vpack.c.bf16 %v658_v0, %v655_v62  ;;  %v1224_v3 = vpop.f32.mrb[4].mxu0  ;;  %v1272_v4 = vpop.f32.mrb[4].mxu1 }
 0x103   : > { %v1225_v5 = vpop.f32.mrb[5].mxu0  ;;  %v1273_v6 = vpop.f32.mrb[5].mxu1 }
 0x104   : > { %1111 = vst [vmem:[%s1581_s8] sm:$0xff] %v1110_v1   ;;  %1194 = vst [vmem:[%s1581_s8 + $0x40] sm:$0xff] %v1150_v2   ;;  %v1226_v7 = vadd.f32 %v1225_v5, %v1224_v3  ;;  %v1274_v8 = vadd.f32 %v1273_v6, %v1272_v4  ;;  %v1227_v9 = vpop.f32.mrb[6].mxu0  ;;  %v1275_v10 = vpop.f32.mrb[6].mxu1 }
 0x105   : > { %v1228_v11 = vpop.f32.mrb[7].mxu0  ;;  %v1276_v12 = vpop.f32.mrb[7].mxu1 }
 0x106   : > { %v1229_v13 = vadd.f32 %v1228_v11, %v1227_v9  ;;  %v1277_v14 = vadd.f32 %v1276_v12, %v1275_v10  ;;  %v599_v15 = vadd.f32 %v1226_v7, %v1571_v56  ;;  %v663_v16 = vadd.f32 %v1274_v8, %v1571_v56 }
 0x108   : > { %v602_v17 = vadd.f32 %v1229_v13, %v1571_v56  ;;  %v666_v18 = vadd.f32 %v1277_v14, %v1571_v56 }
 0x10a   : > { %v1115_v19 = vpack.c.bf16 %v602_v17, %v599_v15  ;;  %v1155_v20 = vpack.c.bf16 %v666_v18, %v663_v16  ;;  %v1230_v21 = vpop.f32.mrb[8].mxu0  ;;  %v1278_v22 = vpop.f32.mrb[8].mxu1 }
 0x10b   : > { %v1231_v23 = vpop.f32.mrb[9].mxu0  ;;  %v1279_v24 = vpop.f32.mrb[9].mxu1 }
 0x10c   : > { %1187 = vst [vmem:[%s1581_s8 + $0x8] sm:$0xff] %v1115_v19   ;;  %1195 = vst [vmem:[%s1581_s8 + $0x48] sm:$0xff] %v1155_v20   ;;  %v1232_v25 = vadd.f32 %v1231_v23, %v1230_v21  ;;  %v1280_v26 = vadd.f32 %v1279_v24, %v1278_v22  ;;  %v1233_v27 = vpop.f32.mrb[10].mxu0  ;;  %v1281_v28 = vpop.f32.mrb[10].mxu1 }
 0x10d   : > { %v1234_v29 = vpop.f32.mrb[11].mxu0  ;;  %v1282_v30 = vpop.f32.mrb[11].mxu1 }
 0x10e   : > { %v1235_v31 = vadd.f32 %v1234_v29, %v1233_v27  ;;  %v1283_v32 = vadd.f32 %v1282_v30, %v1281_v28  ;;  %v607_v33 = vadd.f32 %v1232_v25, %v1571_v56  ;;  %v671_v34 = vadd.f32 %v1280_v26, %v1571_v56 }
 0x110   : > { %v610_v35 = vadd.f32 %v1235_v31, %v1571_v56  ;;  %v674_v36 = vadd.f32 %v1283_v32, %v1571_v56 }
 0x112   : > { %v1120_v37 = vpack.c.bf16 %v610_v35, %v607_v33  ;;  %v1160_v38 = vpack.c.bf16 %v674_v36, %v671_v34  ;;  %v1236_v39 = vpop.f32.mrb[12].mxu0  ;;  %v1284_v40 = vpop.f32.mrb[12].mxu1 }
 0x113   : > { %v1237_v41 = vpop.f32.mrb[13].mxu0  ;;  %v1285_v42 = vpop.f32.mrb[13].mxu1 }
 0x114   : > { %1188 = vst [vmem:[%s1581_s8 + $0x10] sm:$0xff] %v1120_v37   ;;  %1196 = vst [vmem:[%s1581_s8 + $0x50] sm:$0xff] %v1160_v38   ;;  %v1238_v43 = vadd.f32 %v1237_v41, %v1236_v39  ;;  %v1286_v44 = vadd.f32 %v1285_v42, %v1284_v40  ;;  %v1239_v45 = vpop.f32.mrb[14].mxu0  ;;  %v1287_v46 = vpop.f32.mrb[14].mxu1 }
 0x115   : > { %v1240_v47 = vpop.f32.mrb[15].mxu0  ;;  %v1288_v48 = vpop.f32.mrb[15].mxu1 }
 0x116   : > { %v1241_v49 = vadd.f32 %v1240_v47, %v1239_v45  ;;  %v1289_v50 = vadd.f32 %v1288_v48, %v1287_v46  ;;  %v615_v51 = vadd.f32 %v1238_v43, %v1571_v56  ;;  %v679_v52 = vadd.f32 %v1286_v44, %v1571_v56 }
 0x118   : > { %v618_v53 = vadd.f32 %v1241_v49, %v1571_v56  ;;  %v682_v54 = vadd.f32 %v1289_v50, %v1571_v56 }
 0x11a   : > { %v1125_v55 = vpack.c.bf16 %v618_v53, %v615_v51  ;;  %v1165_v57 = vpack.c.bf16 %v682_v54, %v679_v52  ;;  %v1242_v58 = vpop.f32.mrb[16].mxu0  ;;  %v1290_v59 = vpop.f32.mrb[16].mxu1 }
 0x11b   : > { %v1243_v60 = vpop.f32.mrb[17].mxu0  ;;  %v1291_v61 = vpop.f32.mrb[17].mxu1 }
 0x11c   : > { %1189 = vst [vmem:[%s1581_s8 + $0x18] sm:$0xff] %v1125_v55   ;;  %1197 = vst [vmem:[%s1581_s8 + $0x58] sm:$0xff] %v1165_v57   ;;  %v1244_v62 = vadd.f32 %v1243_v60, %v1242_v58  ;;  %v1292_v63 = vadd.f32 %v1291_v61, %v1290_v59  ;;  %v1245_v0 = vpop.f32.mrb[18].mxu0  ;;  %v1293_v1 = vpop.f32.mrb[18].mxu1 }
 0x11d   : > { %v1246_v2 = vpop.f32.mrb[19].mxu0  ;;  %v1294_v3 = vpop.f32.mrb[19].mxu1 }
 0x11e   : > { %v1247_v4 = vadd.f32 %v1246_v2, %v1245_v0  ;;  %v1295_v5 = vadd.f32 %v1294_v3, %v1293_v1  ;;  %v623_v6 = vadd.f32 %v1244_v62, %v1571_v56  ;;  %v687_v7 = vadd.f32 %v1292_v63, %v1571_v56 }
 0x120   : > { %v626_v8 = vadd.f32 %v1247_v4, %v1571_v56  ;;  %v690_v9 = vadd.f32 %v1295_v5, %v1571_v56 }
 0x122   : > { %v1130_v10 = vpack.c.bf16 %v626_v8, %v623_v6  ;;  %v1170_v11 = vpack.c.bf16 %v690_v9, %v687_v7  ;;  %v1248_v12 = vpop.f32.mrb[20].mxu0  ;;  %v1296_v13 = vpop.f32.mrb[20].mxu1 }
 0x123   : > { %v1249_v14 = vpop.f32.mrb[21].mxu0  ;;  %v1297_v15 = vpop.f32.mrb[21].mxu1 }
 0x124   : > { %1190 = vst [vmem:[%s1581_s8 + $0x20] sm:$0xff] %v1130_v10   ;;  %1198 = vst [vmem:[%s1581_s8 + $0x60] sm:$0xff] %v1170_v11   ;;  %v1250_v16 = vadd.f32 %v1249_v14, %v1248_v12  ;;  %v1298_v17 = vadd.f32 %v1297_v15, %v1296_v13  ;;  %v1251_v18 = vpop.f32.mrb[22].mxu0  ;;  %v1299_v19 = vpop.f32.mrb[22].mxu1 }
 0x125   : > { %v1252_v20 = vpop.f32.mrb[23].mxu0  ;;  %v1300_v21 = vpop.f32.mrb[23].mxu1 }
 0x126   : > { %v1253_v22 = vadd.f32 %v1252_v20, %v1251_v18  ;;  %v1301_v23 = vadd.f32 %v1300_v21, %v1299_v19  ;;  %v631_v24 = vadd.f32 %v1250_v16, %v1571_v56  ;;  %v695_v25 = vadd.f32 %v1298_v17, %v1571_v56 }
 0x128   : > { %v634_v26 = vadd.f32 %v1253_v22, %v1571_v56  ;;  %v698_v27 = vadd.f32 %v1301_v23, %v1571_v56 }
 0x12a   : > { %v1135_v28 = vpack.c.bf16 %v634_v26, %v631_v24  ;;  %v1175_v29 = vpack.c.bf16 %v698_v27, %v695_v25  ;;  %v1254_v30 = vpop.f32.mrb[24].mxu0  ;;  %v1302_v31 = vpop.f32.mrb[24].mxu1 }
 0x12b   : > { %v1255_v32 = vpop.f32.mrb[25].mxu0  ;;  %v1303_v33 = vpop.f32.mrb[25].mxu1 }
 0x12c   : > { %1191 = vst [vmem:[%s1581_s8 + $0x28] sm:$0xff] %v1135_v28   ;;  %1199 = vst [vmem:[%s1581_s8 + $0x68] sm:$0xff] %v1175_v29   ;;  %v1256_v34 = vadd.f32 %v1255_v32, %v1254_v30  ;;  %v1304_v35 = vadd.f32 %v1303_v33, %v1302_v31  ;;  %v1257_v36 = vpop.f32.mrb[26].mxu0  ;;  %v1305_v37 = vpop.f32.mrb[26].mxu1 }
 0x12d   : > { %v1258_v38 = vpop.f32.mrb[27].mxu0  ;;  %v1306_v39 = vpop.f32.mrb[27].mxu1 }
 0x12e   : > { %v1259_v40 = vadd.f32 %v1258_v38, %v1257_v36  ;;  %v1307_v41 = vadd.f32 %v1306_v39, %v1305_v37  ;;  %v639_v42 = vadd.f32 %v1256_v34, %v1571_v56  ;;  %v703_v43 = vadd.f32 %v1304_v35, %v1571_v56 }
 0x130   : > { %v642_v44 = vadd.f32 %v1259_v40, %v1571_v56  ;;  %v706_v45 = vadd.f32 %v1307_v41, %v1571_v56 }
 0x132   : > { %v1140_v46 = vpack.c.bf16 %v642_v44, %v639_v42  ;;  %v1180_v47 = vpack.c.bf16 %v706_v45, %v703_v43  ;;  %v1260_v48 = vpop.f32.mrb[28].mxu0  ;;  %v1308_v49 = vpop.f32.mrb[28].mxu1 }
 0x133   : > { %v1261_v50 = vpop.f32.mrb[29].mxu0  ;;  %v1309_v51 = vpop.f32.mrb[29].mxu1 }
 0x134   : > { %1192 = vst [vmem:[%s1581_s8 + $0x30] sm:$0xff] %v1140_v46   ;;  %1200 = vst [vmem:[%s1581_s8 + $0x70] sm:$0xff] %v1180_v47   ;;  %v1262_v52 = vadd.f32 %v1261_v50, %v1260_v48  ;;  %v1310_v53 = vadd.f32 %v1309_v51, %v1308_v49  ;;  %v1263_v54 = vpop.f32.mrb[30].mxu0  ;;  %v1311_v55 = vpop.f32.mrb[30].mxu1 }
 0x135   : > { %v1264_v57 = vpop.f32.mrb[31].mxu0  ;;  %v1312_v58 = vpop.f32.mrb[31].mxu1 }
 0x136   : > { %v1265_v59 = vadd.f32 %v1264_v57, %v1263_v54  ;;  %v1313_v60 = vadd.f32 %v1312_v58, %v1311_v55  ;;  %v647_v61 = vadd.f32 %v1262_v52, %v1571_v56  ;;  %v711_v62 = vadd.f32 %v1310_v53, %v1571_v56 }
 0x138   : > { %v650_v63 = vadd.f32 %v1265_v59, %v1571_v56  ;;  %v714_v0 = vadd.f32 %v1313_v60, %v1571_v56 }
 0x13a   : > { %v1145_v1 = vpack.c.bf16 %v650_v63, %v647_v61  ;;  %v1185_v2 = vpack.c.bf16 %v714_v0, %v711_v62 }
 0x13c   : > { %1193 = vst [vmem:[%s1581_s8 + $0x38] sm:$0xff] %v1145_v1   ;;  %1201 = vst [vmem:[%s1581_s8 + $0x78] sm:$0xff] %v1185_v2  }
 0x13d PF: > { %s13_s14 = sadd.s32 1, %s1440_s14   ;;  %s1640_s12 = smov %s1436_s13 }
 0x13e   : > { %p10_p5 = scmp.ge.s32.totalorder %s13_s14, 4   ;;  %s1641_s13 = smov %s1643_s15 }
 0x140   :  { %12 = sbr.rel (!%p10_p5) target bundleno = 2 (0x2), region = 68 }

// kernel: _lambda_.10
= control target key start
LH: loop header
LB: loop body
LE: loop exit
PB: predicated region body
PF: predicated region fallthrough
CT: control target
= control target key end

     0   :  { %s1610_s1 = inlined_call_operand.vmem [shape: bf16[640,128], index: 1, kind: input, shape index: {}]   ;;  %s1611_s0 = inlined_call_operand.vmem [shape: bf16[128,640], index: 0, kind: input, shape index: {}]   ;;  %s1612_s2 = inlined_call_operand.vmem [shape: f32[1,128], index: 2, kind: input, shape index: {}]   ;;  %s1613_s3 = inlined_call_operand.vmem [shape: bf16[128,128], index: 3, kind: output, shape index: {}]  }
   0x1   :  { %v1182_v0 = vld [vmem:[%s1610_s1 + $0x40] sm:$0xff]   ;;  %v1186_v4 = vld [vmem:[%s1610_s1 + $0x48] sm:$0xff]   ;;  %v1190_v8 = vld [vmem:[%s1610_s1 + $0x50] sm:$0xff]  }
   0x2   :  { %v1183_v1 = vld [vmem:[%s1610_s1 + $0xc0] sm:$0xff]   ;;  %990 = vmatprep.subr.bf16.mxu0 %v1182_v0  ;;  %v1187_v5 = vld [vmem:[%s1610_s1 + $0xc8] sm:$0xff]   ;;  %v1191_v9 = vld [vmem:[%s1610_s1 + $0xd0] sm:$0xff]  }
   0x3   :  { %v1184_v2 = vld [vmem:[%s1610_s1] sm:$0xff]   ;;  %1054 = vmatprep.subr.bf16.mxu1 %v1183_v1  ;;  %v1188_v6 = vld [vmem:[%s1610_s1 + $0x8] sm:$0xff]   ;;  %v1192_v10 = vld [vmem:[%s1610_s1 + $0x10] sm:$0xff]  }
   0x4   :  { %v1185_v3 = vld [vmem:[%s1610_s1 + $0x80] sm:$0xff]   ;;  %991 = vmatpush3.bf16.msra.mxu0 %v1184_v2  ;;  %v1189_v7 = vld [vmem:[%s1610_s1 + $0x88] sm:$0xff]   ;;  %v1193_v11 = vld [vmem:[%s1610_s1 + $0x90] sm:$0xff]  }
   0x5   :  { %1055 = vmatpush3.bf16.msra.mxu1 %v1185_v3  ;;  %992 = vmatprep.subr.bf16.mxu0 %v1186_v4  ;;  %v1194_v12 = vld [vmem:[%s1610_s1 + $0x58] sm:$0xff]   ;;  %v1198_v16 = vld [vmem:[%s1610_s1 + $0x60] sm:$0xff]   ;;  %v1202_v20 = vld [vmem:[%s1610_s1 + $0x68] sm:$0xff]  }
   0x6   :  { %1056 = vmatprep.subr.bf16.mxu1 %v1187_v5  ;;  %v1195_v13 = vld [vmem:[%s1610_s1 + $0xd8] sm:$0xff]   ;;  %v1199_v17 = vld [vmem:[%s1610_s1 + $0xe0] sm:$0xff]   ;;  %v1203_v21 = vld [vmem:[%s1610_s1 + $0xe8] sm:$0xff]  }
   0x7   :  { %v1196_v14 = vld [vmem:[%s1610_s1 + $0x18] sm:$0xff]   ;;  %v1200_v18 = vld [vmem:[%s1610_s1 + $0x20] sm:$0xff]   ;;  %v1204_v22 = vld [vmem:[%s1610_s1 + $0x28] sm:$0xff]  }
   0x8   :  { %993 = vmatpush3.bf16.msra.mxu0 %v1188_v6  ;;  %v1197_v15 = vld [vmem:[%s1610_s1 + $0x98] sm:$0xff]   ;;  %v1201_v19 = vld [vmem:[%s1610_s1 + $0xa0] sm:$0xff]   ;;  %v1205_v23 = vld [vmem:[%s1610_s1 + $0xa8] sm:$0xff]  }
   0x9   :  { %1057 = vmatpush3.bf16.msra.mxu1 %v1189_v7  ;;  %994 = vmatprep.subr.bf16.mxu0 %v1190_v8  ;;  %v1206_v24 = vld [vmem:[%s1610_s1 + $0x70] sm:$0xff]   ;;  %v1210_v28 = vld [vmem:[%s1610_s1 + $0x78] sm:$0xff]   ;;  %v1219_v35 = vld [vmem:[%s1611_s0 + $0xc] ss:$20 sps:$4 sm:$0xff]  }
   0xa   :  { %1058 = vmatprep.subr.bf16.mxu1 %v1191_v9  ;;  %v1207_v25 = vld [vmem:[%s1610_s1 + $0xf0] sm:$0xff]   ;;  %v1211_v29 = vld [vmem:[%s1610_s1 + $0xf8] sm:$0xff]   ;;  %v1220_v36 = vld [vmem:[%s1610_s1 + $0x100] sm:$0xff]   ;;  %727 = vmatprep.mubr.bf16.mxu1 %v1219_v35 }
   0xb   :  { %v1208_v26 = vld [vmem:[%s1610_s1 + $0x30] sm:$0xff]   ;;  %v1212_v30 = vld [vmem:[%s1610_s1 + $0x38] sm:$0xff]   ;;  %v1221_v37 = vld [vmem:[%s1611_s0 + $0x2c] ss:$20 sps:$4 sm:$0xff]  }
   0xc   :  { %995 = vmatpush3.bf16.msra.mxu0 %v1192_v10  ;;  %v1209_v27 = vld [vmem:[%s1610_s1 + $0xb0] sm:$0xff]   ;;  %v1213_v31 = vld [vmem:[%s1610_s1 + $0xb8] sm:$0xff]   ;;  %v1227_v39 = vld [vmem:[%s1610_s1 + $0x108] sm:$0xff]  }
   0xd   :  { %1059 = vmatpush3.bf16.msra.mxu1 %v1193_v11  ;;  %996 = vmatprep.subr.bf16.mxu0 %v1194_v12  ;;  %v1214_v32 = vld [vmem:[%s1611_s0] ss:$20 sps:$4 sm:$0xff]   ;;  %v1216_v33 = vld [vmem:[%s1611_s0 + $0x4] ss:$20 sps:$4 sm:$0xff]   ;;  %v1217_v34 = vld [vmem:[%s1611_s0 + $0x8] ss:$20 sps:$4 sm:$0xff]  }
   0xe   :  { %1060 = vmatprep.subr.bf16.mxu1 %v1195_v13  ;;  %630 = vmatprep.mubr.bf16.mxu0 %v1216_v33  ;;  %v1223_v38 = vld [vmem:[%s1611_s0 + $0x34] ss:$20 sps:$4 sm:$0xff]   ;;  %v1226_v41 = vld [vmem:[%s1611_s0 + $0x30] ss:$20 sps:$4 sm:$0xff]   ;;  %v1241_v45 = vld [vmem:[%s1610_s1 + $0x118] sm:$0xff]  }
   0xf   :  { %v1225_v40 = vld [vmem:[%s1611_s0 + $0x28] ss:$20 sps:$4 sm:$0xff]   ;;  %v1234_v44 = vld [vmem:[%s1610_s1 + $0x110] sm:$0xff]   ;;  %v1233_v47 = vld [vmem:[%s1611_s0 + $0x58] ss:$20 sps:$4 sm:$0xff]  }
  0x10   :  { %997 = vmatpush3.bf16.msra.mxu0 %v1196_v14  ;;  %v1228_v42 = vld [vmem:[%s1611_s0 + $0x54] ss:$20 sps:$4 sm:$0xff]   ;;  %v1230_v43 = vld [vmem:[%s1611_s0 + $0x5c] ss:$20 sps:$4 sm:$0xff]   ;;  %v1237_v49 = vld [vmem:[%s1611_s0 + $0x84] ss:$20 sps:$4 sm:$0xff]  }
  0x11   :  { %1061 = vmatpush3.bf16.msra.mxu1 %v1197_v15  ;;  %998 = vmatprep.subr.bf16.mxu0 %v1198_v16  ;;  %v1232_v46 = vld [vmem:[%s1611_s0 + $0x50] ss:$20 sps:$4 sm:$0xff]   ;;  %v1255_v51 = vld [vmem:[%s1610_s1 + $0x128] sm:$0xff]   ;;  %v1240_v53 = vld [vmem:[%s1611_s0 + $0x80] ss:$20 sps:$4 sm:$0xff]  }
  0x12   :  { %1062 = vmatprep.subr.bf16.mxu1 %v1199_v17  ;;  %v1235_v48 = vld [vmem:[%s1611_s0 + $0x7c] ss:$20 sps:$4 sm:$0xff]   ;;  %v1248_v50 = vld [vmem:[%s1610_s1 + $0x120] sm:$0xff]   ;;  %v1239_v52 = vld [vmem:[%s1611_s0 + $0x78] ss:$20 sps:$4 sm:$0xff]  }
  0x13   :  { %v1242_v54 = vld [vmem:[%s1611_s0 + $0xa4] ss:$20 sps:$4 sm:$0xff]   ;;  %v1262_v55 = vld [vmem:[%s1610_s1 + $0x130] sm:$0xff]   ;;  %v1244_v56 = vld [vmem:[%s1611_s0 + $0xac] ss:$20 sps:$4 sm:$0xff]  }
  0x14   :  { %999 = vmatpush3.bf16.msra.mxu0 %v1200_v18  ;;  %v1269_v57 = vld [vmem:[%s1610_s1 + $0x138] sm:$0xff]   ;;  %v1246_v58 = vld [vmem:[%s1611_s0 + $0xa0] ss:$20 sps:$4 sm:$0xff]   ;;  %v1254_v63 = vld [vmem:[%s1611_s0 + $0xd0] ss:$20 sps:$4 sm:$0xff]  }
  0x15   :  { %1063 = vmatpush3.bf16.msra.mxu1 %v1201_v19  ;;  %1000 = vmatprep.subr.bf16.mxu0 %v1202_v20  ;;  %v1247_v59 = vld [vmem:[%s1611_s0 + $0xa8] ss:$20 sps:$4 sm:$0xff]   ;;  %v1249_v60 = vld [vmem:[%s1611_s0 + $0xcc] ss:$20 sps:$4 sm:$0xff]   ;;  %v1260_v2 = vld [vmem:[%s1611_s0 + $0xf0] ss:$20 sps:$4 sm:$0xff]  }
  0x16   :  { %1064 = vmatprep.subr.bf16.mxu1 %v1203_v21  ;;  %v1251_v61 = vld [vmem:[%s1611_s0 + $0xd4] ss:$20 sps:$4 sm:$0xff]   ;;  %v1258_v1 = vld [vmem:[%s1611_s0 + $0xfc] ss:$20 sps:$4 sm:$0xff]   ;;  %v1261_v3 = vld [vmem:[%s1611_s0 + $0xf8] ss:$20 sps:$4 sm:$0xff]  }
  0x17   :  { %v1253_v62 = vld [vmem:[%s1611_s0 + $0xc8] ss:$20 sps:$4 sm:$0xff]   ;;  %v1265_v5 = vld [vmem:[%s1611_s0 + $0x124] ss:$20 sps:$4 sm:$0xff]   ;;  %v1268_v7 = vld [vmem:[%s1611_s0 + $0x120] ss:$20 sps:$4 sm:$0xff]  }
  0x18   :  { %1001 = vmatpush3.bf16.msra.mxu0 %v1204_v22  ;;  %v1256_v0 = vld [vmem:[%s1611_s0 + $0xf4] ss:$20 sps:$4 sm:$0xff]   ;;  %v1263_v4 = vld [vmem:[%s1611_s0 + $0x11c] ss:$20 sps:$4 sm:$0xff]   ;;  %v1267_v6 = vld [vmem:[%s1611_s0 + $0x118] ss:$20 sps:$4 sm:$0xff]  }
  0x19   :  { %1065 = vmatpush3.bf16.msra.mxu1 %v1205_v23  ;;  %1002 = vmatprep.subr.bf16.mxu0 %v1206_v24  ;;  %v1270_v8 = vld [vmem:[%s1611_s0 + $0x10] ss:$20 sps:$4 sm:$0xff]   ;;  %v1272_v10 = vld [vmem:[%s1611_s0 + $0x38] ss:$20 sps:$4 sm:$0xff]   ;;  %v1274_v12 = vld [vmem:[%s1611_s0 + $0x60] ss:$20 sps:$4 sm:$0xff]  }
  0x1a   :  { %1066 = vmatprep.subr.bf16.mxu1 %v1207_v25  ;;  %v1271_v9 = vld [vmem:[%s1611_s0 + $0xb0] ss:$20 sps:$4 sm:$0xff]   ;;  %v1273_v11 = vld [vmem:[%s1611_s0 + $0xd8] ss:$20 sps:$4 sm:$0xff]   ;;  %v1275_v13 = vld [vmem:[%s1611_s0 + $0x100] ss:$20 sps:$4 sm:$0xff]  }
  0x1b   :  { %v1276_v14 = vld [vmem:[%s1611_s0 + $0x88] ss:$20 sps:$4 sm:$0xff]   ;;  %v1541_v18 = vld [vmem:[%s1612_s2] ss:$0 sm:$0xff] }
  0x1c   :  { %1003 = vmatpush3.bf16.msra.mxu0 %v1208_v26  ;;  %v1277_v15 = vld [vmem:[%s1611_s0 + $0x128] ss:$20 sps:$4 sm:$0xff]  }
  0x1d   :  { %1067 = vmatpush3.bf16.msra.mxu1 %v1209_v27  ;;  %1004 = vmatprep.subr.bf16.mxu0 %v1210_v28 }
  0x1e   :  { %1068 = vmatprep.subr.bf16.mxu1 %v1211_v29 }
  0x20   :  { %1005 = vmatpush3.bf16.msra.mxu0 %v1212_v30 }
  0x21   :  { %1069 = vmatpush3.bf16.msra.mxu1 %v1213_v31  ;;  %1134 = vmatprep.subr.bf16.mxu0 %v1220_v36 }
  0x22   :  { %1166 = vmatprep.subr.bf16.mxu1 %v1220_v36 }
  0x23   :  { %631 = vmatmul.mubr.bf16.vlgmr.msra.gmra.mrb[0].mxu0 %v1214_v32 }
  0x24   :  { %728 = vmatmul.mubr.bf16.vlgmr.msra.gmra.mrb[0].mxu1 %v1217_v34  ;;  %1135 = vmatpush3.bf16.msra.mxu0 %v1220_v36 }
  0x25   :  { %1174 = vmatpush3.bf16.msra.mxu1 %v1220_v36  ;;  %638 = vmatprep.mubr.bf16.mxu0 %v1221_v37 }
  0x26   :  { %735 = vmatprep.mubr.bf16.mxu1 %v1223_v38  ;;  %1136 = vmatprep.subr.bf16.mxu0 %v1227_v39 }
  0x27   :  { %1167 = vmatprep.subr.bf16.mxu1 %v1227_v39 }
  0x28   :  { %1137 = vmatpush3.bf16.msra.mxu0 %v1227_v39 }
  0x29   :  { %1175 = vmatpush3.bf16.msra.mxu1 %v1227_v39  ;;  %1138 = vmatprep.subr.bf16.mxu0 %v1234_v44 }
  0x2a   :  { %1168 = vmatprep.subr.bf16.mxu1 %v1234_v44 }
  0x2b   :  { %639 = vmatmul.mubr.bf16.gmra.mrb[4].mxu0 %v1225_v40 }
  0x2c   :  { %736 = vmatmul.mubr.bf16.gmra.mrb[4].mxu1 %v1226_v41  ;;  %646 = vmatprep.mubr.bf16.mxu0 %v1228_v42 }
  0x2d   :  { %743 = vmatprep.mubr.bf16.mxu1 %v1230_v43  ;;  %1139 = vmatpush3.bf16.msra.mxu0 %v1234_v44 }
  0x2e   :  { %1176 = vmatpush3.bf16.msra.mxu1 %v1234_v44  ;;  %1140 = vmatprep.subr.bf16.mxu0 %v1241_v45 }
  0x2f   :  { %1169 = vmatprep.subr.bf16.mxu1 %v1241_v45 }
  0x31   :  { %1141 = vmatpush3.bf16.msra.mxu0 %v1241_v45 }
  0x32   :  { %1177 = vmatpush3.bf16.msra.mxu1 %v1241_v45  ;;  %1142 = vmatprep.subr.bf16.mxu0 %v1248_v50 }
  0x33   :  { %647 = vmatmul.mubr.bf16.gmra.mrb[8].mxu0 %v1232_v46  ;;  %1170 = vmatprep.subr.bf16.mxu1 %v1248_v50 }
  0x34   :  { %744 = vmatmul.mubr.bf16.gmra.mrb[8].mxu1 %v1233_v47  ;;  %654 = vmatprep.mubr.bf16.mxu0 %v1235_v48 }
  0x35   :  { %751 = vmatprep.mubr.bf16.mxu1 %v1237_v49  ;;  %1143 = vmatpush3.bf16.msra.mxu0 %v1248_v50 }
  0x36   :  { %1178 = vmatpush3.bf16.msra.mxu1 %v1248_v50  ;;  %1144 = vmatprep.subr.bf16.mxu0 %v1255_v51 }
  0x37   :  { %1171 = vmatprep.subr.bf16.mxu1 %v1255_v51 }
  0x39   :  { %1145 = vmatpush3.bf16.msra.mxu0 %v1255_v51 }
  0x3a   :  { %1179 = vmatpush3.bf16.msra.mxu1 %v1255_v51  ;;  %1146 = vmatprep.subr.bf16.mxu0 %v1262_v55 }
  0x3b   :  { %655 = vmatmul.mubr.bf16.gmra.mrb[12].mxu0 %v1239_v52  ;;  %1172 = vmatprep.subr.bf16.mxu1 %v1262_v55 }
  0x3c   :  { %752 = vmatmul.mubr.bf16.gmra.mrb[12].mxu1 %v1240_v53  ;;  %662 = vmatprep.mubr.bf16.mxu0 %v1242_v54 }
  0x3d   :  { %759 = vmatprep.mubr.bf16.mxu1 %v1244_v56  ;;  %1147 = vmatpush3.bf16.msra.mxu0 %v1262_v55 }
  0x3e   :  { %1180 = vmatpush3.bf16.msra.mxu1 %v1262_v55  ;;  %1148 = vmatprep.subr.bf16.mxu0 %v1269_v57 }
  0x3f   :  { %1173 = vmatprep.subr.bf16.mxu1 %v1269_v57 }
  0x41   :  { %1149 = vmatpush3.bf16.msra.mxu0 %v1269_v57 }
  0x42   :  { %1181 = vmatpush3.bf16.msra.mxu1 %v1269_v57 }
  0x43   :  { %663 = vmatmul.mubr.bf16.gmra.mrb[16].mxu0 %v1246_v58 }
  0x44   :  { %760 = vmatmul.mubr.bf16.gmra.mrb[16].mxu1 %v1247_v59  ;;  %670 = vmatprep.mubr.bf16.mxu0 %v1249_v60 }
  0x45   :  { %767 = vmatprep.mubr.bf16.mxu1 %v1251_v61 }
  0x4b   :  { %671 = vmatmul.mubr.bf16.gmra.mrb[20].mxu0 %v1253_v62 }
  0x4c   :  { %768 = vmatmul.mubr.bf16.gmra.mrb[20].mxu1 %v1254_v63  ;;  %678 = vmatprep.mubr.bf16.mxu0 %v1256_v0 }
  0x4d   :  { %775 = vmatprep.mubr.bf16.mxu1 %v1258_v1 }
  0x53   :  { %679 = vmatmul.mubr.bf16.gmra.mrb[24].mxu0 %v1260_v2 }
  0x54   :  { %776 = vmatmul.mubr.bf16.gmra.mrb[24].mxu1 %v1261_v3  ;;  %686 = vmatprep.mubr.bf16.mxu0 %v1263_v4 }
  0x55   :  { %783 = vmatprep.mubr.bf16.mxu1 %v1265_v5 }
  0x5b   :  { %687 = vmatmul.mubr.bf16.gmra.mrb[28].mxu0 %v1267_v6 }
  0x5c   :  { %784 = vmatmul.mubr.bf16.gmra.mrb[28].mxu1 %v1268_v7  ;;  %1150 = vmatprep.mubr.bf16.mxu0 %v1270_v8 }
  0x5d   :  { %1158 = vmatprep.mubr.bf16.mxu1 %v1271_v9 }
  0x63   :  { %1151 = vmatmul.mubr.bf16.vlgmr.msra.gmra.mrb[32].mxu0 %v1272_v10 }
  0x64   :  { %1159 = vmatmul.mubr.bf16.vlgmr.msra.gmra.mrb[32].mxu1 %v1273_v11  ;;  %1154 = vmatprep.mubr.bf16.mxu0 %v1274_v12 }
  0x65   :  { %1162 = vmatprep.mubr.bf16.mxu1 %v1275_v13 }
  0x6b   :  { %1155 = vmatmul.mubr.bf16.gmra.mrb[36].mxu0 %v1276_v14 }
  0x6c   :  { %1163 = vmatmul.mubr.bf16.gmra.mrb[36].mxu1 %v1277_v15 }
  0xf6   :  { %v1006_v16 = vpop.f32.mrb[0].mxu0 }
  0xf7   :  { %v1070_v17 = vpop.f32.mrb[0].mxu1  ;;  %v1007_v19 = vpop.f32.mrb[1].mxu0 }
  0xf8   :  { %v1008_v20 = vadd.f32 %v1007_v19, %v1006_v16  ;;  %v1071_v21 = vpop.f32.mrb[1].mxu1  ;;  %v1009_v22 = vpop.f32.mrb[2].mxu0 }
  0xf9   :  { %v1072_v23 = vadd.f32 %v1071_v21, %v1070_v17  ;;  %v1073_v24 = vpop.f32.mrb[2].mxu1  ;;  %v1010_v25 = vpop.f32.mrb[3].mxu0 }
  0xfa   :  { %v633_v26 = vadd.f32 %v1008_v20, %v1541_v18  ;;  %v1011_v27 = vadd.f32 %v1010_v25, %v1009_v22  ;;  %v1074_v28 = vpop.f32.mrb[3].mxu1 }
  0xfb   :  { %v1075_v29 = vadd.f32 %v1074_v28, %v1073_v24 }
  0xfc   :  { %v636_v30 = vadd.f32 %v1011_v27, %v1541_v18  ;;  %v1545_v31 = vadd.f32 %v1072_v23, %v633_v26 }
  0xfe   :  { %v1012_v32 = vpop.f32.mrb[4].mxu0  ;;  %v1547_v33 = vadd.f32 %v1075_v29, %v636_v30 }
  0xff   :  { %v1076_v34 = vpop.f32.mrb[4].mxu1  ;;  %v1013_v35 = vpop.f32.mrb[5].mxu0 }
 0x100   :  { %v1014_v36 = vadd.f32 %v1013_v35, %v1012_v32  ;;  %v1077_v37 = vpop.f32.mrb[5].mxu1  ;;  %v1015_v38 = vpop.f32.mrb[6].mxu0 }
 0x101   :  { %v1078_v39 = vadd.f32 %v1077_v37, %v1076_v34  ;;  %v1079_v40 = vpop.f32.mrb[6].mxu1  ;;  %v1016_v41 = vpop.f32.mrb[7].mxu0 }
 0x102   :  { %v641_v42 = vadd.f32 %v1014_v36, %v1541_v18  ;;  %v1017_v43 = vadd.f32 %v1016_v41, %v1015_v38  ;;  %v1080_v44 = vpop.f32.mrb[7].mxu1 }
 0x103   :  { %v1081_v45 = vadd.f32 %v1080_v44, %v1079_v40 }
 0x104   :  { %v644_v46 = vadd.f32 %v1017_v43, %v1541_v18  ;;  %v1551_v47 = vadd.f32 %v1078_v39, %v641_v42 }
 0x106   :  { %v1018_v48 = vpop.f32.mrb[8].mxu0  ;;  %v1553_v49 = vadd.f32 %v1081_v45, %v644_v46 }
 0x107   :  { %v1082_v50 = vpop.f32.mrb[8].mxu1  ;;  %v1019_v51 = vpop.f32.mrb[9].mxu0 }
 0x108   :  { %v1020_v52 = vadd.f32 %v1019_v51, %v1018_v48  ;;  %v1083_v53 = vpop.f32.mrb[9].mxu1  ;;  %v1021_v54 = vpop.f32.mrb[10].mxu0 }
 0x109   :  { %v1084_v55 = vadd.f32 %v1083_v53, %v1082_v50  ;;  %v1085_v56 = vpop.f32.mrb[10].mxu1  ;;  %v1022_v57 = vpop.f32.mrb[11].mxu0 }
 0x10a   :  { %v649_v58 = vadd.f32 %v1020_v52, %v1541_v18  ;;  %v1023_v59 = vadd.f32 %v1022_v57, %v1021_v54  ;;  %v1086_v60 = vpop.f32.mrb[11].mxu1 }
 0x10b   :  { %v1087_v61 = vadd.f32 %v1086_v60, %v1085_v56 }
 0x10c   :  { %v652_v62 = vadd.f32 %v1023_v59, %v1541_v18  ;;  %v1557_v63 = vadd.f32 %v1084_v55, %v649_v58 }
 0x10e   :  { %v1024_v0 = vpop.f32.mrb[12].mxu0  ;;  %v1559_v1 = vadd.f32 %v1087_v61, %v652_v62 }
 0x10f   :  { %v1088_v2 = vpop.f32.mrb[12].mxu1  ;;  %v1025_v3 = vpop.f32.mrb[13].mxu0 }
 0x110   :  { %v1026_v4 = vadd.f32 %v1025_v3, %v1024_v0  ;;  %v1089_v5 = vpop.f32.mrb[13].mxu1  ;;  %v1027_v6 = vpop.f32.mrb[14].mxu0 }
 0x111   :  { %v1090_v7 = vadd.f32 %v1089_v5, %v1088_v2  ;;  %v1091_v8 = vpop.f32.mrb[14].mxu1  ;;  %v1028_v9 = vpop.f32.mrb[15].mxu0 }
 0x112   :  { %v657_v10 = vadd.f32 %v1026_v4, %v1541_v18  ;;  %v1029_v11 = vadd.f32 %v1028_v9, %v1027_v6  ;;  %v1092_v12 = vpop.f32.mrb[15].mxu1 }
 0x113   :  { %v1093_v13 = vadd.f32 %v1092_v12, %v1091_v8 }
 0x114   :  { %v660_v14 = vadd.f32 %v1029_v11, %v1541_v18  ;;  %v1563_v15 = vadd.f32 %v1090_v7, %v657_v10 }
 0x116   :  { %v1030_v16 = vpop.f32.mrb[16].mxu0  ;;  %v1565_v17 = vadd.f32 %v1093_v13, %v660_v14 }
 0x117   :  { %v1094_v19 = vpop.f32.mrb[16].mxu1  ;;  %v1031_v20 = vpop.f32.mrb[17].mxu0 }
 0x118   :  { %v1032_v21 = vadd.f32 %v1031_v20, %v1030_v16  ;;  %v1095_v22 = vpop.f32.mrb[17].mxu1  ;;  %v1033_v23 = vpop.f32.mrb[18].mxu0 }
 0x119   :  { %v1096_v24 = vadd.f32 %v1095_v22, %v1094_v19  ;;  %v1097_v25 = vpop.f32.mrb[18].mxu1  ;;  %v1034_v26 = vpop.f32.mrb[19].mxu0 }
 0x11a   :  { %v665_v27 = vadd.f32 %v1032_v21, %v1541_v18  ;;  %v1035_v28 = vadd.f32 %v1034_v26, %v1033_v23  ;;  %v1098_v29 = vpop.f32.mrb[19].mxu1 }
 0x11b   :  { %v1099_v30 = vadd.f32 %v1098_v29, %v1097_v25 }
 0x11c   :  { %v668_v32 = vadd.f32 %v1035_v28, %v1541_v18  ;;  %v762_v34 = vadd.f32 %v1096_v24, %v665_v27 }
 0x11e   :  { %v1036_v35 = vpop.f32.mrb[20].mxu0  ;;  %v1569_v36 = vadd.f32 %v1099_v30, %v668_v32 }
 0x11f   :  { %v1100_v37 = vpop.f32.mrb[20].mxu1  ;;  %v1037_v38 = vpop.f32.mrb[21].mxu0 }
 0x120   :  { %v1038_v39 = vadd.f32 %v1037_v38, %v1036_v35  ;;  %v1101_v40 = vpop.f32.mrb[21].mxu1  ;;  %v1039_v41 = vpop.f32.mrb[22].mxu0 }
 0x121   :  { %v1102_v42 = vadd.f32 %v1101_v40, %v1100_v37  ;;  %v1103_v43 = vpop.f32.mrb[22].mxu1  ;;  %v1040_v44 = vpop.f32.mrb[23].mxu0 }
 0x122   :  { %v673_v45 = vadd.f32 %v1038_v39, %v1541_v18  ;;  %v1041_v46 = vadd.f32 %v1040_v44, %v1039_v41  ;;  %v1104_v48 = vpop.f32.mrb[23].mxu1 }
 0x123   :  { %v1105_v50 = vadd.f32 %v1104_v48, %v1103_v43 }
 0x124   :  { %v676_v51 = vadd.f32 %v1041_v46, %v1541_v18  ;;  %v770_v52 = vadd.f32 %v1102_v42, %v673_v45 }
 0x126   :  { %v1042_v53 = vpop.f32.mrb[24].mxu0  ;;  %v773_v54 = vadd.f32 %v1105_v50, %v676_v51 }
 0x127   :  { %v1106_v55 = vpop.f32.mrb[24].mxu1  ;;  %v1043_v56 = vpop.f32.mrb[25].mxu0 }
 0x128   :  { %v1044_v57 = vadd.f32 %v1043_v56, %v1042_v53  ;;  %v1107_v58 = vpop.f32.mrb[25].mxu1  ;;  %v1045_v59 = vpop.f32.mrb[26].mxu0 }
 0x129   :  { %v1108_v60 = vadd.f32 %v1107_v58, %v1106_v55  ;;  %v1109_v61 = vpop.f32.mrb[26].mxu1  ;;  %v1046_v62 = vpop.f32.mrb[27].mxu0 }
 0x12a   :  { %v681_v0 = vadd.f32 %v1044_v57, %v1541_v18  ;;  %v1047_v2 = vadd.f32 %v1046_v62, %v1045_v59  ;;  %v1110_v3 = vpop.f32.mrb[27].mxu1 }
 0x12b   :  { %v1111_v4 = vadd.f32 %v1110_v3, %v1109_v61 }
 0x12c   :  { %v684_v5 = vadd.f32 %v1047_v2, %v1541_v18  ;;  %v778_v6 = vadd.f32 %v1108_v60, %v681_v0 }
 0x12e   :  { %v1048_v7 = vpop.f32.mrb[28].mxu0  ;;  %v781_v8 = vadd.f32 %v1111_v4, %v684_v5 }
 0x12f   :  { %v1112_v9 = vpop.f32.mrb[28].mxu1  ;;  %v1049_v10 = vpop.f32.mrb[29].mxu0 }
 0x130   :  { %v1050_v11 = vadd.f32 %v1049_v10, %v1048_v7  ;;  %v1113_v12 = vpop.f32.mrb[29].mxu1  ;;  %v1051_v13 = vpop.f32.mrb[30].mxu0 }
 0x131   :  { %v1114_v14 = vadd.f32 %v1113_v12, %v1112_v9  ;;  %v1115_v16 = vpop.f32.mrb[30].mxu1  ;;  %v1052_v19 = vpop.f32.mrb[31].mxu0 }
 0x132   :  { %v689_v20 = vadd.f32 %v1050_v11, %v1541_v18  ;;  %v1053_v21 = vadd.f32 %v1052_v19, %v1051_v13  ;;  %v1116_v22 = vpop.f32.mrb[31].mxu1 }
 0x133   :  { %v1117_v23 = vadd.f32 %v1116_v22, %v1115_v16 }
 0x134   :  { %v692_v24 = vadd.f32 %v1053_v21, %v1541_v18  ;;  %v786_v25 = vadd.f32 %v1114_v14, %v689_v20 }
 0x136   :  { %v1152_v26 = vpop.f32.mrb[32].mxu0  ;;  %v789_v27 = vadd.f32 %v1117_v23, %v692_v24 }
 0x137   :  { %v835_v28 = vadd.f32 %v1152_v26, %v1551_v47  ;;  %v1160_v29 = vpop.f32.mrb[32].mxu1  ;;  %v826_v30 = vpop.f32.mrb[33].mxu0 }
 0x138   :  { %v867_v32 = vadd.f32 %v1160_v29, %v770_v52  ;;  %v827_v35 = vadd.f32 %v826_v30, %v1545_v31  ;;  %v858_v37 = vpop.f32.mrb[33].mxu1  ;;  %v1153_v38 = vpop.f32.mrb[34].mxu0 }
 0x139   :  { %v859_v39 = vadd.f32 %v858_v37, %v762_v34  ;;  %v838_v40 = vadd.f32 %v1153_v38, %v1553_v49  ;;  %v1161_v41 = vpop.f32.mrb[34].mxu1  ;;  %v829_v42 = vpop.f32.mrb[35].mxu0 }
 0x13a   :  { %v870_v43 = vadd.f32 %v1161_v41, %v773_v54  ;;  %v830_v18 = vadd.f32 %v829_v42, %v1547_v33  ;;  %v861_v44 = vpop.f32.mrb[35].mxu1 }
 0x13b   :  { %v890_v45 = vpack.c.bf16 %v838_v40, %v835_v28  ;;  %v862_v46 = vadd.f32 %v861_v44, %v1569_v36 }
 0x13c   :  { %v894_v47 = vpack.c.bf16 %v870_v43, %v867_v32  ;;  %v889_v48 = vpack.c.bf16 %v830_v18, %v827_v35 }
 0x13d   :  { %898 = vst [vmem:[%s1613_s3 + $0x8] sm:$0xff] %v890_v45  ;;  %v893_v31 = vpack.c.bf16 %v862_v46, %v859_v39 }
 0x13e   :  { %902 = vst [vmem:[%s1613_s3 + $0x28] sm:$0xff] %v894_v47  ;;  %897 = vst [vmem:[%s1613_s3] sm:$0xff] %v889_v48  ;;  %v1156_v33 = vpop.f32.mrb[36].mxu0 }
 0x13f   :  { %901 = vst [vmem:[%s1613_s3 + $0x20] sm:$0xff] %v893_v31  ;;  %v851_v49 = vadd.f32 %v1156_v33, %v1563_v15  ;;  %v1164_v34 = vpop.f32.mrb[36].mxu1  ;;  %v842_v36 = vpop.f32.mrb[37].mxu0 }
 0x140   :  { %v883_v50 = vadd.f32 %v1164_v34, %v786_v25  ;;  %v843_v51 = vadd.f32 %v842_v36, %v1557_v63  ;;  %v874_v52 = vpop.f32.mrb[37].mxu1  ;;  %v1157_v53 = vpop.f32.mrb[38].mxu0 }
 0x141   :  { %v875_v54 = vadd.f32 %v874_v52, %v778_v6  ;;  %v854_v55 = vadd.f32 %v1157_v53, %v1565_v17  ;;  %v1165_v56 = vpop.f32.mrb[38].mxu1  ;;  %v845_v57 = vpop.f32.mrb[39].mxu0 }
 0x142   :  { %v886_v58 = vadd.f32 %v1165_v56, %v789_v27  ;;  %v846_v59 = vadd.f32 %v845_v57, %v1559_v1  ;;  %v877_v60 = vpop.f32.mrb[39].mxu1 }
 0x143   :  { %v892_v61 = vpack.c.bf16 %v854_v55, %v851_v49  ;;  %v878_v62 = vadd.f32 %v877_v60, %v781_v8 }
 0x144   :  { %v896_v0 = vpack.c.bf16 %v886_v58, %v883_v50  ;;  %v891_v15 = vpack.c.bf16 %v846_v59, %v843_v51 }
 0x145   :  { %900 = vst [vmem:[%s1613_s3 + $0x18] sm:$0xff] %v892_v61  ;;  %v895_v63 = vpack.c.bf16 %v878_v62, %v875_v54 }
 0x146   :  { %904 = vst [vmem:[%s1613_s3 + $0x38] sm:$0xff] %v896_v0  ;;  %899 = vst [vmem:[%s1613_s3 + $0x10] sm:$0xff] %v891_v15 }
 0x147   :  { %903 = vst [vmem:[%s1613_s3 + $0x30] sm:$0xff] %v895_v63 }

// kernel: _lambda_.11
= control target key start
LH: loop header
LB: loop body
LE: loop exit
PB: predicated region body
PF: predicated region fallthrough
CT: control target
= control target key end

     0   :  { %s820_s1 = inlined_call_operand.vmem [shape: bf16[256,128], index: 1, kind: input, shape index: {}]   ;;  %s821_s0 = inlined_call_operand.vmem [shape: bf16[128,256], index: 0, kind: input, shape index: {}]   ;;  %s822_s2 = inlined_call_operand.vmem [shape: f32[1,128], index: 2, kind: input, shape index: {}]   ;;  %s823_s3 = inlined_call_operand.vmem [shape: bf16[128,128], index: 3, kind: output, shape index: {}]  }
   0x1   :  { %v619_v0 = vld [vmem:[%s820_s1 + $0x40] sm:$0xff]   ;;  %v621_v2 = vld [vmem:[%s820_s1 + $0x48] sm:$0xff]   ;;  %v623_v4 = vld [vmem:[%s820_s1 + $0x50] sm:$0xff]  }
   0x2   :  { %v620_v1 = vld [vmem:[%s820_s1] sm:$0xff]   ;;  %539 = vmatprep.subr.bf16.mxu0 %v619_v0  ;;  %603 = vmatprep.subr.bf16.mxu1 %v619_v0  ;;  %v622_v3 = vld [vmem:[%s820_s1 + $0x8] sm:$0xff]   ;;  %v624_v5 = vld [vmem:[%s820_s1 + $0x10] sm:$0xff]  }
   0x3   :  { %540 = vmatpush3.bf16.msra.mxu0 %v620_v1  ;;  %611 = vmatpush3.bf16.msra.mxu1 %v620_v1  ;;  %v625_v6 = vld [vmem:[%s820_s1 + $0x58] sm:$0xff]   ;;  %v627_v8 = vld [vmem:[%s820_s1 + $0x60] sm:$0xff]   ;;  %v629_v10 = vld [vmem:[%s820_s1 + $0x68] sm:$0xff]  }
   0x4   :  { %541 = vmatprep.subr.bf16.mxu0 %v621_v2  ;;  %604 = vmatprep.subr.bf16.mxu1 %v621_v2  ;;  %v626_v7 = vld [vmem:[%s820_s1 + $0x18] sm:$0xff]   ;;  %v628_v9 = vld [vmem:[%s820_s1 + $0x20] sm:$0xff]   ;;  %v630_v13 = vld [vmem:[%s820_s1 + $0x28] sm:$0xff]  }
   0x5   :  { %v637_v11 = vld [vmem:[%s821_s0 + $0x4] ss:$8 sps:$4 sm:$0xff]   ;;  %v631_v14 = vld [vmem:[%s820_s1 + $0x70] sm:$0xff]   ;;  %v633_v16 = vld [vmem:[%s820_s1 + $0x78] sm:$0xff]  }
   0x6   :  { %v640_v12 = vld [vmem:[%s821_s0 + $0x44] ss:$8 sps:$4 sm:$0xff]   ;;  %278 = vmatprep.mubr.bf16.mxu0 %v637_v11  ;;  %v632_v15 = vld [vmem:[%s820_s1 + $0x30] sm:$0xff]   ;;  %v634_v17 = vld [vmem:[%s820_s1 + $0x38] sm:$0xff]  }
   0x7   :  { %542 = vmatpush3.bf16.msra.mxu0 %v622_v3  ;;  %612 = vmatpush3.bf16.msra.mxu1 %v622_v3  ;;  %v635_v18 = vld [vmem:[%s821_s0] ss:$8 sps:$4 sm:$0xff]   ;;  %v641_v20 = vld [vmem:[%s821_s0 + $0x14] ss:$8 sps:$4 sm:$0xff]   ;;  %v645_v22 = vld [vmem:[%s821_s0 + $0x10] ss:$8 sps:$4 sm:$0xff]  }
   0x8   :  { %543 = vmatprep.subr.bf16.mxu0 %v623_v4  ;;  %605 = vmatprep.subr.bf16.mxu1 %v623_v4  ;;  %v638_v19 = vld [vmem:[%s821_s0 + $0x40] ss:$8 sps:$4 sm:$0xff]   ;;  %v643_v21 = vld [vmem:[%s821_s0 + $0x54] ss:$8 sps:$4 sm:$0xff]   ;;  %v646_v23 = vld [vmem:[%s821_s0 + $0x50] ss:$8 sps:$4 sm:$0xff]  }
   0x9   :  { %310 = vmatprep.mubr.bf16.mxu1 %v640_v12  ;;  %v647_v24 = vld [vmem:[%s821_s0 + $0x24] ss:$8 sps:$4 sm:$0xff]   ;;  %v651_v26 = vld [vmem:[%s821_s0 + $0x20] ss:$8 sps:$4 sm:$0xff]   ;;  %v653_v28 = vld [vmem:[%s821_s0 + $0x34] ss:$8 sps:$4 sm:$0xff]  }
   0xa   :  { %v649_v25 = vld [vmem:[%s821_s0 + $0x64] ss:$8 sps:$4 sm:$0xff]   ;;  %v652_v27 = vld [vmem:[%s821_s0 + $0x60] ss:$8 sps:$4 sm:$0xff]   ;;  %v655_v29 = vld [vmem:[%s821_s0 + $0x74] ss:$8 sps:$4 sm:$0xff]  }
   0xb   :  { %544 = vmatpush3.bf16.msra.mxu0 %v624_v5  ;;  %613 = vmatpush3.bf16.msra.mxu1 %v624_v5  ;;  %v657_v30 = vld [vmem:[%s821_s0 + $0x30] ss:$8 sps:$4 sm:$0xff]   ;;  %v778_v40 = vld [vmem:[%s822_s2] ss:$0 sm:$0xff] }
   0xc   :  { %545 = vmatprep.subr.bf16.mxu0 %v625_v6  ;;  %606 = vmatprep.subr.bf16.mxu1 %v625_v6  ;;  %v658_v31 = vld [vmem:[%s821_s0 + $0x70] ss:$8 sps:$4 sm:$0xff]  }
   0xf   :  { %546 = vmatpush3.bf16.msra.mxu0 %v626_v7  ;;  %614 = vmatpush3.bf16.msra.mxu1 %v626_v7 }
  0x10   :  { %547 = vmatprep.subr.bf16.mxu0 %v627_v8  ;;  %607 = vmatprep.subr.bf16.mxu1 %v627_v8 }
  0x13   :  { %548 = vmatpush3.bf16.msra.mxu0 %v628_v9  ;;  %615 = vmatpush3.bf16.msra.mxu1 %v628_v9 }
  0x14   :  { %549 = vmatprep.subr.bf16.mxu0 %v629_v10  ;;  %608 = vmatprep.subr.bf16.mxu1 %v629_v10 }
  0x17   :  { %550 = vmatpush3.bf16.msra.mxu0 %v630_v13  ;;  %616 = vmatpush3.bf16.msra.mxu1 %v630_v13 }
  0x18   :  { %551 = vmatprep.subr.bf16.mxu0 %v631_v14  ;;  %609 = vmatprep.subr.bf16.mxu1 %v631_v14 }
  0x1b   :  { %552 = vmatpush3.bf16.msra.mxu0 %v632_v15  ;;  %617 = vmatpush3.bf16.msra.mxu1 %v632_v15 }
  0x1c   :  { %553 = vmatprep.subr.bf16.mxu0 %v633_v16  ;;  %610 = vmatprep.subr.bf16.mxu1 %v633_v16 }
  0x1f   :  { %554 = vmatpush3.bf16.msra.mxu0 %v634_v17  ;;  %618 = vmatpush3.bf16.msra.mxu1 %v634_v17 }
  0x22   :  { %279 = vmatmul.mubr.bf16.vlgmr.msra.gmra.mrb[0].mxu0 %v635_v18  ;;  %311 = vmatmul.mubr.bf16.vlgmr.msra.gmra.mrb[0].mxu1 %v638_v19 }
  0x23   :  { %286 = vmatprep.mubr.bf16.mxu0 %v641_v20  ;;  %318 = vmatprep.mubr.bf16.mxu1 %v643_v21 }
  0x2a   :  { %287 = vmatmul.mubr.bf16.gmra.mrb[4].mxu0 %v645_v22  ;;  %319 = vmatmul.mubr.bf16.gmra.mrb[4].mxu1 %v646_v23 }
  0x2b   :  { %294 = vmatprep.mubr.bf16.mxu0 %v647_v24  ;;  %326 = vmatprep.mubr.bf16.mxu1 %v649_v25 }
  0x32   :  { %295 = vmatmul.mubr.bf16.gmra.mrb[8].mxu0 %v651_v26  ;;  %327 = vmatmul.mubr.bf16.gmra.mrb[8].mxu1 %v652_v27 }
  0x33   :  { %302 = vmatprep.mubr.bf16.mxu0 %v653_v28  ;;  %334 = vmatprep.mubr.bf16.mxu1 %v655_v29 }
  0x3a   :  { %303 = vmatmul.mubr.bf16.gmra.mrb[12].mxu0 %v657_v30  ;;  %335 = vmatmul.mubr.bf16.gmra.mrb[12].mxu1 %v658_v31 }
  0xf5   :  { %v555_v32 = vpop.f32.mrb[0].mxu0  ;;  %v579_v33 = vpop.f32.mrb[0].mxu1 }
  0xf6   :  { %v556_v34 = vpop.f32.mrb[1].mxu0  ;;  %v580_v35 = vpop.f32.mrb[1].mxu1 }
  0xf7   :  { %v557_v36 = vadd.f32 %v556_v34, %v555_v32  ;;  %v581_v37 = vadd.f32 %v580_v35, %v579_v33  ;;  %v558_v38 = vpop.f32.mrb[2].mxu0  ;;  %v582_v39 = vpop.f32.mrb[2].mxu1 }
  0xf8   :  { %v559_v41 = vpop.f32.mrb[3].mxu0  ;;  %v583_v42 = vpop.f32.mrb[3].mxu1 }
  0xf9   :  { %v560_v43 = vadd.f32 %v559_v41, %v558_v38  ;;  %v584_v44 = vadd.f32 %v583_v42, %v582_v39  ;;  %v281_v45 = vadd.f32 %v557_v36, %v778_v40  ;;  %v313_v46 = vadd.f32 %v581_v37, %v778_v40 }
  0xfb   :  { %v284_v47 = vadd.f32 %v560_v43, %v778_v40  ;;  %v316_v48 = vadd.f32 %v584_v44, %v778_v40 }
  0xfd   :  { %v495_v49 = vpack.c.bf16 %v284_v47, %v281_v45  ;;  %v515_v50 = vpack.c.bf16 %v316_v48, %v313_v46  ;;  %v561_v51 = vpop.f32.mrb[4].mxu0  ;;  %v585_v52 = vpop.f32.mrb[4].mxu1 }
  0xfe   :  { %v562_v53 = vpop.f32.mrb[5].mxu0  ;;  %v586_v54 = vpop.f32.mrb[5].mxu1 }
  0xff   :  { %496 = vst [vmem:[%s823_s3] sm:$0xff] %v495_v49   ;;  %535 = vst [vmem:[%s823_s3 + $0x20] sm:$0xff] %v515_v50   ;;  %v563_v55 = vadd.f32 %v562_v53, %v561_v51  ;;  %v587_v56 = vadd.f32 %v586_v54, %v585_v52  ;;  %v564_v57 = vpop.f32.mrb[6].mxu0  ;;  %v588_v58 = vpop.f32.mrb[6].mxu1 }
 0x100   :  { %v565_v59 = vpop.f32.mrb[7].mxu0  ;;  %v589_v60 = vpop.f32.mrb[7].mxu1 }
 0x101   :  { %v566_v61 = vadd.f32 %v565_v59, %v564_v57  ;;  %v590_v62 = vadd.f32 %v589_v60, %v588_v58  ;;  %v289_v63 = vadd.f32 %v563_v55, %v778_v40  ;;  %v321_v0 = vadd.f32 %v587_v56, %v778_v40 }
 0x103   :  { %v292_v1 = vadd.f32 %v566_v61, %v778_v40  ;;  %v324_v2 = vadd.f32 %v590_v62, %v778_v40 }
 0x105   :  { %v500_v3 = vpack.c.bf16 %v292_v1, %v289_v63  ;;  %v520_v4 = vpack.c.bf16 %v324_v2, %v321_v0  ;;  %v567_v5 = vpop.f32.mrb[8].mxu0  ;;  %v591_v6 = vpop.f32.mrb[8].mxu1 }
 0x106   :  { %v568_v7 = vpop.f32.mrb[9].mxu0  ;;  %v592_v8 = vpop.f32.mrb[9].mxu1 }
 0x107   :  { %532 = vst [vmem:[%s823_s3 + $0x8] sm:$0xff] %v500_v3   ;;  %536 = vst [vmem:[%s823_s3 + $0x28] sm:$0xff] %v520_v4   ;;  %v569_v9 = vadd.f32 %v568_v7, %v567_v5  ;;  %v593_v10 = vadd.f32 %v592_v8, %v591_v6  ;;  %v570_v11 = vpop.f32.mrb[10].mxu0  ;;  %v594_v12 = vpop.f32.mrb[10].mxu1 }
 0x108   :  { %v571_v13 = vpop.f32.mrb[11].mxu0  ;;  %v595_v14 = vpop.f32.mrb[11].mxu1 }
 0x109   :  { %v572_v15 = vadd.f32 %v571_v13, %v570_v11  ;;  %v596_v16 = vadd.f32 %v595_v14, %v594_v12  ;;  %v297_v17 = vadd.f32 %v569_v9, %v778_v40  ;;  %v329_v18 = vadd.f32 %v593_v10, %v778_v40 }
 0x10b   :  { %v300_v19 = vadd.f32 %v572_v15, %v778_v40  ;;  %v332_v20 = vadd.f32 %v596_v16, %v778_v40 }
 0x10d   :  { %v505_v21 = vpack.c.bf16 %v300_v19, %v297_v17  ;;  %v525_v22 = vpack.c.bf16 %v332_v20, %v329_v18  ;;  %v573_v23 = vpop.f32.mrb[12].mxu0  ;;  %v597_v24 = vpop.f32.mrb[12].mxu1 }
 0x10e   :  { %v574_v25 = vpop.f32.mrb[13].mxu0  ;;  %v598_v26 = vpop.f32.mrb[13].mxu1 }
 0x10f   :  { %533 = vst [vmem:[%s823_s3 + $0x10] sm:$0xff] %v505_v21   ;;  %537 = vst [vmem:[%s823_s3 + $0x30] sm:$0xff] %v525_v22   ;;  %v575_v27 = vadd.f32 %v574_v25, %v573_v23  ;;  %v599_v28 = vadd.f32 %v598_v26, %v597_v24  ;;  %v576_v29 = vpop.f32.mrb[14].mxu0  ;;  %v600_v30 = vpop.f32.mrb[14].mxu1 }
 0x110   :  { %v577_v31 = vpop.f32.mrb[15].mxu0  ;;  %v601_v32 = vpop.f32.mrb[15].mxu1 }
 0x111   :  { %v578_v33 = vadd.f32 %v577_v31, %v576_v29  ;;  %v602_v34 = vadd.f32 %v601_v32, %v600_v30  ;;  %v305_v35 = vadd.f32 %v575_v27, %v778_v40  ;;  %v337_v36 = vadd.f32 %v599_v28, %v778_v40 }
 0x113   :  { %v308_v37 = vadd.f32 %v578_v33, %v778_v40  ;;  %v340_v38 = vadd.f32 %v602_v34, %v778_v40 }
 0x115   :  { %v510_v39 = vpack.c.bf16 %v308_v37, %v305_v35  ;;  %v530_v41 = vpack.c.bf16 %v340_v38, %v337_v36 }
 0x117   :  { %534 = vst [vmem:[%s823_s3 + $0x18] sm:$0xff] %v510_v39   ;;  %538 = vst [vmem:[%s823_s3 + $0x38] sm:$0xff] %v530_v41  }

// kernel: _lambda_.16
= control target key start
LH: loop header
LB: loop body
LE: loop exit
PB: predicated region body
PF: predicated region fallthrough
CT: control target
= control target key end

     0   :  { %s8073_s1 = inlined_call_operand.vmem [shape: bf16[2816,256], index: 1, kind: input, shape index: {}]   ;;  %s8074_s0 = inlined_call_operand.vmem [shape: bf16[128,2816], index: 0, kind: input, shape index: {}]   ;;  %s8075_s2 = inlined_call_operand.vmem [shape: f32[1,256], index: 2, kind: input, shape index: {}]   ;;  %s8076_s3 = inlined_call_operand.vmem [shape: bf16[128,256], index: 3, kind: output, shape index: {}]  }
   0x1   :  { %v5497_v0 = vld [vmem:[%s8073_s1 + $0x4] ss:$8 sps:$4 sm:$0xff]   ;;  %v5501_v2 = vld [vmem:[%s8073_s1] ss:$8 sps:$4 sm:$0xff]   ;;  %v5503_v4 = vld [vmem:[%s8073_s1 + $0x14] ss:$8 sps:$4 sm:$0xff]  }
   0x2   :  { %v5499_v1 = vld [vmem:[%s8073_s1 + $0x504] ss:$8 sps:$4 sm:$0xff]   ;;  %3194 = vmatprep.subr.bf16.mxu1 %v5497_v0  ;;  %v5502_v3 = vld [vmem:[%s8073_s1 + $0x500] ss:$8 sps:$4 sm:$0xff]   ;;  %v5505_v5 = vld [vmem:[%s8073_s1 + $0x514] ss:$8 sps:$4 sm:$0xff]  }
   0x3   :  { %3759 = vmatprep.subr.bf16.mxu0 %v5499_v1  ;;  %3195 = vmatpush1.bf16.msra.mxu1 %v5501_v2  ;;  %v5507_v6 = vld [vmem:[%s8073_s1 + $0x10] ss:$8 sps:$4 sm:$0xff]   ;;  %v5509_v8 = vld [vmem:[%s8073_s1 + $0x24] ss:$8 sps:$4 sm:$0xff]   ;;  %v5513_v10 = vld [vmem:[%s8073_s1 + $0x20] ss:$8 sps:$4 sm:$0xff]  }
   0x4   :  { %3760 = vmatpush1.bf16.msra.mxu0 %v5502_v3  ;;  %3196 = vmatprep.subr.bf16.mxu1 %v5503_v4  ;;  %v5508_v7 = vld [vmem:[%s8073_s1 + $0x510] ss:$8 sps:$4 sm:$0xff]   ;;  %v5511_v9 = vld [vmem:[%s8073_s1 + $0x524] ss:$8 sps:$4 sm:$0xff]   ;;  %v5514_v11 = vld [vmem:[%s8073_s1 + $0x520] ss:$8 sps:$4 sm:$0xff]  }
   0x5   :  { %3761 = vmatprep.subr.bf16.mxu0 %v5505_v5  ;;  %v5515_v12 = vld [vmem:[%s8073_s1 + $0x34] ss:$8 sps:$4 sm:$0xff]   ;;  %v5519_v14 = vld [vmem:[%s8073_s1 + $0x30] ss:$8 sps:$4 sm:$0xff]   ;;  %v5521_v16 = vld [vmem:[%s8073_s1 + $0x44] ss:$8 sps:$4 sm:$0xff]  }
   0x6   :  { %v5517_v13 = vld [vmem:[%s8073_s1 + $0x534] ss:$8 sps:$4 sm:$0xff]   ;;  %v5520_v15 = vld [vmem:[%s8073_s1 + $0x530] ss:$8 sps:$4 sm:$0xff]   ;;  %v5523_v17 = vld [vmem:[%s8073_s1 + $0x544] ss:$8 sps:$4 sm:$0xff]  }
   0x7   :  { %3197 = vmatpush1.bf16.msra.mxu1 %v5507_v6  ;;  %v5525_v18 = vld [vmem:[%s8073_s1 + $0x40] ss:$8 sps:$4 sm:$0xff]   ;;  %v5527_v20 = vld [vmem:[%s8073_s1 + $0x54] ss:$8 sps:$4 sm:$0xff]   ;;  %v5531_v22 = vld [vmem:[%s8073_s1 + $0x50] ss:$8 sps:$4 sm:$0xff]  }
   0x8   :  { %3762 = vmatpush1.bf16.msra.mxu0 %v5508_v7  ;;  %3198 = vmatprep.subr.bf16.mxu1 %v5509_v8  ;;  %v5526_v19 = vld [vmem:[%s8073_s1 + $0x540] ss:$8 sps:$4 sm:$0xff]   ;;  %v5529_v21 = vld [vmem:[%s8073_s1 + $0x554] ss:$8 sps:$4 sm:$0xff]   ;;  %v5532_v23 = vld [vmem:[%s8073_s1 + $0x550] ss:$8 sps:$4 sm:$0xff]  }
   0x9   :  { %3763 = vmatprep.subr.bf16.mxu0 %v5511_v9  ;;  %v5533_v24 = vld [vmem:[%s8073_s1 + $0x64] ss:$8 sps:$4 sm:$0xff]   ;;  %v5537_v26 = vld [vmem:[%s8073_s1 + $0x60] ss:$8 sps:$4 sm:$0xff]   ;;  %v5539_v28 = vld [vmem:[%s8073_s1 + $0x74] ss:$8 sps:$4 sm:$0xff]  }
   0xa   :  { %v5535_v25 = vld [vmem:[%s8073_s1 + $0x564] ss:$8 sps:$4 sm:$0xff]   ;;  %v5538_v27 = vld [vmem:[%s8073_s1 + $0x560] ss:$8 sps:$4 sm:$0xff]   ;;  %v5541_v29 = vld [vmem:[%s8073_s1 + $0x574] ss:$8 sps:$4 sm:$0xff]  }
   0xb   :  { %3199 = vmatpush1.bf16.msra.mxu1 %v5513_v10  ;;  %v5543_v30 = vld [vmem:[%s8073_s1 + $0x70] ss:$8 sps:$4 sm:$0xff]   ;;  %v5545_v32 = vld [vmem:[%s8073_s1 + $0x84] ss:$8 sps:$4 sm:$0xff]   ;;  %v5549_v34 = vld [vmem:[%s8073_s1 + $0x80] ss:$8 sps:$4 sm:$0xff]  }
   0xc   :  { %3764 = vmatpush1.bf16.msra.mxu0 %v5514_v11  ;;  %3200 = vmatprep.subr.bf16.mxu1 %v5515_v12  ;;  %v5544_v31 = vld [vmem:[%s8073_s1 + $0x570] ss:$8 sps:$4 sm:$0xff]   ;;  %v5547_v33 = vld [vmem:[%s8073_s1 + $0x584] ss:$8 sps:$4 sm:$0xff]   ;;  %v5550_v35 = vld [vmem:[%s8073_s1 + $0x580] ss:$8 sps:$4 sm:$0xff]  }
   0xd   :  { %3765 = vmatprep.subr.bf16.mxu0 %v5517_v13  ;;  %v5551_v36 = vld [vmem:[%s8073_s1 + $0x94] ss:$8 sps:$4 sm:$0xff]   ;;  %v5555_v38 = vld [vmem:[%s8073_s1 + $0x90] ss:$8 sps:$4 sm:$0xff]   ;;  %v5557_v40 = vld [vmem:[%s8073_s1 + $0xa4] ss:$8 sps:$4 sm:$0xff]  }
   0xe   :  { %v5553_v37 = vld [vmem:[%s8073_s1 + $0x594] ss:$8 sps:$4 sm:$0xff]   ;;  %v5556_v39 = vld [vmem:[%s8073_s1 + $0x590] ss:$8 sps:$4 sm:$0xff]   ;;  %v5559_v41 = vld [vmem:[%s8073_s1 + $0x5a4] ss:$8 sps:$4 sm:$0xff]  }
   0xf   :  { %3201 = vmatpush1.bf16.msra.mxu1 %v5519_v14  ;;  %v5561_v42 = vld [vmem:[%s8073_s1 + $0xa0] ss:$8 sps:$4 sm:$0xff]   ;;  %v5563_v44 = vld [vmem:[%s8073_s1 + $0xb4] ss:$8 sps:$4 sm:$0xff]   ;;  %v5567_v46 = vld [vmem:[%s8073_s1 + $0xb0] ss:$8 sps:$4 sm:$0xff]  }
  0x10   :  { %3766 = vmatpush1.bf16.msra.mxu0 %v5520_v15  ;;  %3202 = vmatprep.subr.bf16.mxu1 %v5521_v16  ;;  %v5562_v43 = vld [vmem:[%s8073_s1 + $0x5a0] ss:$8 sps:$4 sm:$0xff]   ;;  %v5565_v45 = vld [vmem:[%s8073_s1 + $0x5b4] ss:$8 sps:$4 sm:$0xff]   ;;  %v5568_v47 = vld [vmem:[%s8073_s1 + $0x5b0] ss:$8 sps:$4 sm:$0xff]  }
  0x11   :  { %3767 = vmatprep.subr.bf16.mxu0 %v5523_v17  ;;  %v5569_v48 = vld [vmem:[%s8073_s1 + $0xc4] ss:$8 sps:$4 sm:$0xff]   ;;  %v5573_v52 = vld [vmem:[%s8073_s1 + $0xc0] ss:$8 sps:$4 sm:$0xff]   ;;  %v5575_v54 = vld [vmem:[%s8073_s1 + $0xd4] ss:$8 sps:$4 sm:$0xff]  }
  0x12   :  { %v5595_v49 = vld [vmem:[%s8074_s0 + $0x4] ss:$88 sps:$4 sm:$0xff]   ;;  %v5574_v53 = vld [vmem:[%s8073_s1 + $0x5c0] ss:$8 sps:$4 sm:$0xff]   ;;  %v5579_v56 = vld [vmem:[%s8073_s1 + $0xd0] ss:$8 sps:$4 sm:$0xff]  }
  0x13   :  { %3203 = vmatpush1.bf16.msra.mxu1 %v5525_v18  ;;  %v5571_v50 = vld [vmem:[%s8073_s1 + $0x5c4] ss:$8 sps:$4 sm:$0xff]   ;;  %3226 = vmatprep.mubr.bf16.mxu1 %v5595_v49  ;;  %v5577_v55 = vld [vmem:[%s8073_s1 + $0x5d4] ss:$8 sps:$4 sm:$0xff]   ;;  %v5580_v57 = vld [vmem:[%s8073_s1 + $0x5d0] ss:$8 sps:$4 sm:$0xff]  }
  0x14   :  { %3768 = vmatpush1.bf16.msra.mxu0 %v5526_v19  ;;  %3204 = vmatprep.subr.bf16.mxu1 %v5527_v20  ;;  %v5598_v51 = vld [vmem:[%s8074_s0 + $0x2c] ss:$88 sps:$4 sm:$0xff]   ;;  %v5585_v60 = vld [vmem:[%s8073_s1 + $0xe0] ss:$8 sps:$4 sm:$0xff]   ;;  %v5587_v62 = vld [vmem:[%s8073_s1 + $0xf4] ss:$8 sps:$4 sm:$0xff]  }
  0x15   :  { %3769 = vmatprep.subr.bf16.mxu0 %v5529_v21  ;;  %3791 = vmatprep.mubr.bf16.mxu0 %v5598_v51  ;;  %v5581_v58 = vld [vmem:[%s8073_s1 + $0xe4] ss:$8 sps:$4 sm:$0xff]   ;;  %v5586_v61 = vld [vmem:[%s8073_s1 + $0x5e0] ss:$8 sps:$4 sm:$0xff]   ;;  %v5589_v63 = vld [vmem:[%s8073_s1 + $0x5f4] ss:$8 sps:$4 sm:$0xff]  }
  0x16   :  { %v5583_v59 = vld [vmem:[%s8073_s1 + $0x5e4] ss:$8 sps:$4 sm:$0xff]   ;;  %v5591_v0 = vld [vmem:[%s8073_s1 + $0xf0] ss:$8 sps:$4 sm:$0xff]   ;;  %v5596_v5 = vld [vmem:[%s8074_s0 + $0x28] ss:$88 sps:$4 sm:$0xff]  }
  0x17   :  { %3205 = vmatpush1.bf16.msra.mxu1 %v5531_v22  ;;  %v5592_v1 = vld [vmem:[%s8073_s1 + $0x5f0] ss:$8 sps:$4 sm:$0xff]   ;;  %v5601_v2 = vld [vmem:[%s8073_s1 + $0x104] ss:$8 sps:$4 sm:$0xff]   ;;  %v5599_v6 = vld [vmem:[%s8073_s1 + $0x100] ss:$8 sps:$4 sm:$0xff]  }
  0x18   :  { %3770 = vmatpush1.bf16.msra.mxu0 %v5532_v23  ;;  %3206 = vmatprep.subr.bf16.mxu1 %v5533_v24  ;;  %v5604_v3 = vld [vmem:[%s8073_s1 + $0x604] ss:$8 sps:$4 sm:$0xff]   ;;  %v5593_v4 = vld [vmem:[%s8074_s0] ss:$88 sps:$4 sm:$0xff]   ;;  %v5607_v8 = vld [vmem:[%s8073_s1 + $0x114] ss:$8 sps:$4 sm:$0xff]  }
  0x19   :  { %3771 = vmatprep.subr.bf16.mxu0 %v5535_v25  ;;  %v5602_v7 = vld [vmem:[%s8073_s1 + $0x600] ss:$8 sps:$4 sm:$0xff]   ;;  %v5610_v9 = vld [vmem:[%s8073_s1 + $0x614] ss:$8 sps:$4 sm:$0xff]   ;;  %v5605_v12 = vld [vmem:[%s8073_s1 + $0x110] ss:$8 sps:$4 sm:$0xff]  }
  0x1a   :  { %v5611_v10 = vld [vmem:[%s8074_s0 + $0xb4] ss:$88 sps:$4 sm:$0xff]   ;;  %v5608_v13 = vld [vmem:[%s8073_s1 + $0x610] ss:$8 sps:$4 sm:$0xff]   ;;  %v5616_v17 = vld [vmem:[%s8073_s1 + $0x120] ss:$8 sps:$4 sm:$0xff]  }
  0x1b   :  { %3207 = vmatpush1.bf16.msra.mxu1 %v5537_v26  ;;  %v5613_v11 = vld [vmem:[%s8074_s0 + $0xdc] ss:$88 sps:$4 sm:$0xff]   ;;  %v5618_v14 = vld [vmem:[%s8073_s1 + $0x124] ss:$8 sps:$4 sm:$0xff]   ;;  %v5615_v16 = vld [vmem:[%s8074_s0 + $0xb0] ss:$88 sps:$4 sm:$0xff]  }
  0x1c   :  { %3772 = vmatpush1.bf16.msra.mxu0 %v5538_v27  ;;  %3208 = vmatprep.subr.bf16.mxu1 %v5539_v28  ;;  %v5622_v15 = vld [vmem:[%s8073_s1 + $0x624] ss:$8 sps:$4 sm:$0xff]   ;;  %v5619_v18 = vld [vmem:[%s8074_s0 + $0xd8] ss:$88 sps:$4 sm:$0xff]   ;;  %v5620_v19 = vld [vmem:[%s8073_s1 + $0x620] ss:$8 sps:$4 sm:$0xff]  }
  0x1d   :  { %3773 = vmatprep.subr.bf16.mxu0 %v5541_v29  ;;  %v5625_v20 = vld [vmem:[%s8073_s1 + $0x134] ss:$8 sps:$4 sm:$0xff]   ;;  %v5631_v23 = vld [vmem:[%s8074_s0 + $0x18c] ss:$88 sps:$4 sm:$0xff]   ;;  %v5623_v24 = vld [vmem:[%s8073_s1 + $0x130] ss:$8 sps:$4 sm:$0xff]  }
  0x1e   :  { %v5628_v21 = vld [vmem:[%s8073_s1 + $0x634] ss:$8 sps:$4 sm:$0xff]   ;;  %v5626_v25 = vld [vmem:[%s8073_s1 + $0x630] ss:$8 sps:$4 sm:$0xff]   ;;  %v5636_v26 = vld [vmem:[%s8073_s1 + $0x144] ss:$8 sps:$4 sm:$0xff]  }
  0x1f   :  { %3209 = vmatpush1.bf16.msra.mxu1 %v5543_v30  ;;  %v5629_v22 = vld [vmem:[%s8074_s0 + $0x164] ss:$88 sps:$4 sm:$0xff]   ;;  %v5633_v28 = vld [vmem:[%s8074_s0 + $0x160] ss:$88 sps:$4 sm:$0xff]  }
  0x20   :  { %3774 = vmatpush1.bf16.msra.mxu0 %v5544_v31  ;;  %3210 = vmatprep.subr.bf16.mxu1 %v5545_v32  ;;  %v5640_v27 = vld [vmem:[%s8073_s1 + $0x644] ss:$8 sps:$4 sm:$0xff]   ;;  %v5634_v29 = vld [vmem:[%s8073_s1 + $0x140] ss:$8 sps:$4 sm:$0xff]   ;;  %v5643_v32 = vld [vmem:[%s8073_s1 + $0x154] ss:$8 sps:$4 sm:$0xff]  }
  0x21   :  { %3775 = vmatprep.subr.bf16.mxu0 %v5547_v33  ;;  %v5637_v30 = vld [vmem:[%s8074_s0 + $0x188] ss:$88 sps:$4 sm:$0xff]   ;;  %v5646_v33 = vld [vmem:[%s8073_s1 + $0x654] ss:$8 sps:$4 sm:$0xff]   ;;  %v5662_v49 = vld [vmem:[%s8073_s1 + $0x670] ss:$8 sps:$4 sm:$0xff]  }
  0x22   :  { %v5638_v31 = vld [vmem:[%s8073_s1 + $0x640] ss:$8 sps:$4 sm:$0xff]   ;;  %v5676_v51 = vld [vmem:[%s8073_s1 + $0x684] ss:$8 sps:$4 sm:$0xff]  }
  0x23   :  { %3211 = vmatpush1.bf16.msra.mxu1 %v5549_v34  ;;  %v5647_v34 = vld [vmem:[%s8074_s0 + $0x214] ss:$88 sps:$4 sm:$0xff]  }
  0x24   :  { %3776 = vmatpush1.bf16.msra.mxu0 %v5550_v35  ;;  %3212 = vmatprep.subr.bf16.mxu1 %v5551_v36  ;;  %v5649_v35 = vld [vmem:[%s8074_s0 + $0x23c] ss:$88 sps:$4 sm:$0xff]   ;;  %v5641_v36 = vld [vmem:[%s8073_s1 + $0x150] ss:$8 sps:$4 sm:$0xff]  }
  0x25   :  { %3777 = vmatprep.subr.bf16.mxu0 %v5553_v37  ;;  %v5644_v37 = vld [vmem:[%s8073_s1 + $0x650] ss:$8 sps:$4 sm:$0xff]  }
  0x27   :  { %3213 = vmatpush1.bf16.msra.mxu1 %v5555_v38  ;;  %v5654_v38 = vld [vmem:[%s8073_s1 + $0x164] ss:$8 sps:$4 sm:$0xff]  }
  0x28   :  { %3778 = vmatpush1.bf16.msra.mxu0 %v5556_v39  ;;  %3214 = vmatprep.subr.bf16.mxu1 %v5557_v40  ;;  %v5658_v39 = vld [vmem:[%s8073_s1 + $0x664] ss:$8 sps:$4 sm:$0xff]   ;;  %v5651_v40 = vld [vmem:[%s8074_s0 + $0x210] ss:$88 sps:$4 sm:$0xff]  }
  0x29   :  { %3779 = vmatprep.subr.bf16.mxu0 %v5559_v41  ;;  %v5652_v41 = vld [vmem:[%s8073_s1 + $0x160] ss:$8 sps:$4 sm:$0xff]  }
  0x2b   :  { %3215 = vmatpush1.bf16.msra.mxu1 %v5561_v42  ;;  %v5655_v42 = vld [vmem:[%s8074_s0 + $0x238] ss:$88 sps:$4 sm:$0xff]  }
  0x2c   :  { %3780 = vmatpush1.bf16.msra.mxu0 %v5562_v43  ;;  %3216 = vmatprep.subr.bf16.mxu1 %v5563_v44  ;;  %v5656_v43 = vld [vmem:[%s8073_s1 + $0x660] ss:$8 sps:$4 sm:$0xff]   ;;  %v5661_v44 = vld [vmem:[%s8073_s1 + $0x174] ss:$8 sps:$4 sm:$0xff]  }
  0x2d   :  { %3781 = vmatprep.subr.bf16.mxu0 %v5565_v45  ;;  %v5664_v45 = vld [vmem:[%s8073_s1 + $0x674] ss:$8 sps:$4 sm:$0xff]  }
  0x2f   :  { %3217 = vmatpush1.bf16.msra.mxu1 %v5567_v46  ;;  %v5665_v46 = vld [vmem:[%s8074_s0 + $0x2c4] ss:$88 sps:$4 sm:$0xff]  }
  0x30   :  { %3782 = vmatpush1.bf16.msra.mxu0 %v5568_v47  ;;  %3218 = vmatprep.subr.bf16.mxu1 %v5569_v48  ;;  %v5667_v47 = vld [vmem:[%s8074_s0 + $0x2ec] ss:$88 sps:$4 sm:$0xff]   ;;  %v5659_v48 = vld [vmem:[%s8073_s1 + $0x170] ss:$8 sps:$4 sm:$0xff]  }
  0x31   :  { %3783 = vmatprep.subr.bf16.mxu0 %v5571_v50  ;;  %v5672_v50 = vld [vmem:[%s8073_s1 + $0x184] ss:$8 sps:$4 sm:$0xff]  }
  0x33   :  { %3219 = vmatpush1.bf16.msra.mxu1 %v5573_v52  ;;  %v5669_v52 = vld [vmem:[%s8074_s0 + $0x2c0] ss:$88 sps:$4 sm:$0xff]  }
  0x34   :  { %3784 = vmatpush1.bf16.msra.mxu0 %v5574_v53  ;;  %3220 = vmatprep.subr.bf16.mxu1 %v5575_v54  ;;  %v5670_v53 = vld [vmem:[%s8073_s1 + $0x180] ss:$8 sps:$4 sm:$0xff]  }
  0x35   :  { %3785 = vmatprep.subr.bf16.mxu0 %v5577_v55  ;;  %v5673_v54 = vld [vmem:[%s8074_s0 + $0x2e8] ss:$88 sps:$4 sm:$0xff]  }
  0x36   :  { %v5674_v55 = vld [vmem:[%s8073_s1 + $0x680] ss:$8 sps:$4 sm:$0xff]  }
  0x37   :  { %3221 = vmatpush1.bf16.msra.mxu1 %v5579_v56  ;;  %v5679_v56 = vld [vmem:[%s8073_s1 + $0x194] ss:$8 sps:$4 sm:$0xff]  }
  0x38   :  { %3786 = vmatpush1.bf16.msra.mxu0 %v5580_v57  ;;  %3222 = vmatprep.subr.bf16.mxu1 %v5581_v58  ;;  %v5682_v57 = vld [vmem:[%s8073_s1 + $0x694] ss:$8 sps:$4 sm:$0xff]  }
  0x39   :  { %3787 = vmatprep.subr.bf16.mxu0 %v5583_v59  ;;  %v5683_v58 = vld [vmem:[%s8074_s0 + $0x374] ss:$88 sps:$4 sm:$0xff]  }
  0x3a   :  { %v5685_v59 = vld [vmem:[%s8074_s0 + $0x39c] ss:$88 sps:$4 sm:$0xff]  }
  0x3b   :  { %3223 = vmatpush1.bf16.msra.mxu1 %v5585_v60  ;;  %v5677_v60 = vld [vmem:[%s8073_s1 + $0x190] ss:$8 sps:$4 sm:$0xff]  }
  0x3c   :  { %3788 = vmatpush1.bf16.msra.mxu0 %v5586_v61  ;;  %3224 = vmatprep.subr.bf16.mxu1 %v5587_v62  ;;  %v5680_v61 = vld [vmem:[%s8073_s1 + $0x690] ss:$8 sps:$4 sm:$0xff]   ;;  %v5690_v62 = vld [vmem:[%s8073_s1 + $0x1a4] ss:$8 sps:$4 sm:$0xff]  }
  0x3d   :  { %3789 = vmatprep.subr.bf16.mxu0 %v5589_v63  ;;  %v5694_v63 = vld [vmem:[%s8073_s1 + $0x6a4] ss:$8 sps:$4 sm:$0xff]  }
  0x3f   :  { %3225 = vmatpush1.bf16.msra.mxu1 %v5591_v0  ;;  %v5687_v0 = vld [vmem:[%s8074_s0 + $0x370] ss:$88 sps:$4 sm:$0xff]  }
  0x40   :  { %3790 = vmatpush1.bf16.msra.mxu0 %v5592_v1  ;;  %3307 = vmatprep.subr.bf16.mxu1 %v5601_v2  ;;  %v5688_v1 = vld [vmem:[%s8073_s1 + $0x1a0] ss:$8 sps:$4 sm:$0xff]   ;;  %v5691_v2 = vld [vmem:[%s8074_s0 + $0x398] ss:$88 sps:$4 sm:$0xff]  }
  0x41   :  { %3872 = vmatprep.subr.bf16.mxu0 %v5604_v3  ;;  %v5692_v3 = vld [vmem:[%s8073_s1 + $0x6a0] ss:$8 sps:$4 sm:$0xff]  }
  0x42   :  { %3227 = vmatmul.mubr.bf16.vlgmr.msra.gmra.mrb[0].mxu1 %v5593_v4  ;;  %v5697_v4 = vld [vmem:[%s8073_s1 + $0x1b4] ss:$8 sps:$4 sm:$0xff]  }
  0x43   :  { %3792 = vmatmul.mubr.bf16.vlgmr.msra.gmra.mrb[0].mxu0 %v5596_v5  ;;  %3308 = vmatpush1.bf16.msra.mxu1 %v5599_v6  ;;  %v5700_v5 = vld [vmem:[%s8073_s1 + $0x6b4] ss:$8 sps:$4 sm:$0xff]  }
  0x44   :  { %3873 = vmatpush1.bf16.msra.mxu0 %v5602_v7  ;;  %3309 = vmatprep.subr.bf16.mxu1 %v5607_v8  ;;  %v5701_v6 = vld [vmem:[%s8074_s0 + $0x424] ss:$88 sps:$4 sm:$0xff]   ;;  %v5695_v8 = vld [vmem:[%s8073_s1 + $0x1b0] ss:$8 sps:$4 sm:$0xff]  }
  0x45   :  { %3874 = vmatprep.subr.bf16.mxu0 %v5610_v9  ;;  %3236 = vmatprep.mubr.bf16.mxu1 %v5611_v10  ;;  %v5703_v7 = vld [vmem:[%s8074_s0 + $0x44c] ss:$88 sps:$4 sm:$0xff]   ;;  %v5698_v9 = vld [vmem:[%s8073_s1 + $0x6b0] ss:$8 sps:$4 sm:$0xff]  }
  0x46   :  { %3801 = vmatprep.mubr.bf16.mxu0 %v5613_v11  ;;  %v5708_v10 = vld [vmem:[%s8073_s1 + $0x1c4] ss:$8 sps:$4 sm:$0xff]  }
  0x47   :  { %3310 = vmatpush1.bf16.msra.mxu1 %v5605_v12  ;;  %v5712_v11 = vld [vmem:[%s8073_s1 + $0x6c4] ss:$8 sps:$4 sm:$0xff]   ;;  %v5705_v12 = vld [vmem:[%s8074_s0 + $0x420] ss:$88 sps:$4 sm:$0xff]  }
  0x48   :  { %3875 = vmatpush1.bf16.msra.mxu0 %v5608_v13  ;;  %3311 = vmatprep.subr.bf16.mxu1 %v5618_v14  ;;  %v5706_v13 = vld [vmem:[%s8073_s1 + $0x1c0] ss:$8 sps:$4 sm:$0xff]  }
  0x49   :  { %3876 = vmatprep.subr.bf16.mxu0 %v5622_v15  ;;  %v5709_v14 = vld [vmem:[%s8074_s0 + $0x448] ss:$88 sps:$4 sm:$0xff]  }
  0x4a   :  { %3237 = vmatmul.mubr.bf16.gmra.mrb[4].mxu1 %v5615_v16  ;;  %v5710_v15 = vld [vmem:[%s8073_s1 + $0x6c0] ss:$8 sps:$4 sm:$0xff]   ;;  %v5715_v16 = vld [vmem:[%s8073_s1 + $0x1d4] ss:$8 sps:$4 sm:$0xff]  }
  0x4b   :  { %3802 = vmatmul.mubr.bf16.gmra.mrb[4].mxu0 %v5619_v18  ;;  %3312 = vmatpush1.bf16.msra.mxu1 %v5616_v17  ;;  %v5718_v17 = vld [vmem:[%s8073_s1 + $0x6d4] ss:$8 sps:$4 sm:$0xff]  }
  0x4c   :  { %3877 = vmatpush1.bf16.msra.mxu0 %v5620_v19  ;;  %3313 = vmatprep.subr.bf16.mxu1 %v5625_v20  ;;  %v5719_v18 = vld [vmem:[%s8074_s0 + $0x4d4] ss:$88 sps:$4 sm:$0xff]   ;;  %v5713_v20 = vld [vmem:[%s8073_s1 + $0x1d0] ss:$8 sps:$4 sm:$0xff]  }
  0x4d   :  { %3878 = vmatprep.subr.bf16.mxu0 %v5628_v21  ;;  %3246 = vmatprep.mubr.bf16.mxu1 %v5629_v22  ;;  %v5721_v19 = vld [vmem:[%s8074_s0 + $0x4fc] ss:$88 sps:$4 sm:$0xff]   ;;  %v5716_v21 = vld [vmem:[%s8073_s1 + $0x6d0] ss:$8 sps:$4 sm:$0xff]   ;;  %v5726_v22 = vld [vmem:[%s8073_s1 + $0x1e4] ss:$8 sps:$4 sm:$0xff]  }
  0x4e   :  { %3811 = vmatprep.mubr.bf16.mxu0 %v5631_v23  ;;  %v5730_v23 = vld [vmem:[%s8073_s1 + $0x6e4] ss:$8 sps:$4 sm:$0xff]  }
  0x4f   :  { %3314 = vmatpush1.bf16.msra.mxu1 %v5623_v24  ;;  %v5723_v24 = vld [vmem:[%s8074_s0 + $0x4d0] ss:$88 sps:$4 sm:$0xff]  }
  0x50   :  { %3879 = vmatpush1.bf16.msra.mxu0 %v5626_v25  ;;  %3315 = vmatprep.subr.bf16.mxu1 %v5636_v26  ;;  %v5724_v25 = vld [vmem:[%s8073_s1 + $0x1e0] ss:$8 sps:$4 sm:$0xff]   ;;  %v5727_v26 = vld [vmem:[%s8074_s0 + $0x4f8] ss:$88 sps:$4 sm:$0xff]  }
  0x51   :  { %3880 = vmatprep.subr.bf16.mxu0 %v5640_v27  ;;  %v5728_v27 = vld [vmem:[%s8073_s1 + $0x6e0] ss:$8 sps:$4 sm:$0xff]  }
  0x52   :  { %3247 = vmatmul.mubr.bf16.gmra.mrb[8].mxu1 %v5633_v28  ;;  %v5733_v28 = vld [vmem:[%s8073_s1 + $0x1f4] ss:$8 sps:$4 sm:$0xff]  }
  0x53   :  { %3812 = vmatmul.mubr.bf16.gmra.mrb[8].mxu0 %v5637_v30  ;;  %3316 = vmatpush1.bf16.msra.mxu1 %v5634_v29  ;;  %v5736_v29 = vld [vmem:[%s8073_s1 + $0x6f4] ss:$8 sps:$4 sm:$0xff]   ;;  %v5739_v30 = vld [vmem:[%s8074_s0 + $0xc] ss:$88 sps:$4 sm:$0xff]  }
  0x54   :  { %3881 = vmatpush1.bf16.msra.mxu0 %v5638_v31  ;;  %3317 = vmatprep.subr.bf16.mxu1 %v5643_v32  ;;  %v5742_v31 = vld [vmem:[%s8074_s0 + $0x34] ss:$88 sps:$4 sm:$0xff]   ;;  %v5731_v32 = vld [vmem:[%s8073_s1 + $0x1f0] ss:$8 sps:$4 sm:$0xff]  }
  0x55   :  { %3882 = vmatprep.subr.bf16.mxu0 %v5646_v33  ;;  %3256 = vmatprep.mubr.bf16.mxu1 %v5647_v34  ;;  %v5734_v33 = vld [vmem:[%s8073_s1 + $0x6f0] ss:$8 sps:$4 sm:$0xff]   ;;  %v5745_v34 = vld [vmem:[%s8073_s1 + $0x204] ss:$8 sps:$4 sm:$0xff]  }
  0x56   :  { %3821 = vmatprep.mubr.bf16.mxu0 %v5649_v35  ;;  %v5748_v35 = vld [vmem:[%s8073_s1 + $0x704] ss:$8 sps:$4 sm:$0xff]  }
  0x57   :  { %3318 = vmatpush1.bf16.msra.mxu1 %v5641_v36  ;;  %v5737_v36 = vld [vmem:[%s8074_s0 + $0x8] ss:$88 sps:$4 sm:$0xff]  }
  0x58   :  { %3883 = vmatpush1.bf16.msra.mxu0 %v5644_v37  ;;  %3319 = vmatprep.subr.bf16.mxu1 %v5654_v38  ;;  %v5740_v37 = vld [vmem:[%s8074_s0 + $0x30] ss:$88 sps:$4 sm:$0xff]  }
  0x59   :  { %3884 = vmatprep.subr.bf16.mxu0 %v5658_v39  ;;  %v5743_v38 = vld [vmem:[%s8073_s1 + $0x200] ss:$8 sps:$4 sm:$0xff]  }
  0x5a   :  { %3257 = vmatmul.mubr.bf16.gmra.mrb[12].mxu1 %v5651_v40  ;;  %v5746_v39 = vld [vmem:[%s8073_s1 + $0x700] ss:$8 sps:$4 sm:$0xff]   ;;  %v5751_v40 = vld [vmem:[%s8073_s1 + $0x214] ss:$8 sps:$4 sm:$0xff]  }
  0x5b   :  { %3822 = vmatmul.mubr.bf16.gmra.mrb[12].mxu0 %v5655_v42  ;;  %3320 = vmatpush1.bf16.msra.mxu1 %v5652_v41  ;;  %v5754_v41 = vld [vmem:[%s8073_s1 + $0x714] ss:$8 sps:$4 sm:$0xff]  }
  0x5c   :  { %3885 = vmatpush1.bf16.msra.mxu0 %v5656_v43  ;;  %3321 = vmatprep.subr.bf16.mxu1 %v5661_v44  ;;  %v5755_v42 = vld [vmem:[%s8074_s0 + $0xbc] ss:$88 sps:$4 sm:$0xff]   ;;  %v5749_v44 = vld [vmem:[%s8073_s1 + $0x210] ss:$8 sps:$4 sm:$0xff]  }
  0x5d   :  { %3886 = vmatprep.subr.bf16.mxu0 %v5664_v45  ;;  %3266 = vmatprep.mubr.bf16.mxu1 %v5665_v46  ;;  %v5757_v43 = vld [vmem:[%s8074_s0 + $0xe4] ss:$88 sps:$4 sm:$0xff]   ;;  %v5752_v45 = vld [vmem:[%s8073_s1 + $0x710] ss:$8 sps:$4 sm:$0xff]  }
  0x5e   :  { %3831 = vmatprep.mubr.bf16.mxu0 %v5667_v47  ;;  %v5762_v46 = vld [vmem:[%s8073_s1 + $0x224] ss:$8 sps:$4 sm:$0xff]  }
  0x5f   :  { %3322 = vmatpush1.bf16.msra.mxu1 %v5659_v48  ;;  %v5766_v47 = vld [vmem:[%s8073_s1 + $0x724] ss:$8 sps:$4 sm:$0xff]   ;;  %v5759_v48 = vld [vmem:[%s8074_s0 + $0xb8] ss:$88 sps:$4 sm:$0xff]  }
  0x60   :  { %3887 = vmatpush1.bf16.msra.mxu0 %v5662_v49  ;;  %3323 = vmatprep.subr.bf16.mxu1 %v5672_v50  ;;  %v5760_v49 = vld [vmem:[%s8073_s1 + $0x220] ss:$8 sps:$4 sm:$0xff]  }
  0x61   :  { %3888 = vmatprep.subr.bf16.mxu0 %v5676_v51  ;;  %v5763_v50 = vld [vmem:[%s8074_s0 + $0xe0] ss:$88 sps:$4 sm:$0xff]  }
  0x62   :  { %3267 = vmatmul.mubr.bf16.gmra.mrb[16].mxu1 %v5669_v52  ;;  %v5764_v51 = vld [vmem:[%s8073_s1 + $0x720] ss:$8 sps:$4 sm:$0xff]   ;;  %v5769_v52 = vld [vmem:[%s8073_s1 + $0x234] ss:$8 sps:$4 sm:$0xff]  }
  0x63   :  { %3832 = vmatmul.mubr.bf16.gmra.mrb[16].mxu0 %v5673_v54  ;;  %3324 = vmatpush1.bf16.msra.mxu1 %v5670_v53  ;;  %v5772_v53 = vld [vmem:[%s8073_s1 + $0x734] ss:$8 sps:$4 sm:$0xff]   ;;  %v5773_v54 = vld [vmem:[%s8074_s0 + $0x16c] ss:$88 sps:$4 sm:$0xff]  }
  0x64   :  { %3889 = vmatpush1.bf16.msra.mxu0 %v5674_v55  ;;  %3325 = vmatprep.subr.bf16.mxu1 %v5679_v56  ;;  %v5775_v55 = vld [vmem:[%s8074_s0 + $0x194] ss:$88 sps:$4 sm:$0xff]   ;;  %v5767_v56 = vld [vmem:[%s8073_s1 + $0x230] ss:$8 sps:$4 sm:$0xff]  }
  0x65   :  { %3890 = vmatprep.subr.bf16.mxu0 %v5682_v57  ;;  %3276 = vmatprep.mubr.bf16.mxu1 %v5683_v58  ;;  %v5770_v57 = vld [vmem:[%s8073_s1 + $0x730] ss:$8 sps:$4 sm:$0xff]   ;;  %v5780_v58 = vld [vmem:[%s8073_s1 + $0x244] ss:$8 sps:$4 sm:$0xff]  }
  0x66   :  { %3841 = vmatprep.mubr.bf16.mxu0 %v5685_v59  ;;  %v5784_v59 = vld [vmem:[%s8073_s1 + $0x744] ss:$8 sps:$4 sm:$0xff]  }
  0x67   :  { %3326 = vmatpush1.bf16.msra.mxu1 %v5677_v60  ;;  %v5777_v60 = vld [vmem:[%s8074_s0 + $0x168] ss:$88 sps:$4 sm:$0xff]  }
  0x68   :  { %3891 = vmatpush1.bf16.msra.mxu0 %v5680_v61  ;;  %3327 = vmatprep.subr.bf16.mxu1 %v5690_v62  ;;  %v5778_v61 = vld [vmem:[%s8073_s1 + $0x240] ss:$8 sps:$4 sm:$0xff]  }
  0x69   :  { %3892 = vmatprep.subr.bf16.mxu0 %v5694_v63  ;;  %v5781_v62 = vld [vmem:[%s8074_s0 + $0x190] ss:$88 sps:$4 sm:$0xff]  }
  0x6a   :  { %3277 = vmatmul.mubr.bf16.gmra.mrb[20].mxu1 %v5687_v0  ;;  %v5782_v63 = vld [vmem:[%s8073_s1 + $0x740] ss:$8 sps:$4 sm:$0xff]   ;;  %v5787_v0 = vld [vmem:[%s8073_s1 + $0x254] ss:$8 sps:$4 sm:$0xff]  }
  0x6b   :  { %3842 = vmatmul.mubr.bf16.gmra.mrb[20].mxu0 %v5691_v2  ;;  %3328 = vmatpush1.bf16.msra.mxu1 %v5688_v1  ;;  %v5790_v1 = vld [vmem:[%s8073_s1 + $0x754] ss:$8 sps:$4 sm:$0xff]  }
  0x6c   :  { %3893 = vmatpush1.bf16.msra.mxu0 %v5692_v3  ;;  %3329 = vmatprep.subr.bf16.mxu1 %v5697_v4  ;;  %v5791_v2 = vld [vmem:[%s8074_s0 + $0x21c] ss:$88 sps:$4 sm:$0xff]   ;;  %v5785_v4 = vld [vmem:[%s8073_s1 + $0x250] ss:$8 sps:$4 sm:$0xff]  }
  0x6d   :  { %3894 = vmatprep.subr.bf16.mxu0 %v5700_v5  ;;  %3286 = vmatprep.mubr.bf16.mxu1 %v5701_v6  ;;  %v5793_v3 = vld [vmem:[%s8074_s0 + $0x244] ss:$88 sps:$4 sm:$0xff]   ;;  %v5788_v5 = vld [vmem:[%s8073_s1 + $0x750] ss:$8 sps:$4 sm:$0xff]  }
  0x6e   :  { %3851 = vmatprep.mubr.bf16.mxu0 %v5703_v7  ;;  %v5798_v6 = vld [vmem:[%s8073_s1 + $0x264] ss:$8 sps:$4 sm:$0xff]  }
  0x6f   :  { %3330 = vmatpush1.bf16.msra.mxu1 %v5695_v8  ;;  %v5802_v7 = vld [vmem:[%s8073_s1 + $0x764] ss:$8 sps:$4 sm:$0xff]   ;;  %v5795_v8 = vld [vmem:[%s8074_s0 + $0x218] ss:$88 sps:$4 sm:$0xff]  }
  0x70   :  { %3895 = vmatpush1.bf16.msra.mxu0 %v5698_v9  ;;  %3331 = vmatprep.subr.bf16.mxu1 %v5708_v10  ;;  %v5796_v9 = vld [vmem:[%s8073_s1 + $0x260] ss:$8 sps:$4 sm:$0xff]  }
  0x71   :  { %3896 = vmatprep.subr.bf16.mxu0 %v5712_v11  ;;  %v5799_v10 = vld [vmem:[%s8074_s0 + $0x240] ss:$88 sps:$4 sm:$0xff]  }
  0x72   :  { %3287 = vmatmul.mubr.bf16.gmra.mrb[24].mxu1 %v5705_v12  ;;  %v5800_v11 = vld [vmem:[%s8073_s1 + $0x760] ss:$8 sps:$4 sm:$0xff]   ;;  %v5805_v12 = vld [vmem:[%s8073_s1 + $0x274] ss:$8 sps:$4 sm:$0xff]  }
  0x73   :  { %3852 = vmatmul.mubr.bf16.gmra.mrb[24].mxu0 %v5709_v14  ;;  %3332 = vmatpush1.bf16.msra.mxu1 %v5706_v13  ;;  %v5808_v13 = vld [vmem:[%s8073_s1 + $0x774] ss:$8 sps:$4 sm:$0xff]   ;;  %v5809_v14 = vld [vmem:[%s8074_s0 + $0x2cc] ss:$88 sps:$4 sm:$0xff]  }
  0x74   :  { %3897 = vmatpush1.bf16.msra.mxu0 %v5710_v15  ;;  %3333 = vmatprep.subr.bf16.mxu1 %v5715_v16  ;;  %v5811_v15 = vld [vmem:[%s8074_s0 + $0x2f4] ss:$88 sps:$4 sm:$0xff]   ;;  %v5803_v16 = vld [vmem:[%s8073_s1 + $0x270] ss:$8 sps:$4 sm:$0xff]  }
  0x75   :  { %3898 = vmatprep.subr.bf16.mxu0 %v5718_v17  ;;  %3296 = vmatprep.mubr.bf16.mxu1 %v5719_v18  ;;  %v5806_v17 = vld [vmem:[%s8073_s1 + $0x770] ss:$8 sps:$4 sm:$0xff]   ;;  %v5816_v18 = vld [vmem:[%s8073_s1 + $0x284] ss:$8 sps:$4 sm:$0xff]  }
  0x76   :  { %3861 = vmatprep.mubr.bf16.mxu0 %v5721_v19  ;;  %v5820_v19 = vld [vmem:[%s8073_s1 + $0x784] ss:$8 sps:$4 sm:$0xff]  }
  0x77   :  { %3334 = vmatpush1.bf16.msra.mxu1 %v5713_v20  ;;  %v5813_v20 = vld [vmem:[%s8074_s0 + $0x2c8] ss:$88 sps:$4 sm:$0xff]  }
  0x78   :  { %3899 = vmatpush1.bf16.msra.mxu0 %v5716_v21  ;;  %3335 = vmatprep.subr.bf16.mxu1 %v5726_v22  ;;  %v5814_v21 = vld [vmem:[%s8073_s1 + $0x280] ss:$8 sps:$4 sm:$0xff]  }
  0x79   :  { %3900 = vmatprep.subr.bf16.mxu0 %v5730_v23  ;;  %v5817_v22 = vld [vmem:[%s8074_s0 + $0x2f0] ss:$88 sps:$4 sm:$0xff]  }
  0x7a   :  { %3297 = vmatmul.mubr.bf16.gmra.mrb[28].mxu1 %v5723_v24  ;;  %v5818_v23 = vld [vmem:[%s8073_s1 + $0x780] ss:$8 sps:$4 sm:$0xff]   ;;  %v5823_v24 = vld [vmem:[%s8073_s1 + $0x294] ss:$8 sps:$4 sm:$0xff]  }
  0x7b   :  { %3862 = vmatmul.mubr.bf16.gmra.mrb[28].mxu0 %v5727_v26  ;;  %3336 = vmatpush1.bf16.msra.mxu1 %v5724_v25  ;;  %v5826_v25 = vld [vmem:[%s8073_s1 + $0x794] ss:$8 sps:$4 sm:$0xff]  }
  0x7c   :  { %3901 = vmatpush1.bf16.msra.mxu0 %v5728_v27  ;;  %3337 = vmatprep.subr.bf16.mxu1 %v5733_v28  ;;  %v5827_v26 = vld [vmem:[%s8074_s0 + $0x37c] ss:$88 sps:$4 sm:$0xff]   ;;  %v5821_v28 = vld [vmem:[%s8073_s1 + $0x290] ss:$8 sps:$4 sm:$0xff]  }
  0x7d   :  { %3902 = vmatprep.subr.bf16.mxu0 %v5736_v29  ;;  %3339 = vmatprep.mubr.bf16.mxu1 %v5739_v30  ;;  %v5829_v27 = vld [vmem:[%s8074_s0 + $0x3a4] ss:$88 sps:$4 sm:$0xff]   ;;  %v5824_v29 = vld [vmem:[%s8073_s1 + $0x790] ss:$8 sps:$4 sm:$0xff]  }
  0x7e   :  { %3904 = vmatprep.mubr.bf16.mxu0 %v5742_v31  ;;  %v5834_v30 = vld [vmem:[%s8073_s1 + $0x2a4] ss:$8 sps:$4 sm:$0xff]  }
  0x7f   :  { %3338 = vmatpush1.bf16.msra.mxu1 %v5731_v32  ;;  %v5838_v31 = vld [vmem:[%s8073_s1 + $0x7a4] ss:$8 sps:$4 sm:$0xff]   ;;  %v5831_v32 = vld [vmem:[%s8074_s0 + $0x378] ss:$88 sps:$4 sm:$0xff]  }
  0x80   :  { %3903 = vmatpush1.bf16.msra.mxu0 %v5734_v33  ;;  %3420 = vmatprep.subr.bf16.mxu1 %v5745_v34  ;;  %v5832_v33 = vld [vmem:[%s8073_s1 + $0x2a0] ss:$8 sps:$4 sm:$0xff]  }
  0x81   :  { %3985 = vmatprep.subr.bf16.mxu0 %v5748_v35  ;;  %v5835_v34 = vld [vmem:[%s8074_s0 + $0x3a0] ss:$88 sps:$4 sm:$0xff]  }
  0x82   :  { %3340 = vmatmul.mubr.bf16.vlgmr.msra.gmra.mrb[0].mxu1 %v5737_v36  ;;  %v5836_v35 = vld [vmem:[%s8073_s1 + $0x7a0] ss:$8 sps:$4 sm:$0xff]   ;;  %v5841_v36 = vld [vmem:[%s8073_s1 + $0x2b4] ss:$8 sps:$4 sm:$0xff]  }
  0x83   :  { %3905 = vmatmul.mubr.bf16.vlgmr.msra.gmra.mrb[0].mxu0 %v5740_v37  ;;  %3421 = vmatpush1.bf16.msra.mxu1 %v5743_v38  ;;  %v5844_v37 = vld [vmem:[%s8073_s1 + $0x7b4] ss:$8 sps:$4 sm:$0xff]   ;;  %v5845_v38 = vld [vmem:[%s8074_s0 + $0x42c] ss:$88 sps:$4 sm:$0xff]  }
  0x84   :  { %3986 = vmatpush1.bf16.msra.mxu0 %v5746_v39  ;;  %3422 = vmatprep.subr.bf16.mxu1 %v5751_v40  ;;  %v5847_v39 = vld [vmem:[%s8074_s0 + $0x454] ss:$88 sps:$4 sm:$0xff]   ;;  %v5839_v40 = vld [vmem:[%s8073_s1 + $0x2b0] ss:$8 sps:$4 sm:$0xff]  }
  0x85   :  { %3987 = vmatprep.subr.bf16.mxu0 %v5754_v41  ;;  %3349 = vmatprep.mubr.bf16.mxu1 %v5755_v42  ;;  %v5842_v41 = vld [vmem:[%s8073_s1 + $0x7b0] ss:$8 sps:$4 sm:$0xff]   ;;  %v5852_v42 = vld [vmem:[%s8073_s1 + $0x2c4] ss:$8 sps:$4 sm:$0xff]  }
  0x86   :  { %3914 = vmatprep.mubr.bf16.mxu0 %v5757_v43  ;;  %v5856_v43 = vld [vmem:[%s8073_s1 + $0x7c4] ss:$8 sps:$4 sm:$0xff]  }
  0x87   :  { %3423 = vmatpush1.bf16.msra.mxu1 %v5749_v44  ;;  %v5849_v44 = vld [vmem:[%s8074_s0 + $0x428] ss:$88 sps:$4 sm:$0xff]  }
  0x88   :  { %3988 = vmatpush1.bf16.msra.mxu0 %v5752_v45  ;;  %3424 = vmatprep.subr.bf16.mxu1 %v5762_v46  ;;  %v5850_v45 = vld [vmem:[%s8073_s1 + $0x2c0] ss:$8 sps:$4 sm:$0xff]  }
  0x89   :  { %3989 = vmatprep.subr.bf16.mxu0 %v5766_v47  ;;  %v5853_v46 = vld [vmem:[%s8074_s0 + $0x450] ss:$88 sps:$4 sm:$0xff]  }
  0x8a   :  { %3350 = vmatmul.mubr.bf16.gmra.mrb[4].mxu1 %v5759_v48  ;;  %v5854_v47 = vld [vmem:[%s8073_s1 + $0x7c0] ss:$8 sps:$4 sm:$0xff]   ;;  %v5859_v48 = vld [vmem:[%s8073_s1 + $0x2d4] ss:$8 sps:$4 sm:$0xff]  }
  0x8b   :  { %3915 = vmatmul.mubr.bf16.gmra.mrb[4].mxu0 %v5763_v50  ;;  %3425 = vmatpush1.bf16.msra.mxu1 %v5760_v49  ;;  %v5862_v49 = vld [vmem:[%s8073_s1 + $0x7d4] ss:$8 sps:$4 sm:$0xff]  }
  0x8c   :  { %3990 = vmatpush1.bf16.msra.mxu0 %v5764_v51  ;;  %3426 = vmatprep.subr.bf16.mxu1 %v5769_v52  ;;  %v5863_v50 = vld [vmem:[%s8074_s0 + $0x4dc] ss:$88 sps:$4 sm:$0xff]   ;;  %v5857_v52 = vld [vmem:[%s8073_s1 + $0x2d0] ss:$8 sps:$4 sm:$0xff]  }
  0x8d   :  { %3991 = vmatprep.subr.bf16.mxu0 %v5772_v53  ;;  %3359 = vmatprep.mubr.bf16.mxu1 %v5773_v54  ;;  %v5865_v51 = vld [vmem:[%s8074_s0 + $0x504] ss:$88 sps:$4 sm:$0xff]   ;;  %v5860_v53 = vld [vmem:[%s8073_s1 + $0x7d0] ss:$8 sps:$4 sm:$0xff]  }
  0x8e   :  { %3924 = vmatprep.mubr.bf16.mxu0 %v5775_v55  ;;  %v5870_v54 = vld [vmem:[%s8073_s1 + $0x2e4] ss:$8 sps:$4 sm:$0xff]  }
  0x8f   :  { %3427 = vmatpush1.bf16.msra.mxu1 %v5767_v56  ;;  %v5874_v55 = vld [vmem:[%s8073_s1 + $0x7e4] ss:$8 sps:$4 sm:$0xff]   ;;  %v5867_v56 = vld [vmem:[%s8074_s0 + $0x4d8] ss:$88 sps:$4 sm:$0xff]  }
  0x90   :  { %3992 = vmatpush1.bf16.msra.mxu0 %v5770_v57  ;;  %3428 = vmatprep.subr.bf16.mxu1 %v5780_v58  ;;  %v5868_v57 = vld [vmem:[%s8073_s1 + $0x2e0] ss:$8 sps:$4 sm:$0xff]  }
  0x91   :  { %3993 = vmatprep.subr.bf16.mxu0 %v5784_v59  ;;  %v5871_v58 = vld [vmem:[%s8074_s0 + $0x500] ss:$88 sps:$4 sm:$0xff]  }
  0x92   :  { %3360 = vmatmul.mubr.bf16.gmra.mrb[8].mxu1 %v5777_v60  ;;  %v5872_v59 = vld [vmem:[%s8073_s1 + $0x7e0] ss:$8 sps:$4 sm:$0xff]   ;;  %v5877_v60 = vld [vmem:[%s8073_s1 + $0x2f4] ss:$8 sps:$4 sm:$0xff]  }
  0x93   :  { %3925 = vmatmul.mubr.bf16.gmra.mrb[8].mxu0 %v5781_v62  ;;  %3429 = vmatpush1.bf16.msra.mxu1 %v5778_v61  ;;  %v5880_v61 = vld [vmem:[%s8073_s1 + $0x7f4] ss:$8 sps:$4 sm:$0xff]  }
  0x94   :  { %3994 = vmatpush1.bf16.msra.mxu0 %v5782_v63  ;;  %3430 = vmatprep.subr.bf16.mxu1 %v5787_v0  ;;  %v5883_v62 = vld [vmem:[%s8074_s0 + $0x14] ss:$88 sps:$4 sm:$0xff]   ;;  %v5875_v0 = vld [vmem:[%s8073_s1 + $0x2f0] ss:$8 sps:$4 sm:$0xff]  }
  0x95   :  { %3995 = vmatprep.subr.bf16.mxu0 %v5790_v1  ;;  %3369 = vmatprep.mubr.bf16.mxu1 %v5791_v2  ;;  %v5886_v63 = vld [vmem:[%s8074_s0 + $0x3c] ss:$88 sps:$4 sm:$0xff]   ;;  %v5878_v1 = vld [vmem:[%s8073_s1 + $0x7f0] ss:$8 sps:$4 sm:$0xff]   ;;  %v5889_v2 = vld [vmem:[%s8073_s1 + $0x304] ss:$8 sps:$4 sm:$0xff]  }
  0x96   :  { %3934 = vmatprep.mubr.bf16.mxu0 %v5793_v3  ;;  %v5892_v3 = vld [vmem:[%s8073_s1 + $0x804] ss:$8 sps:$4 sm:$0xff]  }
  0x97   :  { %3431 = vmatpush1.bf16.msra.mxu1 %v5785_v4  ;;  %v5881_v4 = vld [vmem:[%s8074_s0 + $0x10] ss:$88 sps:$4 sm:$0xff]  }
  0x98   :  { %3996 = vmatpush1.bf16.msra.mxu0 %v5788_v5  ;;  %3432 = vmatprep.subr.bf16.mxu1 %v5798_v6  ;;  %v5884_v5 = vld [vmem:[%s8074_s0 + $0x38] ss:$88 sps:$4 sm:$0xff]   ;;  %v5887_v6 = vld [vmem:[%s8073_s1 + $0x300] ss:$8 sps:$4 sm:$0xff]  }
  0x99   :  { %3997 = vmatprep.subr.bf16.mxu0 %v5802_v7  ;;  %v5890_v7 = vld [vmem:[%s8073_s1 + $0x800] ss:$8 sps:$4 sm:$0xff]  }
  0x9a   :  { %3370 = vmatmul.mubr.bf16.gmra.mrb[12].mxu1 %v5795_v8  ;;  %v5895_v8 = vld [vmem:[%s8073_s1 + $0x314] ss:$8 sps:$4 sm:$0xff]  }
  0x9b   :  { %3935 = vmatmul.mubr.bf16.gmra.mrb[12].mxu0 %v5799_v10  ;;  %3433 = vmatpush1.bf16.msra.mxu1 %v5796_v9  ;;  %v5898_v9 = vld [vmem:[%s8073_s1 + $0x814] ss:$8 sps:$4 sm:$0xff]  }
  0x9c   :  { %3998 = vmatpush1.bf16.msra.mxu0 %v5800_v11  ;;  %3434 = vmatprep.subr.bf16.mxu1 %v5805_v12  ;;  %v5899_v10 = vld [vmem:[%s8074_s0 + $0xc4] ss:$88 sps:$4 sm:$0xff]   ;;  %v5893_v12 = vld [vmem:[%s8073_s1 + $0x310] ss:$8 sps:$4 sm:$0xff]  }
  0x9d   :  { %3999 = vmatprep.subr.bf16.mxu0 %v5808_v13  ;;  %3379 = vmatprep.mubr.bf16.mxu1 %v5809_v14  ;;  %v5901_v11 = vld [vmem:[%s8074_s0 + $0xec] ss:$88 sps:$4 sm:$0xff]   ;;  %v5896_v13 = vld [vmem:[%s8073_s1 + $0x810] ss:$8 sps:$4 sm:$0xff]  }
  0x9e   :  { %3944 = vmatprep.mubr.bf16.mxu0 %v5811_v15  ;;  %v5906_v14 = vld [vmem:[%s8073_s1 + $0x324] ss:$8 sps:$4 sm:$0xff]  }
  0x9f   :  { %3435 = vmatpush1.bf16.msra.mxu1 %v5803_v16  ;;  %v5910_v15 = vld [vmem:[%s8073_s1 + $0x824] ss:$8 sps:$4 sm:$0xff]   ;;  %v5903_v16 = vld [vmem:[%s8074_s0 + $0xc0] ss:$88 sps:$4 sm:$0xff]  }
  0xa0   :  { %4000 = vmatpush1.bf16.msra.mxu0 %v5806_v17  ;;  %3436 = vmatprep.subr.bf16.mxu1 %v5816_v18  ;;  %v5904_v17 = vld [vmem:[%s8073_s1 + $0x320] ss:$8 sps:$4 sm:$0xff]  }
  0xa1   :  { %4001 = vmatprep.subr.bf16.mxu0 %v5820_v19  ;;  %v5907_v18 = vld [vmem:[%s8074_s0 + $0xe8] ss:$88 sps:$4 sm:$0xff]  }
  0xa2   :  { %3380 = vmatmul.mubr.bf16.gmra.mrb[16].mxu1 %v5813_v20  ;;  %v5908_v19 = vld [vmem:[%s8073_s1 + $0x820] ss:$8 sps:$4 sm:$0xff]   ;;  %v5913_v20 = vld [vmem:[%s8073_s1 + $0x334] ss:$8 sps:$4 sm:$0xff]  }
  0xa3   :  { %3945 = vmatmul.mubr.bf16.gmra.mrb[16].mxu0 %v5817_v22  ;;  %3437 = vmatpush1.bf16.msra.mxu1 %v5814_v21  ;;  %v5916_v21 = vld [vmem:[%s8073_s1 + $0x834] ss:$8 sps:$4 sm:$0xff]  }
  0xa4   :  { %4002 = vmatpush1.bf16.msra.mxu0 %v5818_v23  ;;  %3438 = vmatprep.subr.bf16.mxu1 %v5823_v24  ;;  %v5917_v22 = vld [vmem:[%s8074_s0 + $0x174] ss:$88 sps:$4 sm:$0xff]   ;;  %v5911_v24 = vld [vmem:[%s8073_s1 + $0x330] ss:$8 sps:$4 sm:$0xff]  }
  0xa5   :  { %4003 = vmatprep.subr.bf16.mxu0 %v5826_v25  ;;  %3389 = vmatprep.mubr.bf16.mxu1 %v5827_v26  ;;  %v5919_v23 = vld [vmem:[%s8074_s0 + $0x19c] ss:$88 sps:$4 sm:$0xff]   ;;  %v5914_v25 = vld [vmem:[%s8073_s1 + $0x830] ss:$8 sps:$4 sm:$0xff]   ;;  %v5924_v26 = vld [vmem:[%s8073_s1 + $0x344] ss:$8 sps:$4 sm:$0xff]  }
  0xa6   :  { %3954 = vmatprep.mubr.bf16.mxu0 %v5829_v27  ;;  %v5928_v27 = vld [vmem:[%s8073_s1 + $0x844] ss:$8 sps:$4 sm:$0xff]  }
  0xa7   :  { %3439 = vmatpush1.bf16.msra.mxu1 %v5821_v28  ;;  %v5921_v28 = vld [vmem:[%s8074_s0 + $0x170] ss:$88 sps:$4 sm:$0xff]  }
  0xa8   :  { %4004 = vmatpush1.bf16.msra.mxu0 %v5824_v29  ;;  %3440 = vmatprep.subr.bf16.mxu1 %v5834_v30  ;;  %v5922_v29 = vld [vmem:[%s8073_s1 + $0x340] ss:$8 sps:$4 sm:$0xff]   ;;  %v5925_v30 = vld [vmem:[%s8074_s0 + $0x198] ss:$88 sps:$4 sm:$0xff]  }
  0xa9   :  { %4005 = vmatprep.subr.bf16.mxu0 %v5838_v31  ;;  %v5926_v31 = vld [vmem:[%s8073_s1 + $0x840] ss:$8 sps:$4 sm:$0xff]  }
  0xaa   :  { %3390 = vmatmul.mubr.bf16.gmra.mrb[20].mxu1 %v5831_v32  ;;  %v5931_v32 = vld [vmem:[%s8073_s1 + $0x354] ss:$8 sps:$4 sm:$0xff]  }
  0xab   :  { %3955 = vmatmul.mubr.bf16.gmra.mrb[20].mxu0 %v5835_v34  ;;  %3441 = vmatpush1.bf16.msra.mxu1 %v5832_v33  ;;  %v5934_v33 = vld [vmem:[%s8073_s1 + $0x854] ss:$8 sps:$4 sm:$0xff]  }
  0xac   :  { %4006 = vmatpush1.bf16.msra.mxu0 %v5836_v35  ;;  %3442 = vmatprep.subr.bf16.mxu1 %v5841_v36  ;;  %v5935_v34 = vld [vmem:[%s8074_s0 + $0x224] ss:$88 sps:$4 sm:$0xff]   ;;  %v5929_v36 = vld [vmem:[%s8073_s1 + $0x350] ss:$8 sps:$4 sm:$0xff]  }
  0xad   :  { %4007 = vmatprep.subr.bf16.mxu0 %v5844_v37  ;;  %3399 = vmatprep.mubr.bf16.mxu1 %v5845_v38  ;;  %v5937_v35 = vld [vmem:[%s8074_s0 + $0x24c] ss:$88 sps:$4 sm:$0xff]   ;;  %v5932_v37 = vld [vmem:[%s8073_s1 + $0x850] ss:$8 sps:$4 sm:$0xff]  }
  0xae   :  { %3964 = vmatprep.mubr.bf16.mxu0 %v5847_v39  ;;  %v5942_v38 = vld [vmem:[%s8073_s1 + $0x364] ss:$8 sps:$4 sm:$0xff]  }
  0xaf   :  { %3443 = vmatpush1.bf16.msra.mxu1 %v5839_v40  ;;  %v5946_v39 = vld [vmem:[%s8073_s1 + $0x864] ss:$8 sps:$4 sm:$0xff]   ;;  %v5939_v40 = vld [vmem:[%s8074_s0 + $0x220] ss:$88 sps:$4 sm:$0xff]  }
  0xb0   :  { %4008 = vmatpush1.bf16.msra.mxu0 %v5842_v41  ;;  %3444 = vmatprep.subr.bf16.mxu1 %v5852_v42  ;;  %v5940_v41 = vld [vmem:[%s8073_s1 + $0x360] ss:$8 sps:$4 sm:$0xff]  }
  0xb1   :  { %4009 = vmatprep.subr.bf16.mxu0 %v5856_v43  ;;  %v5943_v42 = vld [vmem:[%s8074_s0 + $0x248] ss:$88 sps:$4 sm:$0xff]  }
  0xb2   :  { %3400 = vmatmul.mubr.bf16.gmra.mrb[24].mxu1 %v5849_v44  ;;  %v5944_v43 = vld [vmem:[%s8073_s1 + $0x860] ss:$8 sps:$4 sm:$0xff]   ;;  %v5949_v44 = vld [vmem:[%s8073_s1 + $0x374] ss:$8 sps:$4 sm:$0xff]  }
  0xb3   :  { %3965 = vmatmul.mubr.bf16.gmra.mrb[24].mxu0 %v5853_v46  ;;  %3445 = vmatpush1.bf16.msra.mxu1 %v5850_v45  ;;  %v5952_v45 = vld [vmem:[%s8073_s1 + $0x874] ss:$8 sps:$4 sm:$0xff]  }
  0xb4   :  { %4010 = vmatpush1.bf16.msra.mxu0 %v5854_v47  ;;  %3446 = vmatprep.subr.bf16.mxu1 %v5859_v48  ;;  %v5953_v46 = vld [vmem:[%s8074_s0 + $0x2d4] ss:$88 sps:$4 sm:$0xff]   ;;  %v5947_v48 = vld [vmem:[%s8073_s1 + $0x370] ss:$8 sps:$4 sm:$0xff]  }
  0xb5   :  { %4011 = vmatprep.subr.bf16.mxu0 %v5862_v49  ;;  %3409 = vmatprep.mubr.bf16.mxu1 %v5863_v50  ;;  %v5955_v47 = vld [vmem:[%s8074_s0 + $0x2fc] ss:$88 sps:$4 sm:$0xff]   ;;  %v5950_v49 = vld [vmem:[%s8073_s1 + $0x870] ss:$8 sps:$4 sm:$0xff]   ;;  %v5960_v50 = vld [vmem:[%s8073_s1 + $0x384] ss:$8 sps:$4 sm:$0xff]  }
  0xb6   :  { %3974 = vmatprep.mubr.bf16.mxu0 %v5865_v51  ;;  %v5964_v51 = vld [vmem:[%s8073_s1 + $0x884] ss:$8 sps:$4 sm:$0xff]  }
  0xb7   :  { %3447 = vmatpush1.bf16.msra.mxu1 %v5857_v52  ;;  %v5957_v52 = vld [vmem:[%s8074_s0 + $0x2d0] ss:$88 sps:$4 sm:$0xff]  }
  0xb8   :  { %4012 = vmatpush1.bf16.msra.mxu0 %v5860_v53  ;;  %3448 = vmatprep.subr.bf16.mxu1 %v5870_v54  ;;  %v5958_v53 = vld [vmem:[%s8073_s1 + $0x380] ss:$8 sps:$4 sm:$0xff]   ;;  %v5961_v54 = vld [vmem:[%s8074_s0 + $0x2f8] ss:$88 sps:$4 sm:$0xff]  }
  0xb9   :  { %4013 = vmatprep.subr.bf16.mxu0 %v5874_v55  ;;  %v5962_v55 = vld [vmem:[%s8073_s1 + $0x880] ss:$8 sps:$4 sm:$0xff]  }
  0xba   :  { %3410 = vmatmul.mubr.bf16.gmra.mrb[28].mxu1 %v5867_v56  ;;  %v5967_v56 = vld [vmem:[%s8073_s1 + $0x394] ss:$8 sps:$4 sm:$0xff]  }
  0xbb   :  { %3975 = vmatmul.mubr.bf16.gmra.mrb[28].mxu0 %v5871_v58  ;;  %3449 = vmatpush1.bf16.msra.mxu1 %v5868_v57  ;;  %v5970_v57 = vld [vmem:[%s8073_s1 + $0x894] ss:$8 sps:$4 sm:$0xff]  }
  0xbc   :  { %4014 = vmatpush1.bf16.msra.mxu0 %v5872_v59  ;;  %3450 = vmatprep.subr.bf16.mxu1 %v5877_v60  ;;  %v5971_v58 = vld [vmem:[%s8074_s0 + $0x384] ss:$88 sps:$4 sm:$0xff]   ;;  %v5965_v60 = vld [vmem:[%s8073_s1 + $0x390] ss:$8 sps:$4 sm:$0xff]  }
  0xbd   :  { %4015 = vmatprep.subr.bf16.mxu0 %v5880_v61  ;;  %3452 = vmatprep.mubr.bf16.mxu1 %v5883_v62  ;;  %v5973_v59 = vld [vmem:[%s8074_s0 + $0x3ac] ss:$88 sps:$4 sm:$0xff]   ;;  %v5968_v61 = vld [vmem:[%s8073_s1 + $0x890] ss:$8 sps:$4 sm:$0xff]  }
  0xbe   :  { %4017 = vmatprep.mubr.bf16.mxu0 %v5886_v63  ;;  %v5978_v62 = vld [vmem:[%s8073_s1 + $0x3a4] ss:$8 sps:$4 sm:$0xff]  }
  0xbf   :  { %3451 = vmatpush1.bf16.msra.mxu1 %v5875_v0  ;;  %v5982_v63 = vld [vmem:[%s8073_s1 + $0x8a4] ss:$8 sps:$4 sm:$0xff]   ;;  %v5975_v0 = vld [vmem:[%s8074_s0 + $0x380] ss:$88 sps:$4 sm:$0xff]  }
  0xc0   :  { %4016 = vmatpush1.bf16.msra.mxu0 %v5878_v1  ;;  %3533 = vmatprep.subr.bf16.mxu1 %v5889_v2  ;;  %v5976_v1 = vld [vmem:[%s8073_s1 + $0x3a0] ss:$8 sps:$4 sm:$0xff]  }
  0xc1   :  { %4098 = vmatprep.subr.bf16.mxu0 %v5892_v3  ;;  %v5979_v2 = vld [vmem:[%s8074_s0 + $0x3a8] ss:$88 sps:$4 sm:$0xff]  }
  0xc2   :  { %3453 = vmatmul.mubr.bf16.vlgmr.msra.gmra.mrb[0].mxu1 %v5881_v4  ;;  %v5980_v3 = vld [vmem:[%s8073_s1 + $0x8a0] ss:$8 sps:$4 sm:$0xff]   ;;  %v5985_v4 = vld [vmem:[%s8073_s1 + $0x3b4] ss:$8 sps:$4 sm:$0xff]  }
  0xc3   :  { %4018 = vmatmul.mubr.bf16.vlgmr.msra.gmra.mrb[0].mxu0 %v5884_v5  ;;  %3534 = vmatpush1.bf16.msra.mxu1 %v5887_v6  ;;  %v5988_v5 = vld [vmem:[%s8073_s1 + $0x8b4] ss:$8 sps:$4 sm:$0xff]  }
  0xc4   :  { %4099 = vmatpush1.bf16.msra.mxu0 %v5890_v7  ;;  %3535 = vmatprep.subr.bf16.mxu1 %v5895_v8  ;;  %v5989_v6 = vld [vmem:[%s8074_s0 + $0x434] ss:$88 sps:$4 sm:$0xff]   ;;  %v5983_v8 = vld [vmem:[%s8073_s1 + $0x3b0] ss:$8 sps:$4 sm:$0xff]  }
  0xc5   :  { %4100 = vmatprep.subr.bf16.mxu0 %v5898_v9  ;;  %3462 = vmatprep.mubr.bf16.mxu1 %v5899_v10  ;;  %v5991_v7 = vld [vmem:[%s8074_s0 + $0x45c] ss:$88 sps:$4 sm:$0xff]   ;;  %v5986_v9 = vld [vmem:[%s8073_s1 + $0x8b0] ss:$8 sps:$4 sm:$0xff]   ;;  %v5996_v10 = vld [vmem:[%s8073_s1 + $0x3c4] ss:$8 sps:$4 sm:$0xff]  }
  0xc6   :  { %4027 = vmatprep.mubr.bf16.mxu0 %v5901_v11  ;;  %v6000_v11 = vld [vmem:[%s8073_s1 + $0x8c4] ss:$8 sps:$4 sm:$0xff]  }
  0xc7   :  { %3536 = vmatpush1.bf16.msra.mxu1 %v5893_v12  ;;  %v5993_v12 = vld [vmem:[%s8074_s0 + $0x430] ss:$88 sps:$4 sm:$0xff]  }
  0xc8   :  { %4101 = vmatpush1.bf16.msra.mxu0 %v5896_v13  ;;  %3537 = vmatprep.subr.bf16.mxu1 %v5906_v14  ;;  %v5994_v13 = vld [vmem:[%s8073_s1 + $0x3c0] ss:$8 sps:$4 sm:$0xff]   ;;  %v5997_v14 = vld [vmem:[%s8074_s0 + $0x458] ss:$88 sps:$4 sm:$0xff]  }
  0xc9   :  { %4102 = vmatprep.subr.bf16.mxu0 %v5910_v15  ;;  %v5998_v15 = vld [vmem:[%s8073_s1 + $0x8c0] ss:$8 sps:$4 sm:$0xff]  }
  0xca   :  { %3463 = vmatmul.mubr.bf16.gmra.mrb[4].mxu1 %v5903_v16  ;;  %v6003_v16 = vld [vmem:[%s8073_s1 + $0x3d4] ss:$8 sps:$4 sm:$0xff]  }
  0xcb   :  { %4028 = vmatmul.mubr.bf16.gmra.mrb[4].mxu0 %v5907_v18  ;;  %3538 = vmatpush1.bf16.msra.mxu1 %v5904_v17  ;;  %v6006_v17 = vld [vmem:[%s8073_s1 + $0x8d4] ss:$8 sps:$4 sm:$0xff]  }
  0xcc   :  { %4103 = vmatpush1.bf16.msra.mxu0 %v5908_v19  ;;  %3539 = vmatprep.subr.bf16.mxu1 %v5913_v20  ;;  %v6007_v18 = vld [vmem:[%s8074_s0 + $0x4e4] ss:$88 sps:$4 sm:$0xff]   ;;  %v6001_v20 = vld [vmem:[%s8073_s1 + $0x3d0] ss:$8 sps:$4 sm:$0xff]  }
  0xcd   :  { %4104 = vmatprep.subr.bf16.mxu0 %v5916_v21  ;;  %3472 = vmatprep.mubr.bf16.mxu1 %v5917_v22  ;;  %v6009_v19 = vld [vmem:[%s8074_s0 + $0x50c] ss:$88 sps:$4 sm:$0xff]   ;;  %v6004_v21 = vld [vmem:[%s8073_s1 + $0x8d0] ss:$8 sps:$4 sm:$0xff]  }
  0xce   :  { %4037 = vmatprep.mubr.bf16.mxu0 %v5919_v23  ;;  %v6014_v22 = vld [vmem:[%s8073_s1 + $0x3e4] ss:$8 sps:$4 sm:$0xff]  }
  0xcf   :  { %3540 = vmatpush1.bf16.msra.mxu1 %v5911_v24  ;;  %v6018_v23 = vld [vmem:[%s8073_s1 + $0x8e4] ss:$8 sps:$4 sm:$0xff]   ;;  %v6011_v24 = vld [vmem:[%s8074_s0 + $0x4e0] ss:$88 sps:$4 sm:$0xff]  }
  0xd0   :  { %4105 = vmatpush1.bf16.msra.mxu0 %v5914_v25  ;;  %3541 = vmatprep.subr.bf16.mxu1 %v5924_v26  ;;  %v6012_v25 = vld [vmem:[%s8073_s1 + $0x3e0] ss:$8 sps:$4 sm:$0xff]  }
  0xd1   :  { %4106 = vmatprep.subr.bf16.mxu0 %v5928_v27  ;;  %v6015_v26 = vld [vmem:[%s8074_s0 + $0x508] ss:$88 sps:$4 sm:$0xff]  }
  0xd2   :  { %3473 = vmatmul.mubr.bf16.gmra.mrb[8].mxu1 %v5921_v28  ;;  %v6016_v27 = vld [vmem:[%s8073_s1 + $0x8e0] ss:$8 sps:$4 sm:$0xff]   ;;  %v6021_v28 = vld [vmem:[%s8073_s1 + $0x3f4] ss:$8 sps:$4 sm:$0xff]  }
  0xd3   :  { %4038 = vmatmul.mubr.bf16.gmra.mrb[8].mxu0 %v5925_v30  ;;  %3542 = vmatpush1.bf16.msra.mxu1 %v5922_v29  ;;  %v6024_v29 = vld [vmem:[%s8073_s1 + $0x8f4] ss:$8 sps:$4 sm:$0xff]  }
  0xd4   :  { %4107 = vmatpush1.bf16.msra.mxu0 %v5926_v31  ;;  %3543 = vmatprep.subr.bf16.mxu1 %v5931_v32  ;;  %v6027_v30 = vld [vmem:[%s8074_s0 + $0x1c] ss:$88 sps:$4 sm:$0xff]   ;;  %v6019_v32 = vld [vmem:[%s8073_s1 + $0x3f0] ss:$8 sps:$4 sm:$0xff]  }
  0xd5   :  { %4108 = vmatprep.subr.bf16.mxu0 %v5934_v33  ;;  %3482 = vmatprep.mubr.bf16.mxu1 %v5935_v34  ;;  %v6030_v31 = vld [vmem:[%s8074_s0 + $0x44] ss:$88 sps:$4 sm:$0xff]   ;;  %v6022_v33 = vld [vmem:[%s8073_s1 + $0x8f0] ss:$8 sps:$4 sm:$0xff]  }
  0xd6   :  { %4047 = vmatprep.mubr.bf16.mxu0 %v5937_v35  ;;  %v6033_v34 = vld [vmem:[%s8073_s1 + $0x404] ss:$8 sps:$4 sm:$0xff]  }
  0xd7   :  { %3544 = vmatpush1.bf16.msra.mxu1 %v5929_v36  ;;  %v6036_v35 = vld [vmem:[%s8073_s1 + $0x904] ss:$8 sps:$4 sm:$0xff]   ;;  %v6025_v36 = vld [vmem:[%s8074_s0 + $0x18] ss:$88 sps:$4 sm:$0xff]  }
  0xd8   :  { %4109 = vmatpush1.bf16.msra.mxu0 %v5932_v37  ;;  %3545 = vmatprep.subr.bf16.mxu1 %v5942_v38  ;;  %v6028_v37 = vld [vmem:[%s8074_s0 + $0x40] ss:$88 sps:$4 sm:$0xff]  }
  0xd9   :  { %4110 = vmatprep.subr.bf16.mxu0 %v5946_v39  ;;  %v6031_v38 = vld [vmem:[%s8073_s1 + $0x400] ss:$8 sps:$4 sm:$0xff]  }
  0xda   :  { %3483 = vmatmul.mubr.bf16.gmra.mrb[12].mxu1 %v5939_v40  ;;  %v6034_v39 = vld [vmem:[%s8073_s1 + $0x900] ss:$8 sps:$4 sm:$0xff]   ;;  %v6039_v40 = vld [vmem:[%s8073_s1 + $0x414] ss:$8 sps:$4 sm:$0xff]  }
  0xdb   :  { %4048 = vmatmul.mubr.bf16.gmra.mrb[12].mxu0 %v5943_v42  ;;  %3546 = vmatpush1.bf16.msra.mxu1 %v5940_v41  ;;  %v6042_v41 = vld [vmem:[%s8073_s1 + $0x914] ss:$8 sps:$4 sm:$0xff]   ;;  %v6043_v42 = vld [vmem:[%s8074_s0 + $0xcc] ss:$88 sps:$4 sm:$0xff]  }
  0xdc   :  { %4111 = vmatpush1.bf16.msra.mxu0 %v5944_v43  ;;  %3547 = vmatprep.subr.bf16.mxu1 %v5949_v44  ;;  %v6045_v43 = vld [vmem:[%s8074_s0 + $0xf4] ss:$88 sps:$4 sm:$0xff]   ;;  %v6037_v44 = vld [vmem:[%s8073_s1 + $0x410] ss:$8 sps:$4 sm:$0xff]  }
  0xdd   :  { %4112 = vmatprep.subr.bf16.mxu0 %v5952_v45  ;;  %3492 = vmatprep.mubr.bf16.mxu1 %v5953_v46  ;;  %v6040_v45 = vld [vmem:[%s8073_s1 + $0x910] ss:$8 sps:$4 sm:$0xff]   ;;  %v6050_v46 = vld [vmem:[%s8073_s1 + $0x424] ss:$8 sps:$4 sm:$0xff]  }
  0xde   :  { %4057 = vmatprep.mubr.bf16.mxu0 %v5955_v47  ;;  %v6054_v47 = vld [vmem:[%s8073_s1 + $0x924] ss:$8 sps:$4 sm:$0xff]  }
  0xdf   :  { %3548 = vmatpush1.bf16.msra.mxu1 %v5947_v48  ;;  %v6047_v48 = vld [vmem:[%s8074_s0 + $0xc8] ss:$88 sps:$4 sm:$0xff]  }
  0xe0   :  { %4113 = vmatpush1.bf16.msra.mxu0 %v5950_v49  ;;  %3549 = vmatprep.subr.bf16.mxu1 %v5960_v50  ;;  %v6048_v49 = vld [vmem:[%s8073_s1 + $0x420] ss:$8 sps:$4 sm:$0xff]  }
  0xe1   :  { %4114 = vmatprep.subr.bf16.mxu0 %v5964_v51  ;;  %v6051_v50 = vld [vmem:[%s8074_s0 + $0xf0] ss:$88 sps:$4 sm:$0xff]  }
  0xe2   :  { %3493 = vmatmul.mubr.bf16.gmra.mrb[16].mxu1 %v5957_v52  ;;  %v6052_v51 = vld [vmem:[%s8073_s1 + $0x920] ss:$8 sps:$4 sm:$0xff]   ;;  %v6057_v52 = vld [vmem:[%s8073_s1 + $0x434] ss:$8 sps:$4 sm:$0xff]  }
  0xe3   :  { %4058 = vmatmul.mubr.bf16.gmra.mrb[16].mxu0 %v5961_v54  ;;  %3550 = vmatpush1.bf16.msra.mxu1 %v5958_v53  ;;  %v6060_v53 = vld [vmem:[%s8073_s1 + $0x934] ss:$8 sps:$4 sm:$0xff]  }
  0xe4   :  { %4115 = vmatpush1.bf16.msra.mxu0 %v5962_v55  ;;  %3551 = vmatprep.subr.bf16.mxu1 %v5967_v56  ;;  %v6061_v54 = vld [vmem:[%s8074_s0 + $0x17c] ss:$88 sps:$4 sm:$0xff]   ;;  %v6055_v56 = vld [vmem:[%s8073_s1 + $0x430] ss:$8 sps:$4 sm:$0xff]  }
  0xe5   :  { %4116 = vmatprep.subr.bf16.mxu0 %v5970_v57  ;;  %3502 = vmatprep.mubr.bf16.mxu1 %v5971_v58  ;;  %v6063_v55 = vld [vmem:[%s8074_s0 + $0x1a4] ss:$88 sps:$4 sm:$0xff]   ;;  %v6058_v57 = vld [vmem:[%s8073_s1 + $0x930] ss:$8 sps:$4 sm:$0xff]  }
  0xe6   :  { %4067 = vmatprep.mubr.bf16.mxu0 %v5973_v59  ;;  %v6068_v58 = vld [vmem:[%s8073_s1 + $0x444] ss:$8 sps:$4 sm:$0xff]  }
  0xe7   :  { %3552 = vmatpush1.bf16.msra.mxu1 %v5965_v60  ;;  %v6072_v59 = vld [vmem:[%s8073_s1 + $0x944] ss:$8 sps:$4 sm:$0xff]   ;;  %v6065_v60 = vld [vmem:[%s8074_s0 + $0x178] ss:$88 sps:$4 sm:$0xff]  }
  0xe8   :  { %4117 = vmatpush1.bf16.msra.mxu0 %v5968_v61  ;;  %3553 = vmatprep.subr.bf16.mxu1 %v5978_v62  ;;  %v6066_v61 = vld [vmem:[%s8073_s1 + $0x440] ss:$8 sps:$4 sm:$0xff]  }
  0xe9   :  { %4118 = vmatprep.subr.bf16.mxu0 %v5982_v63  ;;  %v6069_v62 = vld [vmem:[%s8074_s0 + $0x1a0] ss:$88 sps:$4 sm:$0xff]  }
  0xea   :  { %3503 = vmatmul.mubr.bf16.gmra.mrb[20].mxu1 %v5975_v0  ;;  %v6070_v63 = vld [vmem:[%s8073_s1 + $0x940] ss:$8 sps:$4 sm:$0xff]   ;;  %v6075_v0 = vld [vmem:[%s8073_s1 + $0x454] ss:$8 sps:$4 sm:$0xff]  }
  0xeb   :  { %4068 = vmatmul.mubr.bf16.gmra.mrb[20].mxu0 %v5979_v2  ;;  %3554 = vmatpush1.bf16.msra.mxu1 %v5976_v1  ;;  %v6078_v1 = vld [vmem:[%s8073_s1 + $0x954] ss:$8 sps:$4 sm:$0xff]   ;;  %v6079_v2 = vld [vmem:[%s8074_s0 + $0x22c] ss:$88 sps:$4 sm:$0xff]  }
  0xec   :  { %4119 = vmatpush1.bf16.msra.mxu0 %v5980_v3  ;;  %3555 = vmatprep.subr.bf16.mxu1 %v5985_v4  ;;  %v6081_v3 = vld [vmem:[%s8074_s0 + $0x254] ss:$88 sps:$4 sm:$0xff]   ;;  %v6073_v4 = vld [vmem:[%s8073_s1 + $0x450] ss:$8 sps:$4 sm:$0xff]  }
  0xed   :  { %4120 = vmatprep.subr.bf16.mxu0 %v5988_v5  ;;  %3512 = vmatprep.mubr.bf16.mxu1 %v5989_v6  ;;  %v6076_v5 = vld [vmem:[%s8073_s1 + $0x950] ss:$8 sps:$4 sm:$0xff]   ;;  %v6086_v6 = vld [vmem:[%s8073_s1 + $0x464] ss:$8 sps:$4 sm:$0xff]  }
  0xee   :  { %4077 = vmatprep.mubr.bf16.mxu0 %v5991_v7  ;;  %v6090_v7 = vld [vmem:[%s8073_s1 + $0x964] ss:$8 sps:$4 sm:$0xff]  }
  0xef   :  { %3556 = vmatpush1.bf16.msra.mxu1 %v5983_v8  ;;  %v6083_v8 = vld [vmem:[%s8074_s0 + $0x228] ss:$88 sps:$4 sm:$0xff]  }
  0xf0   :  { %4121 = vmatpush1.bf16.msra.mxu0 %v5986_v9  ;;  %3557 = vmatprep.subr.bf16.mxu1 %v5996_v10  ;;  %v6084_v9 = vld [vmem:[%s8073_s1 + $0x460] ss:$8 sps:$4 sm:$0xff]  }
  0xf1   :  { %4122 = vmatprep.subr.bf16.mxu0 %v6000_v11  ;;  %v6087_v10 = vld [vmem:[%s8074_s0 + $0x250] ss:$88 sps:$4 sm:$0xff]  }
  0xf2   :  { %3513 = vmatmul.mubr.bf16.gmra.mrb[24].mxu1 %v5993_v12  ;;  %v6088_v11 = vld [vmem:[%s8073_s1 + $0x960] ss:$8 sps:$4 sm:$0xff]   ;;  %v6093_v12 = vld [vmem:[%s8073_s1 + $0x474] ss:$8 sps:$4 sm:$0xff]  }
  0xf3   :  { %4078 = vmatmul.mubr.bf16.gmra.mrb[24].mxu0 %v5997_v14  ;;  %3558 = vmatpush1.bf16.msra.mxu1 %v5994_v13  ;;  %v6096_v13 = vld [vmem:[%s8073_s1 + $0x974] ss:$8 sps:$4 sm:$0xff]  }
  0xf4   :  { %4123 = vmatpush1.bf16.msra.mxu0 %v5998_v15  ;;  %3559 = vmatprep.subr.bf16.mxu1 %v6003_v16  ;;  %v6097_v14 = vld [vmem:[%s8074_s0 + $0x2dc] ss:$88 sps:$4 sm:$0xff]   ;;  %v6091_v16 = vld [vmem:[%s8073_s1 + $0x470] ss:$8 sps:$4 sm:$0xff]  }
  0xf5   :  { %4124 = vmatprep.subr.bf16.mxu0 %v6006_v17  ;;  %3522 = vmatprep.mubr.bf16.mxu1 %v6007_v18  ;;  %v6099_v15 = vld [vmem:[%s8074_s0 + $0x304] ss:$88 sps:$4 sm:$0xff]   ;;  %v6094_v17 = vld [vmem:[%s8073_s1 + $0x970] ss:$8 sps:$4 sm:$0xff]  }
  0xf6   :  { %4087 = vmatprep.mubr.bf16.mxu0 %v6009_v19  ;;  %v6104_v18 = vld [vmem:[%s8073_s1 + $0x484] ss:$8 sps:$4 sm:$0xff]  }
  0xf7   :  { %3560 = vmatpush1.bf16.msra.mxu1 %v6001_v20  ;;  %v6108_v19 = vld [vmem:[%s8073_s1 + $0x984] ss:$8 sps:$4 sm:$0xff]   ;;  %v6101_v20 = vld [vmem:[%s8074_s0 + $0x2d8] ss:$88 sps:$4 sm:$0xff]  }
  0xf8   :  { %4125 = vmatpush1.bf16.msra.mxu0 %v6004_v21  ;;  %3561 = vmatprep.subr.bf16.mxu1 %v6014_v22  ;;  %v6102_v21 = vld [vmem:[%s8073_s1 + $0x480] ss:$8 sps:$4 sm:$0xff]  }
  0xf9   :  { %4126 = vmatprep.subr.bf16.mxu0 %v6018_v23  ;;  %v6105_v22 = vld [vmem:[%s8074_s0 + $0x300] ss:$88 sps:$4 sm:$0xff]  }
  0xfa   :  { %3523 = vmatmul.mubr.bf16.gmra.mrb[28].mxu1 %v6011_v24  ;;  %v6106_v23 = vld [vmem:[%s8073_s1 + $0x980] ss:$8 sps:$4 sm:$0xff]   ;;  %v6111_v24 = vld [vmem:[%s8073_s1 + $0x494] ss:$8 sps:$4 sm:$0xff]  }
  0xfb   :  { %4088 = vmatmul.mubr.bf16.gmra.mrb[28].mxu0 %v6015_v26  ;;  %3562 = vmatpush1.bf16.msra.mxu1 %v6012_v25  ;;  %v6114_v25 = vld [vmem:[%s8073_s1 + $0x994] ss:$8 sps:$4 sm:$0xff]   ;;  %v6115_v26 = vld [vmem:[%s8074_s0 + $0x38c] ss:$88 sps:$4 sm:$0xff]  }
  0xfc   :  { %4127 = vmatpush1.bf16.msra.mxu0 %v6016_v27  ;;  %3563 = vmatprep.subr.bf16.mxu1 %v6021_v28  ;;  %v6117_v27 = vld [vmem:[%s8074_s0 + $0x3b4] ss:$88 sps:$4 sm:$0xff]   ;;  %v6109_v28 = vld [vmem:[%s8073_s1 + $0x490] ss:$8 sps:$4 sm:$0xff]  }
  0xfd   :  { %4128 = vmatprep.subr.bf16.mxu0 %v6024_v29  ;;  %3565 = vmatprep.mubr.bf16.mxu1 %v6027_v30  ;;  %v6112_v29 = vld [vmem:[%s8073_s1 + $0x990] ss:$8 sps:$4 sm:$0xff]   ;;  %v6122_v30 = vld [vmem:[%s8073_s1 + $0x4a4] ss:$8 sps:$4 sm:$0xff]  }
  0xfe   :  { %4130 = vmatprep.mubr.bf16.mxu0 %v6030_v31  ;;  %v6126_v31 = vld [vmem:[%s8073_s1 + $0x9a4] ss:$8 sps:$4 sm:$0xff]  }
  0xff   :  { %3564 = vmatpush1.bf16.msra.mxu1 %v6019_v32  ;;  %v6119_v32 = vld [vmem:[%s8074_s0 + $0x388] ss:$88 sps:$4 sm:$0xff]  }
 0x100   :  { %4129 = vmatpush1.bf16.msra.mxu0 %v6022_v33  ;;  %3646 = vmatprep.subr.bf16.mxu1 %v6033_v34  ;;  %v6120_v33 = vld [vmem:[%s8073_s1 + $0x4a0] ss:$8 sps:$4 sm:$0xff]  }
 0x101   :  { %4211 = vmatprep.subr.bf16.mxu0 %v6036_v35  ;;  %v6123_v34 = vld [vmem:[%s8074_s0 + $0x3b0] ss:$88 sps:$4 sm:$0xff]  }
 0x102   :  { %3566 = vmatmul.mubr.bf16.vlgmr.msra.gmra.mrb[0].mxu1 %v6025_v36  ;;  %v6124_v35 = vld [vmem:[%s8073_s1 + $0x9a0] ss:$8 sps:$4 sm:$0xff]   ;;  %v6129_v36 = vld [vmem:[%s8073_s1 + $0x4b4] ss:$8 sps:$4 sm:$0xff]  }
 0x103   :  { %4131 = vmatmul.mubr.bf16.vlgmr.msra.gmra.mrb[0].mxu0 %v6028_v37  ;;  %3647 = vmatpush1.bf16.msra.mxu1 %v6031_v38  ;;  %v6132_v37 = vld [vmem:[%s8073_s1 + $0x9b4] ss:$8 sps:$4 sm:$0xff]  }
 0x104   :  { %4212 = vmatpush1.bf16.msra.mxu0 %v6034_v39  ;;  %3648 = vmatprep.subr.bf16.mxu1 %v6039_v40  ;;  %v6133_v38 = vld [vmem:[%s8074_s0 + $0x43c] ss:$88 sps:$4 sm:$0xff]   ;;  %v6127_v40 = vld [vmem:[%s8073_s1 + $0x4b0] ss:$8 sps:$4 sm:$0xff]  }
 0x105   :  { %4213 = vmatprep.subr.bf16.mxu0 %v6042_v41  ;;  %3575 = vmatprep.mubr.bf16.mxu1 %v6043_v42  ;;  %v6135_v39 = vld [vmem:[%s8074_s0 + $0x464] ss:$88 sps:$4 sm:$0xff]   ;;  %v6130_v41 = vld [vmem:[%s8073_s1 + $0x9b0] ss:$8 sps:$4 sm:$0xff]  }
 0x106   :  { %4140 = vmatprep.mubr.bf16.mxu0 %v6045_v43  ;;  %v6140_v42 = vld [vmem:[%s8073_s1 + $0x4c4] ss:$8 sps:$4 sm:$0xff]  }
 0x107   :  { %3649 = vmatpush1.bf16.msra.mxu1 %v6037_v44  ;;  %v6144_v43 = vld [vmem:[%s8073_s1 + $0x9c4] ss:$8 sps:$4 sm:$0xff]   ;;  %v6137_v44 = vld [vmem:[%s8074_s0 + $0x438] ss:$88 sps:$4 sm:$0xff]  }
 0x108   :  { %4214 = vmatpush1.bf16.msra.mxu0 %v6040_v45  ;;  %3650 = vmatprep.subr.bf16.mxu1 %v6050_v46  ;;  %v6138_v45 = vld [vmem:[%s8073_s1 + $0x4c0] ss:$8 sps:$4 sm:$0xff]  }
 0x109   :  { %4215 = vmatprep.subr.bf16.mxu0 %v6054_v47  ;;  %v6141_v46 = vld [vmem:[%s8074_s0 + $0x460] ss:$88 sps:$4 sm:$0xff]  }
 0x10a   :  { %3576 = vmatmul.mubr.bf16.gmra.mrb[4].mxu1 %v6047_v48  ;;  %v6142_v47 = vld [vmem:[%s8073_s1 + $0x9c0] ss:$8 sps:$4 sm:$0xff]   ;;  %v6147_v48 = vld [vmem:[%s8073_s1 + $0x4d4] ss:$8 sps:$4 sm:$0xff]  }
 0x10b   :  { %4141 = vmatmul.mubr.bf16.gmra.mrb[4].mxu0 %v6051_v50  ;;  %3651 = vmatpush1.bf16.msra.mxu1 %v6048_v49  ;;  %v6150_v49 = vld [vmem:[%s8073_s1 + $0x9d4] ss:$8 sps:$4 sm:$0xff]   ;;  %v6151_v50 = vld [vmem:[%s8074_s0 + $0x4ec] ss:$88 sps:$4 sm:$0xff]  }
 0x10c   :  { %4216 = vmatpush1.bf16.msra.mxu0 %v6052_v51  ;;  %3652 = vmatprep.subr.bf16.mxu1 %v6057_v52  ;;  %v6153_v51 = vld [vmem:[%s8074_s0 + $0x514] ss:$88 sps:$4 sm:$0xff]   ;;  %v6145_v52 = vld [vmem:[%s8073_s1 + $0x4d0] ss:$8 sps:$4 sm:$0xff]  }
 0x10d   :  { %4217 = vmatprep.subr.bf16.mxu0 %v6060_v53  ;;  %3585 = vmatprep.mubr.bf16.mxu1 %v6061_v54  ;;  %v6148_v53 = vld [vmem:[%s8073_s1 + $0x9d0] ss:$8 sps:$4 sm:$0xff]   ;;  %v6158_v54 = vld [vmem:[%s8073_s1 + $0x4e4] ss:$8 sps:$4 sm:$0xff]  }
 0x10e   :  { %4150 = vmatprep.mubr.bf16.mxu0 %v6063_v55  ;;  %v6162_v55 = vld [vmem:[%s8073_s1 + $0x9e4] ss:$8 sps:$4 sm:$0xff]  }
 0x10f   :  { %3653 = vmatpush1.bf16.msra.mxu1 %v6055_v56  ;;  %v6155_v56 = vld [vmem:[%s8074_s0 + $0x4e8] ss:$88 sps:$4 sm:$0xff]  }
 0x110   :  { %4218 = vmatpush1.bf16.msra.mxu0 %v6058_v57  ;;  %3654 = vmatprep.subr.bf16.mxu1 %v6068_v58  ;;  %v6156_v57 = vld [vmem:[%s8073_s1 + $0x4e0] ss:$8 sps:$4 sm:$0xff]  }
 0x111   :  { %4219 = vmatprep.subr.bf16.mxu0 %v6072_v59  ;;  %v6159_v58 = vld [vmem:[%s8074_s0 + $0x510] ss:$88 sps:$4 sm:$0xff]  }
 0x112   :  { %3586 = vmatmul.mubr.bf16.gmra.mrb[8].mxu1 %v6065_v60  ;;  %v6160_v59 = vld [vmem:[%s8073_s1 + $0x9e0] ss:$8 sps:$4 sm:$0xff]   ;;  %v6165_v60 = vld [vmem:[%s8073_s1 + $0x4f4] ss:$8 sps:$4 sm:$0xff]  }
 0x113   :  { %4151 = vmatmul.mubr.bf16.gmra.mrb[8].mxu0 %v6069_v62  ;;  %3655 = vmatpush1.bf16.msra.mxu1 %v6066_v61  ;;  %v6168_v61 = vld [vmem:[%s8073_s1 + $0x9f4] ss:$8 sps:$4 sm:$0xff]  }
 0x114   :  { %4220 = vmatpush1.bf16.msra.mxu0 %v6070_v63  ;;  %3656 = vmatprep.subr.bf16.mxu1 %v6075_v0  ;;  %v6171_v62 = vld [vmem:[%s8074_s0 + $0x24] ss:$88 sps:$4 sm:$0xff]   ;;  %v6163_v0 = vld [vmem:[%s8073_s1 + $0x4f0] ss:$8 sps:$4 sm:$0xff]  }
 0x115   :  { %4221 = vmatprep.subr.bf16.mxu0 %v6078_v1  ;;  %3595 = vmatprep.mubr.bf16.mxu1 %v6079_v2  ;;  %v6174_v63 = vld [vmem:[%s8074_s0 + $0x4c] ss:$88 sps:$4 sm:$0xff]   ;;  %v6166_v1 = vld [vmem:[%s8073_s1 + $0x9f0] ss:$8 sps:$4 sm:$0xff]  }
 0x116   :  { %4160 = vmatprep.mubr.bf16.mxu0 %v6081_v3  ;;  %v6177_v2 = vld [vmem:[%s8073_s1 + $0xa04] ss:$8 sps:$4 sm:$0xff]   ;;  %v6169_v3 = vld [vmem:[%s8074_s0 + $0x20] ss:$88 sps:$4 sm:$0xff]  }
 0x117   :  { %3657 = vmatpush1.bf16.msra.mxu1 %v6073_v4  ;;  %v6172_v4 = vld [vmem:[%s8074_s0 + $0x48] ss:$88 sps:$4 sm:$0xff]  }
 0x118   :  { %4222 = vmatpush1.bf16.msra.mxu0 %v6076_v5  ;;  %3658 = vmatprep.subr.bf16.mxu1 %v6086_v6  ;;  %v6175_v5 = vld [vmem:[%s8073_s1 + $0xa00] ss:$8 sps:$4 sm:$0xff]   ;;  %v6180_v6 = vld [vmem:[%s8073_s1 + $0xa14] ss:$8 sps:$4 sm:$0xff]  }
 0x119   :  { %4223 = vmatprep.subr.bf16.mxu0 %v6090_v7  ;;  %v6181_v7 = vld [vmem:[%s8074_s0 + $0xd4] ss:$88 sps:$4 sm:$0xff]  }
 0x11a   :  { %3596 = vmatmul.mubr.bf16.gmra.mrb[12].mxu1 %v6083_v8  ;;  %v6183_v8 = vld [vmem:[%s8074_s0 + $0xfc] ss:$88 sps:$4 sm:$0xff]  }
 0x11b   :  { %4161 = vmatmul.mubr.bf16.gmra.mrb[12].mxu0 %v6087_v10  ;;  %3659 = vmatpush1.bf16.msra.mxu1 %v6084_v9  ;;  %v6178_v9 = vld [vmem:[%s8073_s1 + $0xa10] ss:$8 sps:$4 sm:$0xff]   ;;  %v6189_v10 = vld [vmem:[%s8073_s1 + $0xa24] ss:$8 sps:$4 sm:$0xff]  }
 0x11c   :  { %4224 = vmatpush1.bf16.msra.mxu0 %v6088_v11  ;;  %3660 = vmatprep.subr.bf16.mxu1 %v6093_v12  ;;  %v6185_v11 = vld [vmem:[%s8074_s0 + $0xd0] ss:$88 sps:$4 sm:$0xff]  }
 0x11d   :  { %4225 = vmatprep.subr.bf16.mxu0 %v6096_v13  ;;  %3605 = vmatprep.mubr.bf16.mxu1 %v6097_v14  ;;  %v6186_v12 = vld [vmem:[%s8074_s0 + $0xf8] ss:$88 sps:$4 sm:$0xff]   ;;  %v6187_v13 = vld [vmem:[%s8073_s1 + $0xa20] ss:$8 sps:$4 sm:$0xff]   ;;  %v6192_v14 = vld [vmem:[%s8073_s1 + $0xa34] ss:$8 sps:$4 sm:$0xff]  }
 0x11e   :  { %4170 = vmatprep.mubr.bf16.mxu0 %v6099_v15  ;;  %v6193_v15 = vld [vmem:[%s8074_s0 + $0x184] ss:$88 sps:$4 sm:$0xff]  }
 0x11f   :  { %3661 = vmatpush1.bf16.msra.mxu1 %v6091_v16  ;;  %v6195_v16 = vld [vmem:[%s8074_s0 + $0x1ac] ss:$88 sps:$4 sm:$0xff]  }
 0x120   :  { %4226 = vmatpush1.bf16.msra.mxu0 %v6094_v17  ;;  %3662 = vmatprep.subr.bf16.mxu1 %v6104_v18  ;;  %v6190_v17 = vld [vmem:[%s8073_s1 + $0xa30] ss:$8 sps:$4 sm:$0xff]   ;;  %v6201_v18 = vld [vmem:[%s8073_s1 + $0xa44] ss:$8 sps:$4 sm:$0xff]  }
 0x121   :  { %4227 = vmatprep.subr.bf16.mxu0 %v6108_v19  ;;  %v6197_v19 = vld [vmem:[%s8074_s0 + $0x180] ss:$88 sps:$4 sm:$0xff]  }
 0x122   :  { %3606 = vmatmul.mubr.bf16.gmra.mrb[16].mxu1 %v6101_v20  ;;  %v6198_v20 = vld [vmem:[%s8074_s0 + $0x1a8] ss:$88 sps:$4 sm:$0xff]  }
 0x123   :  { %4171 = vmatmul.mubr.bf16.gmra.mrb[16].mxu0 %v6105_v22  ;;  %3663 = vmatpush1.bf16.msra.mxu1 %v6102_v21  ;;  %v6199_v21 = vld [vmem:[%s8073_s1 + $0xa40] ss:$8 sps:$4 sm:$0xff]   ;;  %v6204_v22 = vld [vmem:[%s8073_s1 + $0xa54] ss:$8 sps:$4 sm:$0xff]  }
 0x124   :  { %4228 = vmatpush1.bf16.msra.mxu0 %v6106_v23  ;;  %3664 = vmatprep.subr.bf16.mxu1 %v6111_v24  ;;  %v6205_v23 = vld [vmem:[%s8074_s0 + $0x234] ss:$88 sps:$4 sm:$0xff]  }
 0x125   :  { %4229 = vmatprep.subr.bf16.mxu0 %v6114_v25  ;;  %3615 = vmatprep.mubr.bf16.mxu1 %v6115_v26  ;;  %v6207_v24 = vld [vmem:[%s8074_s0 + $0x25c] ss:$88 sps:$4 sm:$0xff]   ;;  %v6202_v25 = vld [vmem:[%s8073_s1 + $0xa50] ss:$8 sps:$4 sm:$0xff]   ;;  %v6213_v26 = vld [vmem:[%s8073_s1 + $0xa64] ss:$8 sps:$4 sm:$0xff]  }
 0x126   :  { %4180 = vmatprep.mubr.bf16.mxu0 %v6117_v27  ;;  %v6209_v27 = vld [vmem:[%s8074_s0 + $0x230] ss:$88 sps:$4 sm:$0xff]  }
 0x127   :  { %3665 = vmatpush1.bf16.msra.mxu1 %v6109_v28  ;;  %v6210_v28 = vld [vmem:[%s8074_s0 + $0x258] ss:$88 sps:$4 sm:$0xff]  }
 0x128   :  { %4230 = vmatpush1.bf16.msra.mxu0 %v6112_v29  ;;  %3666 = vmatprep.subr.bf16.mxu1 %v6122_v30  ;;  %v6211_v29 = vld [vmem:[%s8073_s1 + $0xa60] ss:$8 sps:$4 sm:$0xff]   ;;  %v6216_v30 = vld [vmem:[%s8073_s1 + $0xa74] ss:$8 sps:$4 sm:$0xff]  }
 0x129   :  { %4231 = vmatprep.subr.bf16.mxu0 %v6126_v31  ;;  %v6217_v31 = vld [vmem:[%s8074_s0 + $0x2e4] ss:$88 sps:$4 sm:$0xff]  }
 0x12a   :  { %3616 = vmatmul.mubr.bf16.gmra.mrb[20].mxu1 %v6119_v32  ;;  %v6219_v32 = vld [vmem:[%s8074_s0 + $0x30c] ss:$88 sps:$4 sm:$0xff]  }
 0x12b   :  { %4181 = vmatmul.mubr.bf16.gmra.mrb[20].mxu0 %v6123_v34  ;;  %3667 = vmatpush1.bf16.msra.mxu1 %v6120_v33  ;;  %v6214_v33 = vld [vmem:[%s8073_s1 + $0xa70] ss:$8 sps:$4 sm:$0xff]   ;;  %v6225_v34 = vld [vmem:[%s8073_s1 + $0xa84] ss:$8 sps:$4 sm:$0xff]  }
 0x12c   :  { %4232 = vmatpush1.bf16.msra.mxu0 %v6124_v35  ;;  %3668 = vmatprep.subr.bf16.mxu1 %v6129_v36  ;;  %v6221_v35 = vld [vmem:[%s8074_s0 + $0x2e0] ss:$88 sps:$4 sm:$0xff]  }
 0x12d   :  { %4233 = vmatprep.subr.bf16.mxu0 %v6132_v37  ;;  %3625 = vmatprep.mubr.bf16.mxu1 %v6133_v38  ;;  %v6222_v36 = vld [vmem:[%s8074_s0 + $0x308] ss:$88 sps:$4 sm:$0xff]   ;;  %v6228_v38 = vld [vmem:[%s8073_s1 + $0xa94] ss:$8 sps:$4 sm:$0xff]  }
 0x12e   :  { %4190 = vmatprep.mubr.bf16.mxu0 %v6135_v39  ;;  %v6223_v37 = vld [vmem:[%s8073_s1 + $0xa80] ss:$8 sps:$4 sm:$0xff]   ;;  %v6229_v39 = vld [vmem:[%s8074_s0 + $0x394] ss:$88 sps:$4 sm:$0xff]  }
 0x12f   :  { %3669 = vmatpush1.bf16.msra.mxu1 %v6127_v40  ;;  %v6231_v40 = vld [vmem:[%s8074_s0 + $0x3bc] ss:$88 sps:$4 sm:$0xff]  }
 0x130   :  { %4234 = vmatpush1.bf16.msra.mxu0 %v6130_v41  ;;  %3670 = vmatprep.subr.bf16.mxu1 %v6140_v42  ;;  %v6226_v41 = vld [vmem:[%s8073_s1 + $0xa90] ss:$8 sps:$4 sm:$0xff]   ;;  %v6237_v42 = vld [vmem:[%s8073_s1 + $0xaa4] ss:$8 sps:$4 sm:$0xff]  }
 0x131   :  { %4235 = vmatprep.subr.bf16.mxu0 %v6144_v43  ;;  %v6233_v43 = vld [vmem:[%s8074_s0 + $0x390] ss:$88 sps:$4 sm:$0xff]  }
 0x132   :  { %3626 = vmatmul.mubr.bf16.gmra.mrb[24].mxu1 %v6137_v44  ;;  %v6234_v44 = vld [vmem:[%s8074_s0 + $0x3b8] ss:$88 sps:$4 sm:$0xff]  }
 0x133   :  { %4191 = vmatmul.mubr.bf16.gmra.mrb[24].mxu0 %v6141_v46  ;;  %3671 = vmatpush1.bf16.msra.mxu1 %v6138_v45  ;;  %v6235_v45 = vld [vmem:[%s8073_s1 + $0xaa0] ss:$8 sps:$4 sm:$0xff]   ;;  %v6240_v46 = vld [vmem:[%s8073_s1 + $0xab4] ss:$8 sps:$4 sm:$0xff]  }
 0x134   :  { %4236 = vmatpush1.bf16.msra.mxu0 %v6142_v47  ;;  %3672 = vmatprep.subr.bf16.mxu1 %v6147_v48  ;;  %v6241_v47 = vld [vmem:[%s8074_s0 + $0x444] ss:$88 sps:$4 sm:$0xff]  }
 0x135   :  { %4237 = vmatprep.subr.bf16.mxu0 %v6150_v49  ;;  %3635 = vmatprep.mubr.bf16.mxu1 %v6151_v50  ;;  %v6243_v48 = vld [vmem:[%s8074_s0 + $0x46c] ss:$88 sps:$4 sm:$0xff]   ;;  %v6238_v49 = vld [vmem:[%s8073_s1 + $0xab0] ss:$8 sps:$4 sm:$0xff]  }
 0x136   :  { %4200 = vmatprep.mubr.bf16.mxu0 %v6153_v51  ;;  %v6249_v50 = vld [vmem:[%s8073_s1 + $0xac4] ss:$8 sps:$4 sm:$0xff]   ;;  %v6245_v51 = vld [vmem:[%s8074_s0 + $0x440] ss:$88 sps:$4 sm:$0xff]  }
 0x137   :  { %3673 = vmatpush1.bf16.msra.mxu1 %v6145_v52  ;;  %v6246_v52 = vld [vmem:[%s8074_s0 + $0x468] ss:$88 sps:$4 sm:$0xff]  }
 0x138   :  { %4238 = vmatpush1.bf16.msra.mxu0 %v6148_v53  ;;  %3674 = vmatprep.subr.bf16.mxu1 %v6158_v54  ;;  %v6247_v53 = vld [vmem:[%s8073_s1 + $0xac0] ss:$8 sps:$4 sm:$0xff]   ;;  %v6252_v54 = vld [vmem:[%s8073_s1 + $0xad4] ss:$8 sps:$4 sm:$0xff]  }
 0x139   :  { %4239 = vmatprep.subr.bf16.mxu0 %v6162_v55  ;;  %v6253_v55 = vld [vmem:[%s8074_s0 + $0x4f4] ss:$88 sps:$4 sm:$0xff]  }
 0x13a   :  { %3636 = vmatmul.mubr.bf16.gmra.mrb[28].mxu1 %v6155_v56  ;;  %v6255_v56 = vld [vmem:[%s8074_s0 + $0x51c] ss:$88 sps:$4 sm:$0xff]  }
 0x13b   :  { %4201 = vmatmul.mubr.bf16.gmra.mrb[28].mxu0 %v6159_v58  ;;  %3675 = vmatpush1.bf16.msra.mxu1 %v6156_v57  ;;  %v6250_v57 = vld [vmem:[%s8073_s1 + $0xad0] ss:$8 sps:$4 sm:$0xff]   ;;  %v6261_v58 = vld [vmem:[%s8073_s1 + $0xae4] ss:$8 sps:$4 sm:$0xff]  }
 0x13c   :  { %4240 = vmatpush1.bf16.msra.mxu0 %v6160_v59  ;;  %3676 = vmatprep.subr.bf16.mxu1 %v6165_v60  ;;  %v6257_v59 = vld [vmem:[%s8074_s0 + $0x4f0] ss:$88 sps:$4 sm:$0xff]  }
 0x13d   :  { %4241 = vmatprep.subr.bf16.mxu0 %v6168_v61  ;;  %3678 = vmatprep.mubr.bf16.mxu1 %v6171_v62  ;;  %v6258_v60 = vld [vmem:[%s8074_s0 + $0x518] ss:$88 sps:$4 sm:$0xff]   ;;  %v6259_v61 = vld [vmem:[%s8073_s1 + $0xae0] ss:$8 sps:$4 sm:$0xff]   ;;  %v6264_v62 = vld [vmem:[%s8073_s1 + $0xaf4] ss:$8 sps:$4 sm:$0xff]  }
 0x13e   :  { %4243 = vmatprep.mubr.bf16.mxu0 %v6174_v63  ;;  %v6267_v63 = vld [vmem:[%s8074_s0 + $0x54] ss:$88 sps:$4 sm:$0xff]  }
 0x13f   :  { %3677 = vmatpush1.bf16.msra.mxu1 %v6163_v0  ;;  %v6270_v0 = vld [vmem:[%s8074_s0 + $0x314] ss:$88 sps:$4 sm:$0xff]  }
 0x140   :  { %4242 = vmatpush1.bf16.msra.mxu0 %v6166_v1  ;;  %5113 = vmatprep.subr.bf16.mxu1 %v6177_v2  ;;  %v6262_v1 = vld [vmem:[%s8073_s1 + $0xaf0] ss:$8 sps:$4 sm:$0xff]  }
 0x141   :  { %4324 = vmatprep.subr.bf16.mxu0 %v6177_v2  ;;  %v6265_v2 = vld [vmem:[%s8074_s0 + $0x50] ss:$88 sps:$4 sm:$0xff]  }
 0x142   :  { %3679 = vmatmul.mubr.bf16.vlgmr.msra.gmra.mrb[0].mxu1 %v6169_v3  ;;  %v6268_v3 = vld [vmem:[%s8074_s0 + $0x310] ss:$88 sps:$4 sm:$0xff]  }
 0x143   :  { %4244 = vmatmul.mubr.bf16.vlgmr.msra.gmra.mrb[0].mxu0 %v6172_v4  ;;  %5129 = vmatpush1.bf16.msra.mxu1 %v6175_v5  ;;  %v6271_v4 = vld [vmem:[%s8074_s0 + $0x104] ss:$88 sps:$4 sm:$0xff]  }
 0x144   :  { %4325 = vmatpush1.bf16.msra.mxu0 %v6175_v5  ;;  %5114 = vmatprep.subr.bf16.mxu1 %v6180_v6  ;;  %v6273_v5 = vld [vmem:[%s8074_s0 + $0x3c4] ss:$88 sps:$4 sm:$0xff]  }
 0x145   :  { %4326 = vmatprep.subr.bf16.mxu0 %v6180_v6  ;;  %3688 = vmatprep.mubr.bf16.mxu1 %v6181_v7  ;;  %v6275_v6 = vld [vmem:[%s8074_s0 + $0x100] ss:$88 sps:$4 sm:$0xff]  }
 0x146   :  { %4253 = vmatprep.mubr.bf16.mxu0 %v6183_v8  ;;  %v6276_v7 = vld [vmem:[%s8074_s0 + $0x3c0] ss:$88 sps:$4 sm:$0xff]   ;;  %v6277_v8 = vld [vmem:[%s8074_s0 + $0x1b4] ss:$88 sps:$4 sm:$0xff]  }
 0x147   :  { %5130 = vmatpush1.bf16.msra.mxu1 %v6178_v9 }
 0x148   :  { %4327 = vmatpush1.bf16.msra.mxu0 %v6178_v9  ;;  %5115 = vmatprep.subr.bf16.mxu1 %v6189_v10  ;;  %v6279_v9 = vld [vmem:[%s8074_s0 + $0x474] ss:$88 sps:$4 sm:$0xff]  }
 0x149   :  { %4328 = vmatprep.subr.bf16.mxu0 %v6189_v10  ;;  %v6281_v10 = vld [vmem:[%s8074_s0 + $0x1b0] ss:$88 sps:$4 sm:$0xff]  }
 0x14a   :  { %3689 = vmatmul.mubr.bf16.gmra.mrb[4].mxu1 %v6185_v11  ;;  %v6282_v11 = vld [vmem:[%s8074_s0 + $0x470] ss:$88 sps:$4 sm:$0xff]  }
 0x14b   :  { %4254 = vmatmul.mubr.bf16.gmra.mrb[4].mxu0 %v6186_v12  ;;  %5131 = vmatpush1.bf16.msra.mxu1 %v6187_v13  ;;  %v6283_v12 = vld [vmem:[%s8074_s0 + $0x264] ss:$88 sps:$4 sm:$0xff]  }
 0x14c   :  { %4329 = vmatpush1.bf16.msra.mxu0 %v6187_v13  ;;  %5116 = vmatprep.subr.bf16.mxu1 %v6192_v14  ;;  %v6285_v13 = vld [vmem:[%s8074_s0 + $0x524] ss:$88 sps:$4 sm:$0xff]  }
 0x14d   :  { %4330 = vmatprep.subr.bf16.mxu0 %v6192_v14  ;;  %3698 = vmatprep.mubr.bf16.mxu1 %v6193_v15  ;;  %v6287_v14 = vld [vmem:[%s8074_s0 + $0x260] ss:$88 sps:$4 sm:$0xff]  }
 0x14e   :  { %4263 = vmatprep.mubr.bf16.mxu0 %v6195_v16  ;;  %v6288_v15 = vld [vmem:[%s8074_s0 + $0x520] ss:$88 sps:$4 sm:$0xff]  }
 0x14f   :  { %5132 = vmatpush1.bf16.msra.mxu1 %v6190_v17 }
 0x150   :  { %4331 = vmatpush1.bf16.msra.mxu0 %v6190_v17  ;;  %5117 = vmatprep.subr.bf16.mxu1 %v6201_v18 }
 0x151   :  { %4332 = vmatprep.subr.bf16.mxu0 %v6201_v18 }
 0x152   :  { %3699 = vmatmul.mubr.bf16.gmra.mrb[8].mxu1 %v6197_v19 }
 0x153   :  { %4264 = vmatmul.mubr.bf16.gmra.mrb[8].mxu0 %v6198_v20  ;;  %5133 = vmatpush1.bf16.msra.mxu1 %v6199_v21 }
 0x154   :  { %4333 = vmatpush1.bf16.msra.mxu0 %v6199_v21  ;;  %5118 = vmatprep.subr.bf16.mxu1 %v6204_v22 }
 0x155   :  { %4334 = vmatprep.subr.bf16.mxu0 %v6204_v22  ;;  %3708 = vmatprep.mubr.bf16.mxu1 %v6205_v23 }
 0x156   :  { %4273 = vmatprep.mubr.bf16.mxu0 %v6207_v24 }
 0x157   :  { %5134 = vmatpush1.bf16.msra.mxu1 %v6202_v25 }
 0x158   :  { %4335 = vmatpush1.bf16.msra.mxu0 %v6202_v25  ;;  %5119 = vmatprep.subr.bf16.mxu1 %v6213_v26 }
 0x159   :  { %4336 = vmatprep.subr.bf16.mxu0 %v6213_v26 }
 0x15a   :  { %3709 = vmatmul.mubr.bf16.gmra.mrb[12].mxu1 %v6209_v27  ;;  %v544_v27 = vlaneseq }
 0x15b   :  { %4274 = vmatmul.mubr.bf16.gmra.mrb[12].mxu0 %v6210_v28  ;;  %5135 = vmatpush1.bf16.msra.mxu1 %v6211_v29 }
 0x15c   :  { %4337 = vmatpush1.bf16.msra.mxu0 %v6211_v29  ;;  %5120 = vmatprep.subr.bf16.mxu1 %v6216_v30  ;;  %v545_v29 = vshrl.u32 %v544_v27, 7 }
 0x15d   :  { %4338 = vmatprep.subr.bf16.mxu0 %v6216_v30  ;;  %3718 = vmatprep.mubr.bf16.mxu1 %v6217_v31 }
 0x15e   :  { %4283 = vmatprep.mubr.bf16.mxu0 %v6219_v32 }
 0x15f   :  { %5136 = vmatpush1.bf16.msra.mxu1 %v6214_v33 }
 0x160   :  { %4339 = vmatpush1.bf16.msra.mxu0 %v6214_v33  ;;  %5121 = vmatprep.subr.bf16.mxu1 %v6225_v34  ;;  %v546_v33 = vsub.s32 0, %v545_v29 }
 0x161   :  { %4340 = vmatprep.subr.bf16.mxu0 %v6225_v34 }
 0x162   :  { %3719 = vmatmul.mubr.bf16.gmra.mrb[16].mxu1 %v6221_v35  ;;  %v542_v35 = vld [vmem:[%s8075_s2] sm:$0x3] }
 0x163   :  { %4284 = vmatmul.mubr.bf16.gmra.mrb[16].mxu0 %v6222_v36  ;;  %5137 = vmatpush1.bf16.msra.mxu1 %v6223_v37  ;;  %v550_v36 = vsub.s32 1, %v545_v29 }
 0x164   :  { %4341 = vmatpush1.bf16.msra.mxu0 %v6223_v37  ;;  %5122 = vmatprep.subr.bf16.mxu1 %v6228_v38  ;;  %v7928_v37 = vrot.slane %v542_v35, %v546_v33 }
 0x165   :  { %4342 = vmatprep.subr.bf16.mxu0 %v6228_v38  ;;  %3728 = vmatprep.mubr.bf16.mxu1 %v6229_v39  ;;  %v7930_v38 = vrot.slane %v542_v35, %v550_v36 }
 0x166   :  { %4293 = vmatprep.mubr.bf16.mxu0 %v6231_v40 }
 0x167   :  { %5138 = vmatpush1.bf16.msra.mxu1 %v6226_v41 }
 0x168   :  { %4343 = vmatpush1.bf16.msra.mxu0 %v6226_v41  ;;  %5123 = vmatprep.subr.bf16.mxu1 %v6237_v42 }
 0x169   :  { %4344 = vmatprep.subr.bf16.mxu0 %v6237_v42 }
 0x16a   :  { %3729 = vmatmul.mubr.bf16.gmra.mrb[20].mxu1 %v6233_v43 }
 0x16b   :  { %4294 = vmatmul.mubr.bf16.gmra.mrb[20].mxu0 %v6234_v44  ;;  %5139 = vmatpush1.bf16.msra.mxu1 %v6235_v45 }
 0x16c   :  { %4345 = vmatpush1.bf16.msra.mxu0 %v6235_v45  ;;  %5124 = vmatprep.subr.bf16.mxu1 %v6240_v46 }
 0x16d   :  { %4346 = vmatprep.subr.bf16.mxu0 %v6240_v46  ;;  %3738 = vmatprep.mubr.bf16.mxu1 %v6241_v47 }
 0x16e   :  { %4303 = vmatprep.mubr.bf16.mxu0 %v6243_v48 }
 0x16f   :  { %5140 = vmatpush1.bf16.msra.mxu1 %v6238_v49 }
 0x170   :  { %4347 = vmatpush1.bf16.msra.mxu0 %v6238_v49  ;;  %5125 = vmatprep.subr.bf16.mxu1 %v6249_v50 }
 0x171   :  { %4348 = vmatprep.subr.bf16.mxu0 %v6249_v50 }
 0x172   :  { %3739 = vmatmul.mubr.bf16.gmra.mrb[24].mxu1 %v6245_v51 }
 0x173   :  { %4304 = vmatmul.mubr.bf16.gmra.mrb[24].mxu0 %v6246_v52  ;;  %5141 = vmatpush1.bf16.msra.mxu1 %v6247_v53 }
 0x174   :  { %4349 = vmatpush1.bf16.msra.mxu0 %v6247_v53  ;;  %5126 = vmatprep.subr.bf16.mxu1 %v6252_v54 }
 0x175   :  { %4350 = vmatprep.subr.bf16.mxu0 %v6252_v54  ;;  %3748 = vmatprep.mubr.bf16.mxu1 %v6253_v55 }
 0x176   :  { %4313 = vmatprep.mubr.bf16.mxu0 %v6255_v56 }
 0x177   :  { %5142 = vmatpush1.bf16.msra.mxu1 %v6250_v57 }
 0x178   :  { %4351 = vmatpush1.bf16.msra.mxu0 %v6250_v57  ;;  %5127 = vmatprep.subr.bf16.mxu1 %v6261_v58 }
 0x179   :  { %4352 = vmatprep.subr.bf16.mxu0 %v6261_v58 }
 0x17a   :  { %3749 = vmatmul.mubr.bf16.gmra.mrb[28].mxu1 %v6257_v59 }
 0x17b   :  { %4314 = vmatmul.mubr.bf16.gmra.mrb[28].mxu0 %v6258_v60  ;;  %5143 = vmatpush1.bf16.msra.mxu1 %v6259_v61 }
 0x17c   :  { %4353 = vmatpush1.bf16.msra.mxu0 %v6259_v61  ;;  %5128 = vmatprep.subr.bf16.mxu1 %v6264_v62 }
 0x17d   :  { %4354 = vmatprep.subr.bf16.mxu0 %v6264_v62  ;;  %4356 = vmatprep.mubr.bf16.mxu0 %v6267_v63 }
 0x17e   :  { %4396 = vmatprep.mubr.bf16.mxu1 %v6270_v0 }
 0x17f   :  { %5144 = vmatpush1.bf16.msra.mxu1 %v6262_v1 }
 0x180   :  { %4355 = vmatpush1.bf16.msra.mxu0 %v6262_v1 }
 0x182   :  { %4397 = vmatmul.mubr.bf16.vlgmr.msra.gmra.mrb[32].mxu1 %v6268_v3 }
 0x183   :  { %4357 = vmatmul.mubr.bf16.vlgmr.msra.gmra.mrb[0].mxu0 %v6265_v2  ;;  %4406 = vmatprep.mubr.bf16.mxu1 %v6273_v5 }
 0x184   :  { %4366 = vmatprep.mubr.bf16.mxu0 %v6271_v4 }
 0x18a   :  { %4407 = vmatmul.mubr.bf16.gmra.mrb[36].mxu1 %v6276_v7 }
 0x18b   :  { %4367 = vmatmul.mubr.bf16.gmra.mrb[4].mxu0 %v6275_v6  ;;  %4416 = vmatprep.mubr.bf16.mxu1 %v6279_v9 }
 0x18c   :  { %4376 = vmatprep.mubr.bf16.mxu0 %v6277_v8 }
 0x192   :  { %4417 = vmatmul.mubr.bf16.gmra.mrb[40].mxu1 %v6282_v11 }
 0x193   :  { %4377 = vmatmul.mubr.bf16.gmra.mrb[8].mxu0 %v6281_v10  ;;  %4426 = vmatprep.mubr.bf16.mxu1 %v6285_v13 }
 0x194   :  { %4386 = vmatprep.mubr.bf16.mxu0 %v6283_v12 }
 0x19a   :  { %4427 = vmatmul.mubr.bf16.gmra.mrb[44].mxu1 %v6288_v15 }
 0x19b   :  { %4387 = vmatmul.mubr.bf16.gmra.mrb[12].mxu0 %v6287_v14 }
 0x215   :  { %v7893_v16 = vpop.f32.mrb[0].mxu1 }
 0x216   :  { %v7895_v17 = vpop.f32.mrb[1].mxu1 }
 0x217   :  { %v7897_v18 = vpop.f32.mrb[2].mxu1 }
 0x218   :  { %v7899_v19 = vpop.f32.mrb[3].mxu1 }
 0x21d   :  { %v7901_v20 = vpop.f32.mrb[4].mxu1 }
 0x21e   :  { %v7903_v21 = vpop.f32.mrb[5].mxu1 }
 0x21f   :  { %v7905_v22 = vpop.f32.mrb[6].mxu1 }
 0x220   :  { %v7907_v23 = vpop.f32.mrb[7].mxu1 }
 0x225   :  { %v7909_v24 = vpop.f32.mrb[8].mxu1 }
 0x226   :  { %v7911_v25 = vpop.f32.mrb[9].mxu1 }
 0x227   :  { %v7913_v26 = vpop.f32.mrb[10].mxu1 }
 0x228   :  { %v7915_v28 = vpop.f32.mrb[11].mxu1 }
 0x22d   :  { %v7917_v30 = vpop.f32.mrb[12].mxu1 }
 0x22e   :  { %v7919_v31 = vpop.f32.mrb[13].mxu1 }
 0x22f   :  { %v7921_v32 = vpop.f32.mrb[14].mxu1 }
 0x230   :  { %v7923_v34 = vpop.f32.mrb[15].mxu1 }
 0x235   :  { %v3720_v39 = vpop.f32.mrb[16].mxu1 }
 0x236   :  { %v4285_v40 = vpop.f32.mrb[16].mxu0  ;;  %v5177_v41 = vadd.f32 %v3720_v39, %v7928_v37  ;;  %v3722_v42 = vpop.f32.mrb[17].mxu1 }
 0x237   :  { %v4287_v43 = vpop.f32.mrb[17].mxu0  ;;  %v5180_v44 = vadd.f32 %v3722_v42, %v7930_v38  ;;  %v3724_v45 = vpop.f32.mrb[18].mxu1 }
 0x238   :  { %v4289_v46 = vpop.f32.mrb[18].mxu0  ;;  %v5178_v47 = vadd.f32 %v5177_v41, %v4285_v40  ;;  %v5183_v48 = vadd.f32 %v3724_v45, %v7928_v37  ;;  %v3726_v49 = vpop.f32.mrb[19].mxu1 }
 0x239   :  { %v4291_v50 = vpop.f32.mrb[19].mxu0  ;;  %v7935_v51 = vadd.f32 %v5180_v44, %v4287_v43  ;;  %v5186_v52 = vadd.f32 %v3726_v49, %v7930_v38 }
 0x23a   :  { %v7938_v53 = vadd.f32 %v5183_v48, %v4289_v46 }
 0x23b   :  { %v7940_v54 = vadd.f32 %v5186_v52, %v4291_v50 }
 0x23d   :  { %v3730_v55 = vpop.f32.mrb[20].mxu1 }
 0x23e   :  { %v4295_v56 = vpop.f32.mrb[20].mxu0  ;;  %v5189_v57 = vadd.f32 %v3730_v55, %v7928_v37  ;;  %v3732_v58 = vpop.f32.mrb[21].mxu1 }
 0x23f   :  { %v4297_v59 = vpop.f32.mrb[21].mxu0  ;;  %v5192_v60 = vadd.f32 %v3732_v58, %v7930_v38  ;;  %v3734_v61 = vpop.f32.mrb[22].mxu1 }
 0x240   :  { %v4299_v62 = vpop.f32.mrb[22].mxu0  ;;  %v7944_v63 = vadd.f32 %v5189_v57, %v4295_v56  ;;  %v5195_v0 = vadd.f32 %v3734_v61, %v7928_v37  ;;  %v3736_v1 = vpop.f32.mrb[23].mxu1  ;;  %v5145_v61 = vadd.f32 %v7893_v16, %v7928_v37 }
 0x241   :  { %v4301_v2 = vpop.f32.mrb[23].mxu0  ;;  %v7947_v3 = vadd.f32 %v5192_v60, %v4297_v59  ;;  %v5198_v4 = vadd.f32 %v3736_v1, %v7930_v38 }
 0x242   :  { %v7950_v5 = vadd.f32 %v5195_v0, %v4299_v62  ;;  %v5147_v62 = vadd.f32 %v7895_v17, %v7930_v38 }
 0x243   :  { %v7952_v6 = vadd.f32 %v5198_v4, %v4301_v2  ;;  %v5149_v2 = vadd.f32 %v7897_v18, %v7928_v37 }
 0x245   :  { %v3740_v7 = vpop.f32.mrb[24].mxu1 }
 0x246   :  { %v4305_v8 = vpop.f32.mrb[24].mxu0  ;;  %v5201_v9 = vadd.f32 %v3740_v7, %v7928_v37  ;;  %v3742_v10 = vpop.f32.mrb[25].mxu1 }
 0x247   :  { %v4307_v11 = vpop.f32.mrb[25].mxu0  ;;  %v5204_v12 = vadd.f32 %v3742_v10, %v7930_v38  ;;  %v3744_v13 = vpop.f32.mrb[26].mxu1  ;;  %v5151_v10 = vadd.f32 %v7899_v19, %v7930_v38 }
 0x248   :  { %v4309_v14 = vpop.f32.mrb[26].mxu0  ;;  %v7956_v15 = vadd.f32 %v5201_v9, %v4305_v8  ;;  %v5207_v27 = vadd.f32 %v3744_v13, %v7928_v37  ;;  %v3746_v29 = vpop.f32.mrb[27].mxu1 }
 0x249   :  { %v4311_v33 = vpop.f32.mrb[27].mxu0  ;;  %v7959_v35 = vadd.f32 %v5204_v12, %v4307_v11  ;;  %v5210_v36 = vadd.f32 %v3746_v29, %v7930_v38 }
 0x24a   :  { %v7962_v39 = vadd.f32 %v5207_v27, %v4309_v14 }
 0x24b   :  { %v7964_v40 = vadd.f32 %v5210_v36, %v4311_v33 }
 0x24d   :  { %v3750_v41 = vpop.f32.mrb[28].mxu1 }
 0x24e   :  { %v4315_v42 = vpop.f32.mrb[28].mxu0  ;;  %v5213_v43 = vadd.f32 %v3750_v41, %v7928_v37  ;;  %v3752_v44 = vpop.f32.mrb[29].mxu1  ;;  %v5155_v41 = vadd.f32 %v7903_v21, %v7930_v38  ;;  %v5159_v21 = vadd.f32 %v7907_v23, %v7930_v38 }
 0x24f   :  { %v4317_v45 = vpop.f32.mrb[29].mxu0  ;;  %v5216_v46 = vadd.f32 %v3752_v44, %v7930_v38  ;;  %v3754_v48 = vpop.f32.mrb[30].mxu1 }
 0x250   :  { %v4319_v49 = vpop.f32.mrb[30].mxu0  ;;  %v7968_v50 = vadd.f32 %v5213_v43, %v4315_v42  ;;  %v5219_v52 = vadd.f32 %v3754_v48, %v7928_v37  ;;  %v3756_v55 = vpop.f32.mrb[31].mxu1  ;;  %v5157_v43 = vadd.f32 %v7905_v22, %v7928_v37 }
 0x251   :  { %v4321_v56 = vpop.f32.mrb[31].mxu0  ;;  %v7971_v57 = vadd.f32 %v5216_v46, %v4317_v45  ;;  %v5222_v58 = vadd.f32 %v3756_v55, %v7930_v38 }
 0x252   :  { %v7974_v59 = vadd.f32 %v5219_v52, %v4319_v49 }
 0x253   :  { %v7976_v60 = vadd.f32 %v5222_v58, %v4321_v56 }
 0x255   :  { %v4398_v1 = vpop.f32.mrb[32].mxu1 }
 0x256   :  { %v4358_v0 = vpop.f32.mrb[0].mxu0  ;;  %v5179_v7 = vadd.f32 %v5178_v47, %v4398_v1  ;;  %v4400_v9 = vpop.f32.mrb[33].mxu1 }
 0x257   :  { %v5146_v4 = vadd.f32 %v5145_v61, %v4358_v0  ;;  %v4360_v8 = vpop.f32.mrb[1].mxu0  ;;  %v5182_v12 = vadd.f32 %v7935_v51, %v4400_v9  ;;  %v4402_v16 = vpop.f32.mrb[34].mxu1 }
 0x258   :  { %v5148_v11 = vadd.f32 %v5147_v62, %v4360_v8  ;;  %v4362_v13 = vpop.f32.mrb[2].mxu0  ;;  %v5185_v17 = vadd.f32 %v7938_v53, %v4402_v16  ;;  %v4404_v29 = vpop.f32.mrb[35].mxu1  ;;  %v5153_v53 = vadd.f32 %v7901_v20, %v7928_v37 }
 0x259   :  { %v5150_v14 = vadd.f32 %v5149_v2, %v4362_v13  ;;  %v4364_v27 = vpop.f32.mrb[3].mxu0  ;;  %v5105_v36 = vpack.c.bf16 %v5182_v12, %v5179_v7  ;;  %v5188_v47 = vadd.f32 %v7940_v54, %v4404_v29  ;;  %v5163_v2 = vadd.f32 %v7911_v25, %v7930_v38 }
 0x25a   :  { %v5097_v33 = vpack.c.bf16 %v5148_v11, %v5146_v4  ;;  %v5152_v18 = vadd.f32 %v5151_v10, %v4364_v27  ;;  %v5165_v7 = vadd.f32 %v7913_v26, %v7928_v37  ;;  %v5167_v25 = vadd.f32 %v7915_v28, %v7930_v38 }
 0x25b   :  { %4541 = vst [vmem:[%s8076_s3 + $0x40] sm:$0xff] %v5105_v36  ;;  %v5106_v51 = vpack.c.bf16 %v5188_v47, %v5185_v17 }
 0x25c   :  { %4533 = vst [vmem:[%s8076_s3] sm:$0xff] %v5097_v33  ;;  %v5098_v19 = vpack.c.bf16 %v5152_v18, %v5150_v14  ;;  %v5171_v18 = vadd.f32 %v7919_v31, %v7930_v38  ;;  %v5175_v31 = vadd.f32 %v7923_v34, %v7930_v38 }
 0x25d   :  { %4542 = vst [vmem:[%s8076_s3 + $0x48] sm:$0xff] %v5106_v51  ;;  %v4408_v42 = vpop.f32.mrb[36].mxu1 }
 0x25e   :  { %4534 = vst [vmem:[%s8076_s3 + $0x8] sm:$0xff] %v5098_v19  ;;  %v4368_v54 = vpop.f32.mrb[4].mxu0  ;;  %v5191_v45 = vadd.f32 %v7944_v63, %v4408_v42  ;;  %v4410_v46 = vpop.f32.mrb[37].mxu1  ;;  %v5173_v19 = vadd.f32 %v7921_v32, %v7928_v37 }
 0x25f   :  { %v5154_v44 = vadd.f32 %v5153_v53, %v4368_v54  ;;  %v4370_v20 = vpop.f32.mrb[5].mxu0  ;;  %v5194_v49 = vadd.f32 %v7947_v3, %v4410_v46  ;;  %v4412_v55 = vpop.f32.mrb[38].mxu1 }
 0x260   :  { %v5156_v48 = vadd.f32 %v5155_v41, %v4370_v20  ;;  %v4372_v52 = vpop.f32.mrb[6].mxu0  ;;  %v5197_v58 = vadd.f32 %v7950_v5, %v4412_v55  ;;  %v4414_v62 = vpop.f32.mrb[39].mxu1  ;;  %v5161_v5 = vadd.f32 %v7909_v24, %v7928_v37 }
 0x261   :  { %v5158_v56 = vadd.f32 %v5157_v43, %v4372_v52  ;;  %v4374_v61 = vpop.f32.mrb[7].mxu0  ;;  %v5107_v22 = vpack.c.bf16 %v5194_v49, %v5191_v45  ;;  %v5200_v63 = vadd.f32 %v7952_v6, %v4414_v62 }
 0x262   :  { %v5099_v0 = vpack.c.bf16 %v5156_v48, %v5154_v44  ;;  %v5160_v1 = vadd.f32 %v5159_v21, %v4374_v61 }
 0x263   :  { %4543 = vst [vmem:[%s8076_s3 + $0x50] sm:$0xff] %v5107_v22  ;;  %v5108_v3 = vpack.c.bf16 %v5200_v63, %v5197_v58 }
 0x264   :  { %4535 = vst [vmem:[%s8076_s3 + $0x10] sm:$0xff] %v5099_v0  ;;  %v5100_v23 = vpack.c.bf16 %v5160_v1, %v5158_v56 }
 0x265   :  { %4544 = vst [vmem:[%s8076_s3 + $0x58] sm:$0xff] %v5108_v3  ;;  %v4418_v4 = vpop.f32.mrb[40].mxu1 }
 0x266   :  { %4536 = vst [vmem:[%s8076_s3 + $0x18] sm:$0xff] %v5100_v23  ;;  %v4378_v6 = vpop.f32.mrb[8].mxu0  ;;  %v5203_v9 = vadd.f32 %v7956_v15, %v4418_v4  ;;  %v4420_v10 = vpop.f32.mrb[41].mxu1 }
 0x267   :  { %v5162_v8 = vadd.f32 %v5161_v5, %v4378_v6  ;;  %v4380_v24 = vpop.f32.mrb[9].mxu0  ;;  %v5206_v12 = vadd.f32 %v7959_v35, %v4420_v10  ;;  %v4422_v16 = vpop.f32.mrb[42].mxu1 }
 0x268   :  { %v5164_v11 = vadd.f32 %v5163_v2, %v4380_v24  ;;  %v4382_v13 = vpop.f32.mrb[10].mxu0  ;;  %v5209_v17 = vadd.f32 %v7962_v39, %v4422_v16  ;;  %v4424_v29 = vpop.f32.mrb[43].mxu1  ;;  %v5169_v39 = vadd.f32 %v7917_v30, %v7928_v37 }
 0x269   :  { %v5166_v14 = vadd.f32 %v5165_v7, %v4382_v13  ;;  %v4384_v27 = vpop.f32.mrb[11].mxu0  ;;  %v5109_v26 = vpack.c.bf16 %v5206_v12, %v5203_v9  ;;  %v5212_v15 = vadd.f32 %v7964_v40, %v4424_v29 }
 0x26a   :  { %v5101_v33 = vpack.c.bf16 %v5164_v11, %v5162_v8  ;;  %v5168_v36 = vadd.f32 %v5167_v25, %v4384_v27 }
 0x26b   :  { %4545 = vst [vmem:[%s8076_s3 + $0x60] sm:$0xff] %v5109_v26  ;;  %v5110_v35 = vpack.c.bf16 %v5212_v15, %v5209_v17 }
 0x26c   :  { %4537 = vst [vmem:[%s8076_s3 + $0x20] sm:$0xff] %v5101_v33  ;;  %v5102_v28 = vpack.c.bf16 %v5168_v36, %v5166_v14 }
 0x26d   :  { %4546 = vst [vmem:[%s8076_s3 + $0x68] sm:$0xff] %v5110_v35  ;;  %v4428_v47 = vpop.f32.mrb[44].mxu1 }
 0x26e   :  { %4538 = vst [vmem:[%s8076_s3 + $0x28] sm:$0xff] %v5102_v28  ;;  %v4388_v40 = vpop.f32.mrb[12].mxu0  ;;  %v5215_v53 = vadd.f32 %v7968_v50, %v4428_v47  ;;  %v4430_v41 = vpop.f32.mrb[45].mxu1 }
 0x26f   :  { %v5170_v51 = vadd.f32 %v5169_v39, %v4388_v40  ;;  %v4390_v30 = vpop.f32.mrb[13].mxu0  ;;  %v5218_v42 = vadd.f32 %v7971_v57, %v4430_v41  ;;  %v4432_v44 = vpop.f32.mrb[46].mxu1 }
 0x270   :  { %v5172_v54 = vadd.f32 %v5171_v18, %v4390_v30  ;;  %v4392_v43 = vpop.f32.mrb[14].mxu0  ;;  %v5221_v20 = vadd.f32 %v7974_v59, %v4432_v44  ;;  %v4434_v21 = vpop.f32.mrb[47].mxu1 }
 0x271   :  { %v5174_v45 = vadd.f32 %v5173_v19, %v4392_v43  ;;  %v4394_v46 = vpop.f32.mrb[15].mxu0  ;;  %v5111_v32 = vpack.c.bf16 %v5218_v42, %v5215_v53  ;;  %v5224_v50 = vadd.f32 %v7976_v60, %v4434_v21 }
 0x272   :  { %v5103_v48 = vpack.c.bf16 %v5172_v54, %v5170_v51  ;;  %v5176_v37 = vadd.f32 %v5175_v31, %v4394_v46 }
 0x273   :  { %4547 = vst [vmem:[%s8076_s3 + $0x70] sm:$0xff] %v5111_v32  ;;  %v5112_v38 = vpack.c.bf16 %v5224_v50, %v5221_v20 }
 0x274   :  { %4539 = vst [vmem:[%s8076_s3 + $0x30] sm:$0xff] %v5103_v48  ;;  %v5104_v34 = vpack.c.bf16 %v5176_v37, %v5174_v45 }
 0x275   :  { %4548 = vst [vmem:[%s8076_s3 + $0x78] sm:$0xff] %v5112_v38 }
 0x276   :  { %4540 = vst [vmem:[%s8076_s3 + $0x38] sm:$0xff] %v5104_v34 }

// kernel: _lambda_.17
= control target key start
LH: loop header
LB: loop body
LE: loop exit
PB: predicated region body
PF: predicated region fallthrough
CT: control target
= control target key end

     0   :  { %s6567_s1 = inlined_call_operand.vmem [shape: bf16[2304,256], index: 1, kind: input, shape index: {}]   ;;  %s6568_s0 = inlined_call_operand.vmem [shape: bf16[128,2304], index: 0, kind: input, shape index: {}]   ;;  %s6569_s2 = inlined_call_operand.vmem [shape: f32[1,256], index: 2, kind: input, shape index: {}]   ;;  %s6570_s3 = inlined_call_operand.vmem [shape: bf16[128,256], index: 3, kind: output, shape index: {}]  }
   0x1   :  { %v4423_v0 = vld [vmem:[%s6567_s1 + $0x4] ss:$8 sps:$4 sm:$0xff]   ;;  %v4427_v2 = vld [vmem:[%s6567_s1] ss:$8 sps:$4 sm:$0xff]   ;;  %v4429_v4 = vld [vmem:[%s6567_s1 + $0x14] ss:$8 sps:$4 sm:$0xff]  }
   0x2   :  { %v4425_v1 = vld [vmem:[%s6567_s1 + $0x404] ss:$8 sps:$4 sm:$0xff]   ;;  %2618 = vmatprep.subr.bf16.mxu1 %v4423_v0  ;;  %v4428_v3 = vld [vmem:[%s6567_s1 + $0x400] ss:$8 sps:$4 sm:$0xff]   ;;  %v4431_v5 = vld [vmem:[%s6567_s1 + $0x414] ss:$8 sps:$4 sm:$0xff]  }
   0x3   :  { %3070 = vmatprep.subr.bf16.mxu0 %v4425_v1  ;;  %2619 = vmatpush1.bf16.msra.mxu1 %v4427_v2  ;;  %v4433_v6 = vld [vmem:[%s6567_s1 + $0x10] ss:$8 sps:$4 sm:$0xff]   ;;  %v4435_v8 = vld [vmem:[%s6567_s1 + $0x24] ss:$8 sps:$4 sm:$0xff]   ;;  %v4439_v10 = vld [vmem:[%s6567_s1 + $0x20] ss:$8 sps:$4 sm:$0xff]  }
   0x4   :  { %3071 = vmatpush1.bf16.msra.mxu0 %v4428_v3  ;;  %2620 = vmatprep.subr.bf16.mxu1 %v4429_v4  ;;  %v4434_v7 = vld [vmem:[%s6567_s1 + $0x410] ss:$8 sps:$4 sm:$0xff]   ;;  %v4437_v9 = vld [vmem:[%s6567_s1 + $0x424] ss:$8 sps:$4 sm:$0xff]   ;;  %v4440_v11 = vld [vmem:[%s6567_s1 + $0x420] ss:$8 sps:$4 sm:$0xff]  }
   0x5   :  { %3072 = vmatprep.subr.bf16.mxu0 %v4431_v5  ;;  %v4441_v12 = vld [vmem:[%s6567_s1 + $0x34] ss:$8 sps:$4 sm:$0xff]   ;;  %v4445_v14 = vld [vmem:[%s6567_s1 + $0x30] ss:$8 sps:$4 sm:$0xff]   ;;  %v4447_v16 = vld [vmem:[%s6567_s1 + $0x44] ss:$8 sps:$4 sm:$0xff]  }
   0x6   :  { %v4443_v13 = vld [vmem:[%s6567_s1 + $0x434] ss:$8 sps:$4 sm:$0xff]   ;;  %v4446_v15 = vld [vmem:[%s6567_s1 + $0x430] ss:$8 sps:$4 sm:$0xff]   ;;  %v4449_v17 = vld [vmem:[%s6567_s1 + $0x444] ss:$8 sps:$4 sm:$0xff]  }
   0x7   :  { %2621 = vmatpush1.bf16.msra.mxu1 %v4433_v6  ;;  %v4451_v18 = vld [vmem:[%s6567_s1 + $0x40] ss:$8 sps:$4 sm:$0xff]   ;;  %v4453_v20 = vld [vmem:[%s6567_s1 + $0x54] ss:$8 sps:$4 sm:$0xff]   ;;  %v4457_v22 = vld [vmem:[%s6567_s1 + $0x50] ss:$8 sps:$4 sm:$0xff]  }
   0x8   :  { %3073 = vmatpush1.bf16.msra.mxu0 %v4434_v7  ;;  %2622 = vmatprep.subr.bf16.mxu1 %v4435_v8  ;;  %v4452_v19 = vld [vmem:[%s6567_s1 + $0x440] ss:$8 sps:$4 sm:$0xff]   ;;  %v4455_v21 = vld [vmem:[%s6567_s1 + $0x454] ss:$8 sps:$4 sm:$0xff]   ;;  %v4458_v23 = vld [vmem:[%s6567_s1 + $0x450] ss:$8 sps:$4 sm:$0xff]  }
   0x9   :  { %3074 = vmatprep.subr.bf16.mxu0 %v4437_v9  ;;  %v4459_v24 = vld [vmem:[%s6567_s1 + $0x64] ss:$8 sps:$4 sm:$0xff]   ;;  %v4463_v26 = vld [vmem:[%s6567_s1 + $0x60] ss:$8 sps:$4 sm:$0xff]   ;;  %v4465_v28 = vld [vmem:[%s6567_s1 + $0x74] ss:$8 sps:$4 sm:$0xff]  }
   0xa   :  { %v4461_v25 = vld [vmem:[%s6567_s1 + $0x464] ss:$8 sps:$4 sm:$0xff]   ;;  %v4464_v27 = vld [vmem:[%s6567_s1 + $0x460] ss:$8 sps:$4 sm:$0xff]   ;;  %v4467_v29 = vld [vmem:[%s6567_s1 + $0x474] ss:$8 sps:$4 sm:$0xff]  }
   0xb   :  { %2623 = vmatpush1.bf16.msra.mxu1 %v4439_v10  ;;  %v4469_v30 = vld [vmem:[%s6567_s1 + $0x70] ss:$8 sps:$4 sm:$0xff]   ;;  %v4471_v32 = vld [vmem:[%s6567_s1 + $0x84] ss:$8 sps:$4 sm:$0xff]   ;;  %v4475_v34 = vld [vmem:[%s6567_s1 + $0x80] ss:$8 sps:$4 sm:$0xff]  }
   0xc   :  { %3075 = vmatpush1.bf16.msra.mxu0 %v4440_v11  ;;  %2624 = vmatprep.subr.bf16.mxu1 %v4441_v12  ;;  %v4470_v31 = vld [vmem:[%s6567_s1 + $0x470] ss:$8 sps:$4 sm:$0xff]   ;;  %v4473_v33 = vld [vmem:[%s6567_s1 + $0x484] ss:$8 sps:$4 sm:$0xff]   ;;  %v4476_v35 = vld [vmem:[%s6567_s1 + $0x480] ss:$8 sps:$4 sm:$0xff]  }
   0xd   :  { %3076 = vmatprep.subr.bf16.mxu0 %v4443_v13  ;;  %v4477_v36 = vld [vmem:[%s6567_s1 + $0x94] ss:$8 sps:$4 sm:$0xff]   ;;  %v4481_v38 = vld [vmem:[%s6567_s1 + $0x90] ss:$8 sps:$4 sm:$0xff]   ;;  %v4483_v40 = vld [vmem:[%s6567_s1 + $0xa4] ss:$8 sps:$4 sm:$0xff]  }
   0xe   :  { %v4479_v37 = vld [vmem:[%s6567_s1 + $0x494] ss:$8 sps:$4 sm:$0xff]   ;;  %v4482_v39 = vld [vmem:[%s6567_s1 + $0x490] ss:$8 sps:$4 sm:$0xff]   ;;  %v4485_v41 = vld [vmem:[%s6567_s1 + $0x4a4] ss:$8 sps:$4 sm:$0xff]  }
   0xf   :  { %2625 = vmatpush1.bf16.msra.mxu1 %v4445_v14  ;;  %v4487_v42 = vld [vmem:[%s6567_s1 + $0xa0] ss:$8 sps:$4 sm:$0xff]   ;;  %v4489_v44 = vld [vmem:[%s6567_s1 + $0xb4] ss:$8 sps:$4 sm:$0xff]   ;;  %v4493_v46 = vld [vmem:[%s6567_s1 + $0xb0] ss:$8 sps:$4 sm:$0xff]  }
  0x10   :  { %3077 = vmatpush1.bf16.msra.mxu0 %v4446_v15  ;;  %2626 = vmatprep.subr.bf16.mxu1 %v4447_v16  ;;  %v4488_v43 = vld [vmem:[%s6567_s1 + $0x4a0] ss:$8 sps:$4 sm:$0xff]   ;;  %v4491_v45 = vld [vmem:[%s6567_s1 + $0x4b4] ss:$8 sps:$4 sm:$0xff]   ;;  %v4494_v47 = vld [vmem:[%s6567_s1 + $0x4b0] ss:$8 sps:$4 sm:$0xff]  }
  0x11   :  { %3078 = vmatprep.subr.bf16.mxu0 %v4449_v17  ;;  %v4495_v48 = vld [vmem:[%s6567_s1 + $0xc4] ss:$8 sps:$4 sm:$0xff]   ;;  %v4499_v52 = vld [vmem:[%s6567_s1 + $0xc0] ss:$8 sps:$4 sm:$0xff]   ;;  %v4501_v54 = vld [vmem:[%s6567_s1 + $0xd4] ss:$8 sps:$4 sm:$0xff]  }
  0x12   :  { %v4521_v49 = vld [vmem:[%s6568_s0 + $0x4] ss:$72 sps:$4 sm:$0xff]   ;;  %v4500_v53 = vld [vmem:[%s6567_s1 + $0x4c0] ss:$8 sps:$4 sm:$0xff]   ;;  %v4503_v55 = vld [vmem:[%s6567_s1 + $0x4d4] ss:$8 sps:$4 sm:$0xff]  }
  0x13   :  { %2627 = vmatpush1.bf16.msra.mxu1 %v4451_v18  ;;  %v4497_v50 = vld [vmem:[%s6567_s1 + $0x4c4] ss:$8 sps:$4 sm:$0xff]   ;;  %2650 = vmatprep.mubr.bf16.mxu1 %v4521_v49  ;;  %v4505_v56 = vld [vmem:[%s6567_s1 + $0xd0] ss:$8 sps:$4 sm:$0xff]   ;;  %v4511_v60 = vld [vmem:[%s6567_s1 + $0xe0] ss:$8 sps:$4 sm:$0xff]  }
  0x14   :  { %3079 = vmatpush1.bf16.msra.mxu0 %v4452_v19  ;;  %2628 = vmatprep.subr.bf16.mxu1 %v4453_v20  ;;  %v4524_v51 = vld [vmem:[%s6568_s0 + $0x24] ss:$72 sps:$4 sm:$0xff]   ;;  %v4506_v57 = vld [vmem:[%s6567_s1 + $0x4d0] ss:$8 sps:$4 sm:$0xff]   ;;  %v4512_v61 = vld [vmem:[%s6567_s1 + $0x4e0] ss:$8 sps:$4 sm:$0xff]  }
  0x15   :  { %3080 = vmatprep.subr.bf16.mxu0 %v4455_v21  ;;  %3102 = vmatprep.mubr.bf16.mxu0 %v4524_v51  ;;  %v4507_v58 = vld [vmem:[%s6567_s1 + $0xe4] ss:$8 sps:$4 sm:$0xff]   ;;  %v4513_v62 = vld [vmem:[%s6567_s1 + $0xf4] ss:$8 sps:$4 sm:$0xff]   ;;  %v4517_v0 = vld [vmem:[%s6567_s1 + $0xf0] ss:$8 sps:$4 sm:$0xff]  }
  0x16   :  { %v4509_v59 = vld [vmem:[%s6567_s1 + $0x4e4] ss:$8 sps:$4 sm:$0xff]   ;;  %v4515_v63 = vld [vmem:[%s6567_s1 + $0x4f4] ss:$8 sps:$4 sm:$0xff]   ;;  %v4518_v1 = vld [vmem:[%s6567_s1 + $0x4f0] ss:$8 sps:$4 sm:$0xff]  }
  0x17   :  { %2629 = vmatpush1.bf16.msra.mxu1 %v4457_v22  ;;  %v4527_v2 = vld [vmem:[%s6567_s1 + $0x104] ss:$8 sps:$4 sm:$0xff]   ;;  %v4519_v4 = vld [vmem:[%s6568_s0] ss:$72 sps:$4 sm:$0xff]   ;;  %v4533_v8 = vld [vmem:[%s6567_s1 + $0x114] ss:$8 sps:$4 sm:$0xff]  }
  0x18   :  { %3081 = vmatpush1.bf16.msra.mxu0 %v4458_v23  ;;  %2630 = vmatprep.subr.bf16.mxu1 %v4459_v24  ;;  %v4530_v3 = vld [vmem:[%s6567_s1 + $0x504] ss:$8 sps:$4 sm:$0xff]   ;;  %v4522_v5 = vld [vmem:[%s6568_s0 + $0x20] ss:$72 sps:$4 sm:$0xff]   ;;  %v4536_v9 = vld [vmem:[%s6567_s1 + $0x514] ss:$8 sps:$4 sm:$0xff]  }
  0x19   :  { %3082 = vmatprep.subr.bf16.mxu0 %v4461_v25  ;;  %v4525_v6 = vld [vmem:[%s6567_s1 + $0x100] ss:$8 sps:$4 sm:$0xff]   ;;  %v4537_v10 = vld [vmem:[%s6568_s0 + $0x94] ss:$72 sps:$4 sm:$0xff]   ;;  %v4531_v12 = vld [vmem:[%s6567_s1 + $0x110] ss:$8 sps:$4 sm:$0xff]  }
  0x1a   :  { %v4528_v7 = vld [vmem:[%s6567_s1 + $0x500] ss:$8 sps:$4 sm:$0xff]   ;;  %v4539_v11 = vld [vmem:[%s6568_s0 + $0xb4] ss:$72 sps:$4 sm:$0xff]   ;;  %v4534_v13 = vld [vmem:[%s6567_s1 + $0x510] ss:$8 sps:$4 sm:$0xff]  }
  0x1b   :  { %2631 = vmatpush1.bf16.msra.mxu1 %v4463_v26  ;;  %v4544_v14 = vld [vmem:[%s6567_s1 + $0x124] ss:$8 sps:$4 sm:$0xff]   ;;  %v4541_v16 = vld [vmem:[%s6568_s0 + $0x90] ss:$72 sps:$4 sm:$0xff]   ;;  %v4542_v17 = vld [vmem:[%s6567_s1 + $0x120] ss:$8 sps:$4 sm:$0xff]  }
  0x1c   :  { %3083 = vmatpush1.bf16.msra.mxu0 %v4464_v27  ;;  %2632 = vmatprep.subr.bf16.mxu1 %v4465_v28  ;;  %v4548_v15 = vld [vmem:[%s6567_s1 + $0x524] ss:$8 sps:$4 sm:$0xff]   ;;  %v4545_v18 = vld [vmem:[%s6568_s0 + $0xb0] ss:$72 sps:$4 sm:$0xff]   ;;  %v4546_v19 = vld [vmem:[%s6567_s1 + $0x520] ss:$8 sps:$4 sm:$0xff]  }
  0x1d   :  { %3084 = vmatprep.subr.bf16.mxu0 %v4467_v29  ;;  %v4551_v20 = vld [vmem:[%s6567_s1 + $0x134] ss:$8 sps:$4 sm:$0xff]   ;;  %v4555_v22 = vld [vmem:[%s6568_s0 + $0x124] ss:$72 sps:$4 sm:$0xff]   ;;  %v4549_v24 = vld [vmem:[%s6567_s1 + $0x130] ss:$8 sps:$4 sm:$0xff]  }
  0x1e   :  { %v4554_v21 = vld [vmem:[%s6567_s1 + $0x534] ss:$8 sps:$4 sm:$0xff]   ;;  %v4557_v23 = vld [vmem:[%s6568_s0 + $0x144] ss:$72 sps:$4 sm:$0xff]   ;;  %v4552_v25 = vld [vmem:[%s6567_s1 + $0x530] ss:$8 sps:$4 sm:$0xff]  }
  0x1f   :  { %2633 = vmatpush1.bf16.msra.mxu1 %v4469_v30  ;;  %v4562_v26 = vld [vmem:[%s6567_s1 + $0x144] ss:$8 sps:$4 sm:$0xff]   ;;  %v4559_v28 = vld [vmem:[%s6568_s0 + $0x120] ss:$72 sps:$4 sm:$0xff]   ;;  %v4588_v49 = vld [vmem:[%s6567_s1 + $0x570] ss:$8 sps:$4 sm:$0xff]  }
  0x20   :  { %3085 = vmatpush1.bf16.msra.mxu0 %v4470_v31  ;;  %2634 = vmatprep.subr.bf16.mxu1 %v4471_v32  ;;  %v4566_v27 = vld [vmem:[%s6567_s1 + $0x544] ss:$8 sps:$4 sm:$0xff]   ;;  %v4560_v29 = vld [vmem:[%s6567_s1 + $0x140] ss:$8 sps:$4 sm:$0xff]   ;;  %v4569_v32 = vld [vmem:[%s6567_s1 + $0x154] ss:$8 sps:$4 sm:$0xff]  }
  0x21   :  { %3086 = vmatprep.subr.bf16.mxu0 %v4473_v33  ;;  %v4563_v30 = vld [vmem:[%s6568_s0 + $0x140] ss:$72 sps:$4 sm:$0xff]   ;;  %v4572_v33 = vld [vmem:[%s6567_s1 + $0x554] ss:$8 sps:$4 sm:$0xff]   ;;  %v4602_v51 = vld [vmem:[%s6567_s1 + $0x584] ss:$8 sps:$4 sm:$0xff]  }
  0x22   :  { %v4564_v31 = vld [vmem:[%s6567_s1 + $0x540] ss:$8 sps:$4 sm:$0xff]  }
  0x23   :  { %2635 = vmatpush1.bf16.msra.mxu1 %v4475_v34  ;;  %v4573_v34 = vld [vmem:[%s6568_s0 + $0x1b4] ss:$72 sps:$4 sm:$0xff]  }
  0x24   :  { %3087 = vmatpush1.bf16.msra.mxu0 %v4476_v35  ;;  %2636 = vmatprep.subr.bf16.mxu1 %v4477_v36  ;;  %v4575_v35 = vld [vmem:[%s6568_s0 + $0x1d4] ss:$72 sps:$4 sm:$0xff]   ;;  %v4567_v36 = vld [vmem:[%s6567_s1 + $0x150] ss:$8 sps:$4 sm:$0xff]  }
  0x25   :  { %3088 = vmatprep.subr.bf16.mxu0 %v4479_v37  ;;  %v4570_v37 = vld [vmem:[%s6567_s1 + $0x550] ss:$8 sps:$4 sm:$0xff]  }
  0x27   :  { %2637 = vmatpush1.bf16.msra.mxu1 %v4481_v38  ;;  %v4580_v38 = vld [vmem:[%s6567_s1 + $0x164] ss:$8 sps:$4 sm:$0xff]  }
  0x28   :  { %3089 = vmatpush1.bf16.msra.mxu0 %v4482_v39  ;;  %2638 = vmatprep.subr.bf16.mxu1 %v4483_v40  ;;  %v4584_v39 = vld [vmem:[%s6567_s1 + $0x564] ss:$8 sps:$4 sm:$0xff]   ;;  %v4577_v40 = vld [vmem:[%s6568_s0 + $0x1b0] ss:$72 sps:$4 sm:$0xff]  }
  0x29   :  { %3090 = vmatprep.subr.bf16.mxu0 %v4485_v41  ;;  %v4578_v41 = vld [vmem:[%s6567_s1 + $0x160] ss:$8 sps:$4 sm:$0xff]  }
  0x2b   :  { %2639 = vmatpush1.bf16.msra.mxu1 %v4487_v42  ;;  %v4581_v42 = vld [vmem:[%s6568_s0 + $0x1d0] ss:$72 sps:$4 sm:$0xff]  }
  0x2c   :  { %3091 = vmatpush1.bf16.msra.mxu0 %v4488_v43  ;;  %2640 = vmatprep.subr.bf16.mxu1 %v4489_v44  ;;  %v4582_v43 = vld [vmem:[%s6567_s1 + $0x560] ss:$8 sps:$4 sm:$0xff]   ;;  %v4587_v44 = vld [vmem:[%s6567_s1 + $0x174] ss:$8 sps:$4 sm:$0xff]  }
  0x2d   :  { %3092 = vmatprep.subr.bf16.mxu0 %v4491_v45  ;;  %v4590_v45 = vld [vmem:[%s6567_s1 + $0x574] ss:$8 sps:$4 sm:$0xff]  }
  0x2f   :  { %2641 = vmatpush1.bf16.msra.mxu1 %v4493_v46  ;;  %v4591_v46 = vld [vmem:[%s6568_s0 + $0x244] ss:$72 sps:$4 sm:$0xff]  }
  0x30   :  { %3093 = vmatpush1.bf16.msra.mxu0 %v4494_v47  ;;  %2642 = vmatprep.subr.bf16.mxu1 %v4495_v48  ;;  %v4593_v47 = vld [vmem:[%s6568_s0 + $0x264] ss:$72 sps:$4 sm:$0xff]   ;;  %v4585_v48 = vld [vmem:[%s6567_s1 + $0x170] ss:$8 sps:$4 sm:$0xff]  }
  0x31   :  { %3094 = vmatprep.subr.bf16.mxu0 %v4497_v50  ;;  %v4598_v50 = vld [vmem:[%s6567_s1 + $0x184] ss:$8 sps:$4 sm:$0xff]  }
  0x33   :  { %2643 = vmatpush1.bf16.msra.mxu1 %v4499_v52  ;;  %v4595_v52 = vld [vmem:[%s6568_s0 + $0x240] ss:$72 sps:$4 sm:$0xff]  }
  0x34   :  { %3095 = vmatpush1.bf16.msra.mxu0 %v4500_v53  ;;  %2644 = vmatprep.subr.bf16.mxu1 %v4501_v54  ;;  %v4596_v53 = vld [vmem:[%s6567_s1 + $0x180] ss:$8 sps:$4 sm:$0xff]  }
  0x35   :  { %3096 = vmatprep.subr.bf16.mxu0 %v4503_v55  ;;  %v4599_v54 = vld [vmem:[%s6568_s0 + $0x260] ss:$72 sps:$4 sm:$0xff]  }
  0x36   :  { %v4600_v55 = vld [vmem:[%s6567_s1 + $0x580] ss:$8 sps:$4 sm:$0xff]  }
  0x37   :  { %2645 = vmatpush1.bf16.msra.mxu1 %v4505_v56  ;;  %v4605_v56 = vld [vmem:[%s6567_s1 + $0x194] ss:$8 sps:$4 sm:$0xff]  }
  0x38   :  { %3097 = vmatpush1.bf16.msra.mxu0 %v4506_v57  ;;  %2646 = vmatprep.subr.bf16.mxu1 %v4507_v58  ;;  %v4608_v57 = vld [vmem:[%s6567_s1 + $0x594] ss:$8 sps:$4 sm:$0xff]  }
  0x39   :  { %3098 = vmatprep.subr.bf16.mxu0 %v4509_v59  ;;  %v4609_v58 = vld [vmem:[%s6568_s0 + $0x2d4] ss:$72 sps:$4 sm:$0xff]  }
  0x3a   :  { %v4611_v59 = vld [vmem:[%s6568_s0 + $0x2f4] ss:$72 sps:$4 sm:$0xff]  }
  0x3b   :  { %2647 = vmatpush1.bf16.msra.mxu1 %v4511_v60  ;;  %v4603_v60 = vld [vmem:[%s6567_s1 + $0x190] ss:$8 sps:$4 sm:$0xff]  }
  0x3c   :  { %3099 = vmatpush1.bf16.msra.mxu0 %v4512_v61  ;;  %2648 = vmatprep.subr.bf16.mxu1 %v4513_v62  ;;  %v4606_v61 = vld [vmem:[%s6567_s1 + $0x590] ss:$8 sps:$4 sm:$0xff]   ;;  %v4616_v62 = vld [vmem:[%s6567_s1 + $0x1a4] ss:$8 sps:$4 sm:$0xff]  }
  0x3d   :  { %3100 = vmatprep.subr.bf16.mxu0 %v4515_v63  ;;  %v4620_v63 = vld [vmem:[%s6567_s1 + $0x5a4] ss:$8 sps:$4 sm:$0xff]  }
  0x3f   :  { %2649 = vmatpush1.bf16.msra.mxu1 %v4517_v0  ;;  %v4613_v0 = vld [vmem:[%s6568_s0 + $0x2d0] ss:$72 sps:$4 sm:$0xff]  }
  0x40   :  { %3101 = vmatpush1.bf16.msra.mxu0 %v4518_v1  ;;  %2731 = vmatprep.subr.bf16.mxu1 %v4527_v2  ;;  %v4614_v1 = vld [vmem:[%s6567_s1 + $0x1a0] ss:$8 sps:$4 sm:$0xff]   ;;  %v4617_v2 = vld [vmem:[%s6568_s0 + $0x2f0] ss:$72 sps:$4 sm:$0xff]  }
  0x41   :  { %3183 = vmatprep.subr.bf16.mxu0 %v4530_v3  ;;  %v4618_v3 = vld [vmem:[%s6567_s1 + $0x5a0] ss:$8 sps:$4 sm:$0xff]  }
  0x42   :  { %2651 = vmatmul.mubr.bf16.vlgmr.msra.gmra.mrb[0].mxu1 %v4519_v4  ;;  %v4623_v4 = vld [vmem:[%s6567_s1 + $0x1b4] ss:$8 sps:$4 sm:$0xff]  }
  0x43   :  { %3103 = vmatmul.mubr.bf16.vlgmr.msra.gmra.mrb[0].mxu0 %v4522_v5  ;;  %2732 = vmatpush1.bf16.msra.mxu1 %v4525_v6  ;;  %v4626_v5 = vld [vmem:[%s6567_s1 + $0x5b4] ss:$8 sps:$4 sm:$0xff]   ;;  %v4627_v6 = vld [vmem:[%s6568_s0 + $0x364] ss:$72 sps:$4 sm:$0xff]  }
  0x44   :  { %3184 = vmatpush1.bf16.msra.mxu0 %v4528_v7  ;;  %2733 = vmatprep.subr.bf16.mxu1 %v4533_v8  ;;  %v4629_v7 = vld [vmem:[%s6568_s0 + $0x384] ss:$72 sps:$4 sm:$0xff]   ;;  %v4621_v8 = vld [vmem:[%s6567_s1 + $0x1b0] ss:$8 sps:$4 sm:$0xff]  }
  0x45   :  { %3185 = vmatprep.subr.bf16.mxu0 %v4536_v9  ;;  %2660 = vmatprep.mubr.bf16.mxu1 %v4537_v10  ;;  %v4624_v9 = vld [vmem:[%s6567_s1 + $0x5b0] ss:$8 sps:$4 sm:$0xff]   ;;  %v4634_v10 = vld [vmem:[%s6567_s1 + $0x1c4] ss:$8 sps:$4 sm:$0xff]  }
  0x46   :  { %3112 = vmatprep.mubr.bf16.mxu0 %v4539_v11  ;;  %v4638_v11 = vld [vmem:[%s6567_s1 + $0x5c4] ss:$8 sps:$4 sm:$0xff]  }
  0x47   :  { %2734 = vmatpush1.bf16.msra.mxu1 %v4531_v12  ;;  %v4631_v12 = vld [vmem:[%s6568_s0 + $0x360] ss:$72 sps:$4 sm:$0xff]  }
  0x48   :  { %3186 = vmatpush1.bf16.msra.mxu0 %v4534_v13  ;;  %2735 = vmatprep.subr.bf16.mxu1 %v4544_v14  ;;  %v4632_v13 = vld [vmem:[%s6567_s1 + $0x1c0] ss:$8 sps:$4 sm:$0xff]  }
  0x49   :  { %3187 = vmatprep.subr.bf16.mxu0 %v4548_v15  ;;  %v4635_v14 = vld [vmem:[%s6568_s0 + $0x380] ss:$72 sps:$4 sm:$0xff]  }
  0x4a   :  { %2661 = vmatmul.mubr.bf16.gmra.mrb[4].mxu1 %v4541_v16  ;;  %v4636_v15 = vld [vmem:[%s6567_s1 + $0x5c0] ss:$8 sps:$4 sm:$0xff]   ;;  %v4641_v16 = vld [vmem:[%s6567_s1 + $0x1d4] ss:$8 sps:$4 sm:$0xff]  }
  0x4b   :  { %3113 = vmatmul.mubr.bf16.gmra.mrb[4].mxu0 %v4545_v18  ;;  %2736 = vmatpush1.bf16.msra.mxu1 %v4542_v17  ;;  %v4644_v17 = vld [vmem:[%s6567_s1 + $0x5d4] ss:$8 sps:$4 sm:$0xff]  }
  0x4c   :  { %3188 = vmatpush1.bf16.msra.mxu0 %v4546_v19  ;;  %2737 = vmatprep.subr.bf16.mxu1 %v4551_v20  ;;  %v4645_v18 = vld [vmem:[%s6568_s0 + $0x3f4] ss:$72 sps:$4 sm:$0xff]   ;;  %v4639_v20 = vld [vmem:[%s6567_s1 + $0x1d0] ss:$8 sps:$4 sm:$0xff]  }
  0x4d   :  { %3189 = vmatprep.subr.bf16.mxu0 %v4554_v21  ;;  %2670 = vmatprep.mubr.bf16.mxu1 %v4555_v22  ;;  %v4647_v19 = vld [vmem:[%s6568_s0 + $0x414] ss:$72 sps:$4 sm:$0xff]   ;;  %v4642_v21 = vld [vmem:[%s6567_s1 + $0x5d0] ss:$8 sps:$4 sm:$0xff]   ;;  %v4652_v22 = vld [vmem:[%s6567_s1 + $0x1e4] ss:$8 sps:$4 sm:$0xff]  }
  0x4e   :  { %3122 = vmatprep.mubr.bf16.mxu0 %v4557_v23  ;;  %v4656_v23 = vld [vmem:[%s6567_s1 + $0x5e4] ss:$8 sps:$4 sm:$0xff]  }
  0x4f   :  { %2738 = vmatpush1.bf16.msra.mxu1 %v4549_v24  ;;  %v4649_v24 = vld [vmem:[%s6568_s0 + $0x3f0] ss:$72 sps:$4 sm:$0xff]  }
  0x50   :  { %3190 = vmatpush1.bf16.msra.mxu0 %v4552_v25  ;;  %2739 = vmatprep.subr.bf16.mxu1 %v4562_v26  ;;  %v4650_v25 = vld [vmem:[%s6567_s1 + $0x1e0] ss:$8 sps:$4 sm:$0xff]   ;;  %v4653_v26 = vld [vmem:[%s6568_s0 + $0x410] ss:$72 sps:$4 sm:$0xff]  }
  0x51   :  { %3191 = vmatprep.subr.bf16.mxu0 %v4566_v27  ;;  %v4654_v27 = vld [vmem:[%s6567_s1 + $0x5e0] ss:$8 sps:$4 sm:$0xff]  }
  0x52   :  { %2671 = vmatmul.mubr.bf16.gmra.mrb[8].mxu1 %v4559_v28  ;;  %v4659_v28 = vld [vmem:[%s6567_s1 + $0x1f4] ss:$8 sps:$4 sm:$0xff]  }
  0x53   :  { %3123 = vmatmul.mubr.bf16.gmra.mrb[8].mxu0 %v4563_v30  ;;  %2740 = vmatpush1.bf16.msra.mxu1 %v4560_v29  ;;  %v4662_v29 = vld [vmem:[%s6567_s1 + $0x5f4] ss:$8 sps:$4 sm:$0xff]  }
  0x54   :  { %3192 = vmatpush1.bf16.msra.mxu0 %v4564_v31  ;;  %2741 = vmatprep.subr.bf16.mxu1 %v4569_v32  ;;  %v4665_v30 = vld [vmem:[%s6568_s0 + $0xc] ss:$72 sps:$4 sm:$0xff]   ;;  %v4657_v32 = vld [vmem:[%s6567_s1 + $0x1f0] ss:$8 sps:$4 sm:$0xff]  }
  0x55   :  { %3193 = vmatprep.subr.bf16.mxu0 %v4572_v33  ;;  %2680 = vmatprep.mubr.bf16.mxu1 %v4573_v34  ;;  %v4668_v31 = vld [vmem:[%s6568_s0 + $0x2c] ss:$72 sps:$4 sm:$0xff]   ;;  %v4660_v33 = vld [vmem:[%s6567_s1 + $0x5f0] ss:$8 sps:$4 sm:$0xff]  }
  0x56   :  { %3132 = vmatprep.mubr.bf16.mxu0 %v4575_v35  ;;  %v4671_v34 = vld [vmem:[%s6567_s1 + $0x204] ss:$8 sps:$4 sm:$0xff]  }
  0x57   :  { %2742 = vmatpush1.bf16.msra.mxu1 %v4567_v36  ;;  %v4674_v35 = vld [vmem:[%s6567_s1 + $0x604] ss:$8 sps:$4 sm:$0xff]   ;;  %v4663_v36 = vld [vmem:[%s6568_s0 + $0x8] ss:$72 sps:$4 sm:$0xff]  }
  0x58   :  { %3194 = vmatpush1.bf16.msra.mxu0 %v4570_v37  ;;  %2743 = vmatprep.subr.bf16.mxu1 %v4580_v38  ;;  %v4666_v37 = vld [vmem:[%s6568_s0 + $0x28] ss:$72 sps:$4 sm:$0xff]  }
  0x59   :  { %3195 = vmatprep.subr.bf16.mxu0 %v4584_v39  ;;  %v4669_v38 = vld [vmem:[%s6567_s1 + $0x200] ss:$8 sps:$4 sm:$0xff]  }
  0x5a   :  { %2681 = vmatmul.mubr.bf16.gmra.mrb[12].mxu1 %v4577_v40  ;;  %v4672_v39 = vld [vmem:[%s6567_s1 + $0x600] ss:$8 sps:$4 sm:$0xff]   ;;  %v4677_v40 = vld [vmem:[%s6567_s1 + $0x214] ss:$8 sps:$4 sm:$0xff]  }
  0x5b   :  { %3133 = vmatmul.mubr.bf16.gmra.mrb[12].mxu0 %v4581_v42  ;;  %2744 = vmatpush1.bf16.msra.mxu1 %v4578_v41  ;;  %v4680_v41 = vld [vmem:[%s6567_s1 + $0x614] ss:$8 sps:$4 sm:$0xff]  }
  0x5c   :  { %3196 = vmatpush1.bf16.msra.mxu0 %v4582_v43  ;;  %2745 = vmatprep.subr.bf16.mxu1 %v4587_v44  ;;  %v4681_v42 = vld [vmem:[%s6568_s0 + $0x9c] ss:$72 sps:$4 sm:$0xff]   ;;  %v4675_v44 = vld [vmem:[%s6567_s1 + $0x210] ss:$8 sps:$4 sm:$0xff]  }
  0x5d   :  { %3197 = vmatprep.subr.bf16.mxu0 %v4590_v45  ;;  %2690 = vmatprep.mubr.bf16.mxu1 %v4591_v46  ;;  %v4683_v43 = vld [vmem:[%s6568_s0 + $0xbc] ss:$72 sps:$4 sm:$0xff]   ;;  %v4678_v45 = vld [vmem:[%s6567_s1 + $0x610] ss:$8 sps:$4 sm:$0xff]  }
  0x5e   :  { %3142 = vmatprep.mubr.bf16.mxu0 %v4593_v47  ;;  %v4688_v46 = vld [vmem:[%s6567_s1 + $0x224] ss:$8 sps:$4 sm:$0xff]  }
  0x5f   :  { %2746 = vmatpush1.bf16.msra.mxu1 %v4585_v48  ;;  %v4692_v47 = vld [vmem:[%s6567_s1 + $0x624] ss:$8 sps:$4 sm:$0xff]   ;;  %v4685_v48 = vld [vmem:[%s6568_s0 + $0x98] ss:$72 sps:$4 sm:$0xff]  }
  0x60   :  { %3198 = vmatpush1.bf16.msra.mxu0 %v4588_v49  ;;  %2747 = vmatprep.subr.bf16.mxu1 %v4598_v50  ;;  %v4686_v49 = vld [vmem:[%s6567_s1 + $0x220] ss:$8 sps:$4 sm:$0xff]  }
  0x61   :  { %3199 = vmatprep.subr.bf16.mxu0 %v4602_v51  ;;  %v4689_v50 = vld [vmem:[%s6568_s0 + $0xb8] ss:$72 sps:$4 sm:$0xff]  }
  0x62   :  { %2691 = vmatmul.mubr.bf16.gmra.mrb[16].mxu1 %v4595_v52  ;;  %v4690_v51 = vld [vmem:[%s6567_s1 + $0x620] ss:$8 sps:$4 sm:$0xff]   ;;  %v4695_v52 = vld [vmem:[%s6567_s1 + $0x234] ss:$8 sps:$4 sm:$0xff]  }
  0x63   :  { %3143 = vmatmul.mubr.bf16.gmra.mrb[16].mxu0 %v4599_v54  ;;  %2748 = vmatpush1.bf16.msra.mxu1 %v4596_v53  ;;  %v4698_v53 = vld [vmem:[%s6567_s1 + $0x634] ss:$8 sps:$4 sm:$0xff]  }
  0x64   :  { %3200 = vmatpush1.bf16.msra.mxu0 %v4600_v55  ;;  %2749 = vmatprep.subr.bf16.mxu1 %v4605_v56  ;;  %v4699_v54 = vld [vmem:[%s6568_s0 + $0x12c] ss:$72 sps:$4 sm:$0xff]   ;;  %v4693_v56 = vld [vmem:[%s6567_s1 + $0x230] ss:$8 sps:$4 sm:$0xff]  }
  0x65   :  { %3201 = vmatprep.subr.bf16.mxu0 %v4608_v57  ;;  %2700 = vmatprep.mubr.bf16.mxu1 %v4609_v58  ;;  %v4701_v55 = vld [vmem:[%s6568_s0 + $0x14c] ss:$72 sps:$4 sm:$0xff]   ;;  %v4696_v57 = vld [vmem:[%s6567_s1 + $0x630] ss:$8 sps:$4 sm:$0xff]  }
  0x66   :  { %3152 = vmatprep.mubr.bf16.mxu0 %v4611_v59  ;;  %v4706_v58 = vld [vmem:[%s6567_s1 + $0x244] ss:$8 sps:$4 sm:$0xff]  }
  0x67   :  { %2750 = vmatpush1.bf16.msra.mxu1 %v4603_v60  ;;  %v4710_v59 = vld [vmem:[%s6567_s1 + $0x644] ss:$8 sps:$4 sm:$0xff]   ;;  %v4703_v60 = vld [vmem:[%s6568_s0 + $0x128] ss:$72 sps:$4 sm:$0xff]  }
  0x68   :  { %3202 = vmatpush1.bf16.msra.mxu0 %v4606_v61  ;;  %2751 = vmatprep.subr.bf16.mxu1 %v4616_v62  ;;  %v4704_v61 = vld [vmem:[%s6567_s1 + $0x240] ss:$8 sps:$4 sm:$0xff]  }
  0x69   :  { %3203 = vmatprep.subr.bf16.mxu0 %v4620_v63  ;;  %v4707_v62 = vld [vmem:[%s6568_s0 + $0x148] ss:$72 sps:$4 sm:$0xff]  }
  0x6a   :  { %2701 = vmatmul.mubr.bf16.gmra.mrb[20].mxu1 %v4613_v0  ;;  %v4708_v63 = vld [vmem:[%s6567_s1 + $0x640] ss:$8 sps:$4 sm:$0xff]   ;;  %v4713_v0 = vld [vmem:[%s6567_s1 + $0x254] ss:$8 sps:$4 sm:$0xff]  }
  0x6b   :  { %3153 = vmatmul.mubr.bf16.gmra.mrb[20].mxu0 %v4617_v2  ;;  %2752 = vmatpush1.bf16.msra.mxu1 %v4614_v1  ;;  %v4716_v1 = vld [vmem:[%s6567_s1 + $0x654] ss:$8 sps:$4 sm:$0xff]  }
  0x6c   :  { %3204 = vmatpush1.bf16.msra.mxu0 %v4618_v3  ;;  %2753 = vmatprep.subr.bf16.mxu1 %v4623_v4  ;;  %v4717_v2 = vld [vmem:[%s6568_s0 + $0x1bc] ss:$72 sps:$4 sm:$0xff]   ;;  %v4711_v4 = vld [vmem:[%s6567_s1 + $0x250] ss:$8 sps:$4 sm:$0xff]  }
  0x6d   :  { %3205 = vmatprep.subr.bf16.mxu0 %v4626_v5  ;;  %2710 = vmatprep.mubr.bf16.mxu1 %v4627_v6  ;;  %v4719_v3 = vld [vmem:[%s6568_s0 + $0x1dc] ss:$72 sps:$4 sm:$0xff]   ;;  %v4714_v5 = vld [vmem:[%s6567_s1 + $0x650] ss:$8 sps:$4 sm:$0xff]  }
  0x6e   :  { %3162 = vmatprep.mubr.bf16.mxu0 %v4629_v7  ;;  %v4724_v6 = vld [vmem:[%s6567_s1 + $0x264] ss:$8 sps:$4 sm:$0xff]  }
  0x6f   :  { %2754 = vmatpush1.bf16.msra.mxu1 %v4621_v8  ;;  %v4728_v7 = vld [vmem:[%s6567_s1 + $0x664] ss:$8 sps:$4 sm:$0xff]   ;;  %v4721_v8 = vld [vmem:[%s6568_s0 + $0x1b8] ss:$72 sps:$4 sm:$0xff]  }
  0x70   :  { %3206 = vmatpush1.bf16.msra.mxu0 %v4624_v9  ;;  %2755 = vmatprep.subr.bf16.mxu1 %v4634_v10  ;;  %v4722_v9 = vld [vmem:[%s6567_s1 + $0x260] ss:$8 sps:$4 sm:$0xff]  }
  0x71   :  { %3207 = vmatprep.subr.bf16.mxu0 %v4638_v11  ;;  %v4725_v10 = vld [vmem:[%s6568_s0 + $0x1d8] ss:$72 sps:$4 sm:$0xff]  }
  0x72   :  { %2711 = vmatmul.mubr.bf16.gmra.mrb[24].mxu1 %v4631_v12  ;;  %v4726_v11 = vld [vmem:[%s6567_s1 + $0x660] ss:$8 sps:$4 sm:$0xff]   ;;  %v4731_v12 = vld [vmem:[%s6567_s1 + $0x274] ss:$8 sps:$4 sm:$0xff]  }
  0x73   :  { %3163 = vmatmul.mubr.bf16.gmra.mrb[24].mxu0 %v4635_v14  ;;  %2756 = vmatpush1.bf16.msra.mxu1 %v4632_v13  ;;  %v4734_v13 = vld [vmem:[%s6567_s1 + $0x674] ss:$8 sps:$4 sm:$0xff]  }
  0x74   :  { %3208 = vmatpush1.bf16.msra.mxu0 %v4636_v15  ;;  %2757 = vmatprep.subr.bf16.mxu1 %v4641_v16  ;;  %v4735_v14 = vld [vmem:[%s6568_s0 + $0x24c] ss:$72 sps:$4 sm:$0xff]   ;;  %v4729_v16 = vld [vmem:[%s6567_s1 + $0x270] ss:$8 sps:$4 sm:$0xff]  }
  0x75   :  { %3209 = vmatprep.subr.bf16.mxu0 %v4644_v17  ;;  %2720 = vmatprep.mubr.bf16.mxu1 %v4645_v18  ;;  %v4737_v15 = vld [vmem:[%s6568_s0 + $0x26c] ss:$72 sps:$4 sm:$0xff]   ;;  %v4732_v17 = vld [vmem:[%s6567_s1 + $0x670] ss:$8 sps:$4 sm:$0xff]  }
  0x76   :  { %3172 = vmatprep.mubr.bf16.mxu0 %v4647_v19  ;;  %v4742_v18 = vld [vmem:[%s6567_s1 + $0x284] ss:$8 sps:$4 sm:$0xff]  }
  0x77   :  { %2758 = vmatpush1.bf16.msra.mxu1 %v4639_v20  ;;  %v4746_v19 = vld [vmem:[%s6567_s1 + $0x684] ss:$8 sps:$4 sm:$0xff]   ;;  %v4739_v20 = vld [vmem:[%s6568_s0 + $0x248] ss:$72 sps:$4 sm:$0xff]  }
  0x78   :  { %3210 = vmatpush1.bf16.msra.mxu0 %v4642_v21  ;;  %2759 = vmatprep.subr.bf16.mxu1 %v4652_v22  ;;  %v4740_v21 = vld [vmem:[%s6567_s1 + $0x280] ss:$8 sps:$4 sm:$0xff]  }
  0x79   :  { %3211 = vmatprep.subr.bf16.mxu0 %v4656_v23  ;;  %v4743_v22 = vld [vmem:[%s6568_s0 + $0x268] ss:$72 sps:$4 sm:$0xff]  }
  0x7a   :  { %2721 = vmatmul.mubr.bf16.gmra.mrb[28].mxu1 %v4649_v24  ;;  %v4744_v23 = vld [vmem:[%s6567_s1 + $0x680] ss:$8 sps:$4 sm:$0xff]   ;;  %v4749_v24 = vld [vmem:[%s6567_s1 + $0x294] ss:$8 sps:$4 sm:$0xff]  }
  0x7b   :  { %3173 = vmatmul.mubr.bf16.gmra.mrb[28].mxu0 %v4653_v26  ;;  %2760 = vmatpush1.bf16.msra.mxu1 %v4650_v25  ;;  %v4752_v25 = vld [vmem:[%s6567_s1 + $0x694] ss:$8 sps:$4 sm:$0xff]  }
  0x7c   :  { %3212 = vmatpush1.bf16.msra.mxu0 %v4654_v27  ;;  %2761 = vmatprep.subr.bf16.mxu1 %v4659_v28  ;;  %v4753_v26 = vld [vmem:[%s6568_s0 + $0x2dc] ss:$72 sps:$4 sm:$0xff]   ;;  %v4747_v28 = vld [vmem:[%s6567_s1 + $0x290] ss:$8 sps:$4 sm:$0xff]  }
  0x7d   :  { %3213 = vmatprep.subr.bf16.mxu0 %v4662_v29  ;;  %2763 = vmatprep.mubr.bf16.mxu1 %v4665_v30  ;;  %v4755_v27 = vld [vmem:[%s6568_s0 + $0x2fc] ss:$72 sps:$4 sm:$0xff]   ;;  %v4750_v29 = vld [vmem:[%s6567_s1 + $0x690] ss:$8 sps:$4 sm:$0xff]  }
  0x7e   :  { %3215 = vmatprep.mubr.bf16.mxu0 %v4668_v31  ;;  %v4760_v30 = vld [vmem:[%s6567_s1 + $0x2a4] ss:$8 sps:$4 sm:$0xff]  }
  0x7f   :  { %2762 = vmatpush1.bf16.msra.mxu1 %v4657_v32  ;;  %v4764_v31 = vld [vmem:[%s6567_s1 + $0x6a4] ss:$8 sps:$4 sm:$0xff]   ;;  %v4757_v32 = vld [vmem:[%s6568_s0 + $0x2d8] ss:$72 sps:$4 sm:$0xff]  }
  0x80   :  { %3214 = vmatpush1.bf16.msra.mxu0 %v4660_v33  ;;  %2844 = vmatprep.subr.bf16.mxu1 %v4671_v34  ;;  %v4758_v33 = vld [vmem:[%s6567_s1 + $0x2a0] ss:$8 sps:$4 sm:$0xff]  }
  0x81   :  { %3296 = vmatprep.subr.bf16.mxu0 %v4674_v35  ;;  %v4761_v34 = vld [vmem:[%s6568_s0 + $0x2f8] ss:$72 sps:$4 sm:$0xff]  }
  0x82   :  { %2764 = vmatmul.mubr.bf16.vlgmr.msra.gmra.mrb[0].mxu1 %v4663_v36  ;;  %v4762_v35 = vld [vmem:[%s6567_s1 + $0x6a0] ss:$8 sps:$4 sm:$0xff]   ;;  %v4767_v36 = vld [vmem:[%s6567_s1 + $0x2b4] ss:$8 sps:$4 sm:$0xff]  }
  0x83   :  { %3216 = vmatmul.mubr.bf16.vlgmr.msra.gmra.mrb[0].mxu0 %v4666_v37  ;;  %2845 = vmatpush1.bf16.msra.mxu1 %v4669_v38  ;;  %v4770_v37 = vld [vmem:[%s6567_s1 + $0x6b4] ss:$8 sps:$4 sm:$0xff]  }
  0x84   :  { %3297 = vmatpush1.bf16.msra.mxu0 %v4672_v39  ;;  %2846 = vmatprep.subr.bf16.mxu1 %v4677_v40  ;;  %v4771_v38 = vld [vmem:[%s6568_s0 + $0x36c] ss:$72 sps:$4 sm:$0xff]   ;;  %v4765_v40 = vld [vmem:[%s6567_s1 + $0x2b0] ss:$8 sps:$4 sm:$0xff]  }
  0x85   :  { %3298 = vmatprep.subr.bf16.mxu0 %v4680_v41  ;;  %2773 = vmatprep.mubr.bf16.mxu1 %v4681_v42  ;;  %v4773_v39 = vld [vmem:[%s6568_s0 + $0x38c] ss:$72 sps:$4 sm:$0xff]   ;;  %v4768_v41 = vld [vmem:[%s6567_s1 + $0x6b0] ss:$8 sps:$4 sm:$0xff]  }
  0x86   :  { %3225 = vmatprep.mubr.bf16.mxu0 %v4683_v43  ;;  %v4778_v42 = vld [vmem:[%s6567_s1 + $0x2c4] ss:$8 sps:$4 sm:$0xff]  }
  0x87   :  { %2847 = vmatpush1.bf16.msra.mxu1 %v4675_v44  ;;  %v4782_v43 = vld [vmem:[%s6567_s1 + $0x6c4] ss:$8 sps:$4 sm:$0xff]   ;;  %v4775_v44 = vld [vmem:[%s6568_s0 + $0x368] ss:$72 sps:$4 sm:$0xff]  }
  0x88   :  { %3299 = vmatpush1.bf16.msra.mxu0 %v4678_v45  ;;  %2848 = vmatprep.subr.bf16.mxu1 %v4688_v46  ;;  %v4776_v45 = vld [vmem:[%s6567_s1 + $0x2c0] ss:$8 sps:$4 sm:$0xff]  }
  0x89   :  { %3300 = vmatprep.subr.bf16.mxu0 %v4692_v47  ;;  %v4779_v46 = vld [vmem:[%s6568_s0 + $0x388] ss:$72 sps:$4 sm:$0xff]  }
  0x8a   :  { %2774 = vmatmul.mubr.bf16.gmra.mrb[4].mxu1 %v4685_v48  ;;  %v4780_v47 = vld [vmem:[%s6567_s1 + $0x6c0] ss:$8 sps:$4 sm:$0xff]   ;;  %v4785_v48 = vld [vmem:[%s6567_s1 + $0x2d4] ss:$8 sps:$4 sm:$0xff]  }
  0x8b   :  { %3226 = vmatmul.mubr.bf16.gmra.mrb[4].mxu0 %v4689_v50  ;;  %2849 = vmatpush1.bf16.msra.mxu1 %v4686_v49  ;;  %v4788_v49 = vld [vmem:[%s6567_s1 + $0x6d4] ss:$8 sps:$4 sm:$0xff]  }
  0x8c   :  { %3301 = vmatpush1.bf16.msra.mxu0 %v4690_v51  ;;  %2850 = vmatprep.subr.bf16.mxu1 %v4695_v52  ;;  %v4789_v50 = vld [vmem:[%s6568_s0 + $0x3fc] ss:$72 sps:$4 sm:$0xff]   ;;  %v4783_v52 = vld [vmem:[%s6567_s1 + $0x2d0] ss:$8 sps:$4 sm:$0xff]  }
  0x8d   :  { %3302 = vmatprep.subr.bf16.mxu0 %v4698_v53  ;;  %2783 = vmatprep.mubr.bf16.mxu1 %v4699_v54  ;;  %v4791_v51 = vld [vmem:[%s6568_s0 + $0x41c] ss:$72 sps:$4 sm:$0xff]   ;;  %v4786_v53 = vld [vmem:[%s6567_s1 + $0x6d0] ss:$8 sps:$4 sm:$0xff]  }
  0x8e   :  { %3235 = vmatprep.mubr.bf16.mxu0 %v4701_v55  ;;  %v4796_v54 = vld [vmem:[%s6567_s1 + $0x2e4] ss:$8 sps:$4 sm:$0xff]  }
  0x8f   :  { %2851 = vmatpush1.bf16.msra.mxu1 %v4693_v56  ;;  %v4800_v55 = vld [vmem:[%s6567_s1 + $0x6e4] ss:$8 sps:$4 sm:$0xff]   ;;  %v4793_v56 = vld [vmem:[%s6568_s0 + $0x3f8] ss:$72 sps:$4 sm:$0xff]  }
  0x90   :  { %3303 = vmatpush1.bf16.msra.mxu0 %v4696_v57  ;;  %2852 = vmatprep.subr.bf16.mxu1 %v4706_v58  ;;  %v4794_v57 = vld [vmem:[%s6567_s1 + $0x2e0] ss:$8 sps:$4 sm:$0xff]  }
  0x91   :  { %3304 = vmatprep.subr.bf16.mxu0 %v4710_v59  ;;  %v4797_v58 = vld [vmem:[%s6568_s0 + $0x418] ss:$72 sps:$4 sm:$0xff]  }
  0x92   :  { %2784 = vmatmul.mubr.bf16.gmra.mrb[8].mxu1 %v4703_v60  ;;  %v4798_v59 = vld [vmem:[%s6567_s1 + $0x6e0] ss:$8 sps:$4 sm:$0xff]   ;;  %v4803_v60 = vld [vmem:[%s6567_s1 + $0x2f4] ss:$8 sps:$4 sm:$0xff]  }
  0x93   :  { %3236 = vmatmul.mubr.bf16.gmra.mrb[8].mxu0 %v4707_v62  ;;  %2853 = vmatpush1.bf16.msra.mxu1 %v4704_v61  ;;  %v4806_v61 = vld [vmem:[%s6567_s1 + $0x6f4] ss:$8 sps:$4 sm:$0xff]  }
  0x94   :  { %3305 = vmatpush1.bf16.msra.mxu0 %v4708_v63  ;;  %2854 = vmatprep.subr.bf16.mxu1 %v4713_v0  ;;  %v4809_v62 = vld [vmem:[%s6568_s0 + $0x14] ss:$72 sps:$4 sm:$0xff]   ;;  %v4801_v0 = vld [vmem:[%s6567_s1 + $0x2f0] ss:$8 sps:$4 sm:$0xff]  }
  0x95   :  { %3306 = vmatprep.subr.bf16.mxu0 %v4716_v1  ;;  %2793 = vmatprep.mubr.bf16.mxu1 %v4717_v2  ;;  %v4812_v63 = vld [vmem:[%s6568_s0 + $0x34] ss:$72 sps:$4 sm:$0xff]   ;;  %v4804_v1 = vld [vmem:[%s6567_s1 + $0x6f0] ss:$8 sps:$4 sm:$0xff]   ;;  %v4815_v2 = vld [vmem:[%s6567_s1 + $0x304] ss:$8 sps:$4 sm:$0xff]  }
  0x96   :  { %3245 = vmatprep.mubr.bf16.mxu0 %v4719_v3  ;;  %v4818_v3 = vld [vmem:[%s6567_s1 + $0x704] ss:$8 sps:$4 sm:$0xff]  }
  0x97   :  { %2855 = vmatpush1.bf16.msra.mxu1 %v4711_v4  ;;  %v4807_v4 = vld [vmem:[%s6568_s0 + $0x10] ss:$72 sps:$4 sm:$0xff]  }
  0x98   :  { %3307 = vmatpush1.bf16.msra.mxu0 %v4714_v5  ;;  %2856 = vmatprep.subr.bf16.mxu1 %v4724_v6  ;;  %v4810_v5 = vld [vmem:[%s6568_s0 + $0x30] ss:$72 sps:$4 sm:$0xff]   ;;  %v4813_v6 = vld [vmem:[%s6567_s1 + $0x300] ss:$8 sps:$4 sm:$0xff]  }
  0x99   :  { %3308 = vmatprep.subr.bf16.mxu0 %v4728_v7  ;;  %v4816_v7 = vld [vmem:[%s6567_s1 + $0x700] ss:$8 sps:$4 sm:$0xff]  }
  0x9a   :  { %2794 = vmatmul.mubr.bf16.gmra.mrb[12].mxu1 %v4721_v8  ;;  %v4821_v8 = vld [vmem:[%s6567_s1 + $0x314] ss:$8 sps:$4 sm:$0xff]  }
  0x9b   :  { %3246 = vmatmul.mubr.bf16.gmra.mrb[12].mxu0 %v4725_v10  ;;  %2857 = vmatpush1.bf16.msra.mxu1 %v4722_v9  ;;  %v4824_v9 = vld [vmem:[%s6567_s1 + $0x714] ss:$8 sps:$4 sm:$0xff]   ;;  %v4825_v10 = vld [vmem:[%s6568_s0 + $0xa4] ss:$72 sps:$4 sm:$0xff]  }
  0x9c   :  { %3309 = vmatpush1.bf16.msra.mxu0 %v4726_v11  ;;  %2858 = vmatprep.subr.bf16.mxu1 %v4731_v12  ;;  %v4827_v11 = vld [vmem:[%s6568_s0 + $0xc4] ss:$72 sps:$4 sm:$0xff]   ;;  %v4819_v12 = vld [vmem:[%s6567_s1 + $0x310] ss:$8 sps:$4 sm:$0xff]  }
  0x9d   :  { %3310 = vmatprep.subr.bf16.mxu0 %v4734_v13  ;;  %2803 = vmatprep.mubr.bf16.mxu1 %v4735_v14  ;;  %v4822_v13 = vld [vmem:[%s6567_s1 + $0x710] ss:$8 sps:$4 sm:$0xff]   ;;  %v4832_v14 = vld [vmem:[%s6567_s1 + $0x324] ss:$8 sps:$4 sm:$0xff]  }
  0x9e   :  { %3255 = vmatprep.mubr.bf16.mxu0 %v4737_v15  ;;  %v4836_v15 = vld [vmem:[%s6567_s1 + $0x724] ss:$8 sps:$4 sm:$0xff]  }
  0x9f   :  { %2859 = vmatpush1.bf16.msra.mxu1 %v4729_v16  ;;  %v4829_v16 = vld [vmem:[%s6568_s0 + $0xa0] ss:$72 sps:$4 sm:$0xff]  }
  0xa0   :  { %3311 = vmatpush1.bf16.msra.mxu0 %v4732_v17  ;;  %2860 = vmatprep.subr.bf16.mxu1 %v4742_v18  ;;  %v4830_v17 = vld [vmem:[%s6567_s1 + $0x320] ss:$8 sps:$4 sm:$0xff]  }
  0xa1   :  { %3312 = vmatprep.subr.bf16.mxu0 %v4746_v19  ;;  %v4833_v18 = vld [vmem:[%s6568_s0 + $0xc0] ss:$72 sps:$4 sm:$0xff]  }
  0xa2   :  { %2804 = vmatmul.mubr.bf16.gmra.mrb[16].mxu1 %v4739_v20  ;;  %v4834_v19 = vld [vmem:[%s6567_s1 + $0x720] ss:$8 sps:$4 sm:$0xff]   ;;  %v4839_v20 = vld [vmem:[%s6567_s1 + $0x334] ss:$8 sps:$4 sm:$0xff]  }
  0xa3   :  { %3256 = vmatmul.mubr.bf16.gmra.mrb[16].mxu0 %v4743_v22  ;;  %2861 = vmatpush1.bf16.msra.mxu1 %v4740_v21  ;;  %v4842_v21 = vld [vmem:[%s6567_s1 + $0x734] ss:$8 sps:$4 sm:$0xff]  }
  0xa4   :  { %3313 = vmatpush1.bf16.msra.mxu0 %v4744_v23  ;;  %2862 = vmatprep.subr.bf16.mxu1 %v4749_v24  ;;  %v4843_v22 = vld [vmem:[%s6568_s0 + $0x134] ss:$72 sps:$4 sm:$0xff]   ;;  %v4837_v24 = vld [vmem:[%s6567_s1 + $0x330] ss:$8 sps:$4 sm:$0xff]  }
  0xa5   :  { %3314 = vmatprep.subr.bf16.mxu0 %v4752_v25  ;;  %2813 = vmatprep.mubr.bf16.mxu1 %v4753_v26  ;;  %v4845_v23 = vld [vmem:[%s6568_s0 + $0x154] ss:$72 sps:$4 sm:$0xff]   ;;  %v4840_v25 = vld [vmem:[%s6567_s1 + $0x730] ss:$8 sps:$4 sm:$0xff]   ;;  %v4850_v26 = vld [vmem:[%s6567_s1 + $0x344] ss:$8 sps:$4 sm:$0xff]  }
  0xa6   :  { %3265 = vmatprep.mubr.bf16.mxu0 %v4755_v27  ;;  %v4854_v27 = vld [vmem:[%s6567_s1 + $0x744] ss:$8 sps:$4 sm:$0xff]  }
  0xa7   :  { %2863 = vmatpush1.bf16.msra.mxu1 %v4747_v28  ;;  %v4847_v28 = vld [vmem:[%s6568_s0 + $0x130] ss:$72 sps:$4 sm:$0xff]  }
  0xa8   :  { %3315 = vmatpush1.bf16.msra.mxu0 %v4750_v29  ;;  %2864 = vmatprep.subr.bf16.mxu1 %v4760_v30  ;;  %v4848_v29 = vld [vmem:[%s6567_s1 + $0x340] ss:$8 sps:$4 sm:$0xff]   ;;  %v4851_v30 = vld [vmem:[%s6568_s0 + $0x150] ss:$72 sps:$4 sm:$0xff]  }
  0xa9   :  { %3316 = vmatprep.subr.bf16.mxu0 %v4764_v31  ;;  %v4852_v31 = vld [vmem:[%s6567_s1 + $0x740] ss:$8 sps:$4 sm:$0xff]  }
  0xaa   :  { %2814 = vmatmul.mubr.bf16.gmra.mrb[20].mxu1 %v4757_v32  ;;  %v4857_v32 = vld [vmem:[%s6567_s1 + $0x354] ss:$8 sps:$4 sm:$0xff]  }
  0xab   :  { %3266 = vmatmul.mubr.bf16.gmra.mrb[20].mxu0 %v4761_v34  ;;  %2865 = vmatpush1.bf16.msra.mxu1 %v4758_v33  ;;  %v4860_v33 = vld [vmem:[%s6567_s1 + $0x754] ss:$8 sps:$4 sm:$0xff]   ;;  %v4861_v34 = vld [vmem:[%s6568_s0 + $0x1c4] ss:$72 sps:$4 sm:$0xff]  }
  0xac   :  { %3317 = vmatpush1.bf16.msra.mxu0 %v4762_v35  ;;  %2866 = vmatprep.subr.bf16.mxu1 %v4767_v36  ;;  %v4863_v35 = vld [vmem:[%s6568_s0 + $0x1e4] ss:$72 sps:$4 sm:$0xff]   ;;  %v4855_v36 = vld [vmem:[%s6567_s1 + $0x350] ss:$8 sps:$4 sm:$0xff]  }
  0xad   :  { %3318 = vmatprep.subr.bf16.mxu0 %v4770_v37  ;;  %2823 = vmatprep.mubr.bf16.mxu1 %v4771_v38  ;;  %v4858_v37 = vld [vmem:[%s6567_s1 + $0x750] ss:$8 sps:$4 sm:$0xff]   ;;  %v4868_v38 = vld [vmem:[%s6567_s1 + $0x364] ss:$8 sps:$4 sm:$0xff]  }
  0xae   :  { %3275 = vmatprep.mubr.bf16.mxu0 %v4773_v39  ;;  %v4872_v39 = vld [vmem:[%s6567_s1 + $0x764] ss:$8 sps:$4 sm:$0xff]  }
  0xaf   :  { %2867 = vmatpush1.bf16.msra.mxu1 %v4765_v40  ;;  %v4865_v40 = vld [vmem:[%s6568_s0 + $0x1c0] ss:$72 sps:$4 sm:$0xff]  }
  0xb0   :  { %3319 = vmatpush1.bf16.msra.mxu0 %v4768_v41  ;;  %2868 = vmatprep.subr.bf16.mxu1 %v4778_v42  ;;  %v4866_v41 = vld [vmem:[%s6567_s1 + $0x360] ss:$8 sps:$4 sm:$0xff]  }
  0xb1   :  { %3320 = vmatprep.subr.bf16.mxu0 %v4782_v43  ;;  %v4869_v42 = vld [vmem:[%s6568_s0 + $0x1e0] ss:$72 sps:$4 sm:$0xff]  }
  0xb2   :  { %2824 = vmatmul.mubr.bf16.gmra.mrb[24].mxu1 %v4775_v44  ;;  %v4870_v43 = vld [vmem:[%s6567_s1 + $0x760] ss:$8 sps:$4 sm:$0xff]   ;;  %v4875_v44 = vld [vmem:[%s6567_s1 + $0x374] ss:$8 sps:$4 sm:$0xff]  }
  0xb3   :  { %3276 = vmatmul.mubr.bf16.gmra.mrb[24].mxu0 %v4779_v46  ;;  %2869 = vmatpush1.bf16.msra.mxu1 %v4776_v45  ;;  %v4878_v45 = vld [vmem:[%s6567_s1 + $0x774] ss:$8 sps:$4 sm:$0xff]  }
  0xb4   :  { %3321 = vmatpush1.bf16.msra.mxu0 %v4780_v47  ;;  %2870 = vmatprep.subr.bf16.mxu1 %v4785_v48  ;;  %v4879_v46 = vld [vmem:[%s6568_s0 + $0x254] ss:$72 sps:$4 sm:$0xff]   ;;  %v4873_v48 = vld [vmem:[%s6567_s1 + $0x370] ss:$8 sps:$4 sm:$0xff]  }
  0xb5   :  { %3322 = vmatprep.subr.bf16.mxu0 %v4788_v49  ;;  %2833 = vmatprep.mubr.bf16.mxu1 %v4789_v50  ;;  %v4881_v47 = vld [vmem:[%s6568_s0 + $0x274] ss:$72 sps:$4 sm:$0xff]   ;;  %v4876_v49 = vld [vmem:[%s6567_s1 + $0x770] ss:$8 sps:$4 sm:$0xff]   ;;  %v4886_v50 = vld [vmem:[%s6567_s1 + $0x384] ss:$8 sps:$4 sm:$0xff]  }
  0xb6   :  { %3285 = vmatprep.mubr.bf16.mxu0 %v4791_v51  ;;  %v4890_v51 = vld [vmem:[%s6567_s1 + $0x784] ss:$8 sps:$4 sm:$0xff]  }
  0xb7   :  { %2871 = vmatpush1.bf16.msra.mxu1 %v4783_v52  ;;  %v4883_v52 = vld [vmem:[%s6568_s0 + $0x250] ss:$72 sps:$4 sm:$0xff]  }
  0xb8   :  { %3323 = vmatpush1.bf16.msra.mxu0 %v4786_v53  ;;  %2872 = vmatprep.subr.bf16.mxu1 %v4796_v54  ;;  %v4884_v53 = vld [vmem:[%s6567_s1 + $0x380] ss:$8 sps:$4 sm:$0xff]   ;;  %v4887_v54 = vld [vmem:[%s6568_s0 + $0x270] ss:$72 sps:$4 sm:$0xff]  }
  0xb9   :  { %3324 = vmatprep.subr.bf16.mxu0 %v4800_v55  ;;  %v4888_v55 = vld [vmem:[%s6567_s1 + $0x780] ss:$8 sps:$4 sm:$0xff]  }
  0xba   :  { %2834 = vmatmul.mubr.bf16.gmra.mrb[28].mxu1 %v4793_v56  ;;  %v4893_v56 = vld [vmem:[%s6567_s1 + $0x394] ss:$8 sps:$4 sm:$0xff]  }
  0xbb   :  { %3286 = vmatmul.mubr.bf16.gmra.mrb[28].mxu0 %v4797_v58  ;;  %2873 = vmatpush1.bf16.msra.mxu1 %v4794_v57  ;;  %v4896_v57 = vld [vmem:[%s6567_s1 + $0x794] ss:$8 sps:$4 sm:$0xff]   ;;  %v4897_v58 = vld [vmem:[%s6568_s0 + $0x2e4] ss:$72 sps:$4 sm:$0xff]  }
  0xbc   :  { %3325 = vmatpush1.bf16.msra.mxu0 %v4798_v59  ;;  %2874 = vmatprep.subr.bf16.mxu1 %v4803_v60  ;;  %v4899_v59 = vld [vmem:[%s6568_s0 + $0x304] ss:$72 sps:$4 sm:$0xff]   ;;  %v4891_v60 = vld [vmem:[%s6567_s1 + $0x390] ss:$8 sps:$4 sm:$0xff]  }
  0xbd   :  { %3326 = vmatprep.subr.bf16.mxu0 %v4806_v61  ;;  %2876 = vmatprep.mubr.bf16.mxu1 %v4809_v62  ;;  %v4894_v61 = vld [vmem:[%s6567_s1 + $0x790] ss:$8 sps:$4 sm:$0xff]   ;;  %v4904_v62 = vld [vmem:[%s6567_s1 + $0x3a4] ss:$8 sps:$4 sm:$0xff]  }
  0xbe   :  { %3328 = vmatprep.mubr.bf16.mxu0 %v4812_v63  ;;  %v4908_v63 = vld [vmem:[%s6567_s1 + $0x7a4] ss:$8 sps:$4 sm:$0xff]  }
  0xbf   :  { %2875 = vmatpush1.bf16.msra.mxu1 %v4801_v0  ;;  %v4901_v0 = vld [vmem:[%s6568_s0 + $0x2e0] ss:$72 sps:$4 sm:$0xff]  }
  0xc0   :  { %3327 = vmatpush1.bf16.msra.mxu0 %v4804_v1  ;;  %2957 = vmatprep.subr.bf16.mxu1 %v4815_v2  ;;  %v4902_v1 = vld [vmem:[%s6567_s1 + $0x3a0] ss:$8 sps:$4 sm:$0xff]  }
  0xc1   :  { %3409 = vmatprep.subr.bf16.mxu0 %v4818_v3  ;;  %v4905_v2 = vld [vmem:[%s6568_s0 + $0x300] ss:$72 sps:$4 sm:$0xff]  }
  0xc2   :  { %2877 = vmatmul.mubr.bf16.vlgmr.msra.gmra.mrb[0].mxu1 %v4807_v4  ;;  %v4906_v3 = vld [vmem:[%s6567_s1 + $0x7a0] ss:$8 sps:$4 sm:$0xff]   ;;  %v4911_v4 = vld [vmem:[%s6567_s1 + $0x3b4] ss:$8 sps:$4 sm:$0xff]  }
  0xc3   :  { %3329 = vmatmul.mubr.bf16.vlgmr.msra.gmra.mrb[0].mxu0 %v4810_v5  ;;  %2958 = vmatpush1.bf16.msra.mxu1 %v4813_v6  ;;  %v4914_v5 = vld [vmem:[%s6567_s1 + $0x7b4] ss:$8 sps:$4 sm:$0xff]  }
  0xc4   :  { %3410 = vmatpush1.bf16.msra.mxu0 %v4816_v7  ;;  %2959 = vmatprep.subr.bf16.mxu1 %v4821_v8  ;;  %v4915_v6 = vld [vmem:[%s6568_s0 + $0x374] ss:$72 sps:$4 sm:$0xff]   ;;  %v4909_v8 = vld [vmem:[%s6567_s1 + $0x3b0] ss:$8 sps:$4 sm:$0xff]  }
  0xc5   :  { %3411 = vmatprep.subr.bf16.mxu0 %v4824_v9  ;;  %2886 = vmatprep.mubr.bf16.mxu1 %v4825_v10  ;;  %v4917_v7 = vld [vmem:[%s6568_s0 + $0x394] ss:$72 sps:$4 sm:$0xff]   ;;  %v4912_v9 = vld [vmem:[%s6567_s1 + $0x7b0] ss:$8 sps:$4 sm:$0xff]   ;;  %v4922_v10 = vld [vmem:[%s6567_s1 + $0x3c4] ss:$8 sps:$4 sm:$0xff]  }
  0xc6   :  { %3338 = vmatprep.mubr.bf16.mxu0 %v4827_v11  ;;  %v4926_v11 = vld [vmem:[%s6567_s1 + $0x7c4] ss:$8 sps:$4 sm:$0xff]  }
  0xc7   :  { %2960 = vmatpush1.bf16.msra.mxu1 %v4819_v12  ;;  %v4919_v12 = vld [vmem:[%s6568_s0 + $0x370] ss:$72 sps:$4 sm:$0xff]  }
  0xc8   :  { %3412 = vmatpush1.bf16.msra.mxu0 %v4822_v13  ;;  %2961 = vmatprep.subr.bf16.mxu1 %v4832_v14  ;;  %v4920_v13 = vld [vmem:[%s6567_s1 + $0x3c0] ss:$8 sps:$4 sm:$0xff]   ;;  %v4923_v14 = vld [vmem:[%s6568_s0 + $0x390] ss:$72 sps:$4 sm:$0xff]  }
  0xc9   :  { %3413 = vmatprep.subr.bf16.mxu0 %v4836_v15  ;;  %v4924_v15 = vld [vmem:[%s6567_s1 + $0x7c0] ss:$8 sps:$4 sm:$0xff]  }
  0xca   :  { %2887 = vmatmul.mubr.bf16.gmra.mrb[4].mxu1 %v4829_v16  ;;  %v4929_v16 = vld [vmem:[%s6567_s1 + $0x3d4] ss:$8 sps:$4 sm:$0xff]  }
  0xcb   :  { %3339 = vmatmul.mubr.bf16.gmra.mrb[4].mxu0 %v4833_v18  ;;  %2962 = vmatpush1.bf16.msra.mxu1 %v4830_v17  ;;  %v4932_v17 = vld [vmem:[%s6567_s1 + $0x7d4] ss:$8 sps:$4 sm:$0xff]   ;;  %v4933_v18 = vld [vmem:[%s6568_s0 + $0x404] ss:$72 sps:$4 sm:$0xff]  }
  0xcc   :  { %3414 = vmatpush1.bf16.msra.mxu0 %v4834_v19  ;;  %2963 = vmatprep.subr.bf16.mxu1 %v4839_v20  ;;  %v4935_v19 = vld [vmem:[%s6568_s0 + $0x424] ss:$72 sps:$4 sm:$0xff]   ;;  %v4927_v20 = vld [vmem:[%s6567_s1 + $0x3d0] ss:$8 sps:$4 sm:$0xff]  }
  0xcd   :  { %3415 = vmatprep.subr.bf16.mxu0 %v4842_v21  ;;  %2896 = vmatprep.mubr.bf16.mxu1 %v4843_v22  ;;  %v4930_v21 = vld [vmem:[%s6567_s1 + $0x7d0] ss:$8 sps:$4 sm:$0xff]   ;;  %v4940_v22 = vld [vmem:[%s6567_s1 + $0x3e4] ss:$8 sps:$4 sm:$0xff]  }
  0xce   :  { %3348 = vmatprep.mubr.bf16.mxu0 %v4845_v23  ;;  %v4944_v23 = vld [vmem:[%s6567_s1 + $0x7e4] ss:$8 sps:$4 sm:$0xff]  }
  0xcf   :  { %2964 = vmatpush1.bf16.msra.mxu1 %v4837_v24  ;;  %v4937_v24 = vld [vmem:[%s6568_s0 + $0x400] ss:$72 sps:$4 sm:$0xff]  }
  0xd0   :  { %3416 = vmatpush1.bf16.msra.mxu0 %v4840_v25  ;;  %2965 = vmatprep.subr.bf16.mxu1 %v4850_v26  ;;  %v4938_v25 = vld [vmem:[%s6567_s1 + $0x3e0] ss:$8 sps:$4 sm:$0xff]  }
  0xd1   :  { %3417 = vmatprep.subr.bf16.mxu0 %v4854_v27  ;;  %v4941_v26 = vld [vmem:[%s6568_s0 + $0x420] ss:$72 sps:$4 sm:$0xff]  }
  0xd2   :  { %2897 = vmatmul.mubr.bf16.gmra.mrb[8].mxu1 %v4847_v28  ;;  %v4942_v27 = vld [vmem:[%s6567_s1 + $0x7e0] ss:$8 sps:$4 sm:$0xff]   ;;  %v4947_v28 = vld [vmem:[%s6567_s1 + $0x3f4] ss:$8 sps:$4 sm:$0xff]  }
  0xd3   :  { %3349 = vmatmul.mubr.bf16.gmra.mrb[8].mxu0 %v4851_v30  ;;  %2966 = vmatpush1.bf16.msra.mxu1 %v4848_v29  ;;  %v4950_v29 = vld [vmem:[%s6567_s1 + $0x7f4] ss:$8 sps:$4 sm:$0xff]  }
  0xd4   :  { %3418 = vmatpush1.bf16.msra.mxu0 %v4852_v31  ;;  %2967 = vmatprep.subr.bf16.mxu1 %v4857_v32  ;;  %v4953_v30 = vld [vmem:[%s6568_s0 + $0x1c] ss:$72 sps:$4 sm:$0xff]   ;;  %v4945_v32 = vld [vmem:[%s6567_s1 + $0x3f0] ss:$8 sps:$4 sm:$0xff]  }
  0xd5   :  { %3419 = vmatprep.subr.bf16.mxu0 %v4860_v33  ;;  %2906 = vmatprep.mubr.bf16.mxu1 %v4861_v34  ;;  %v4956_v31 = vld [vmem:[%s6568_s0 + $0x3c] ss:$72 sps:$4 sm:$0xff]   ;;  %v4948_v33 = vld [vmem:[%s6567_s1 + $0x7f0] ss:$8 sps:$4 sm:$0xff]  }
  0xd6   :  { %3358 = vmatprep.mubr.bf16.mxu0 %v4863_v35  ;;  %v4959_v34 = vld [vmem:[%s6567_s1 + $0x804] ss:$8 sps:$4 sm:$0xff]   ;;  %v4951_v35 = vld [vmem:[%s6568_s0 + $0x18] ss:$72 sps:$4 sm:$0xff]  }
  0xd7   :  { %2968 = vmatpush1.bf16.msra.mxu1 %v4855_v36  ;;  %v4954_v36 = vld [vmem:[%s6568_s0 + $0x38] ss:$72 sps:$4 sm:$0xff]  }
  0xd8   :  { %3420 = vmatpush1.bf16.msra.mxu0 %v4858_v37  ;;  %2969 = vmatprep.subr.bf16.mxu1 %v4868_v38  ;;  %v4957_v37 = vld [vmem:[%s6567_s1 + $0x800] ss:$8 sps:$4 sm:$0xff]   ;;  %v4962_v38 = vld [vmem:[%s6567_s1 + $0x814] ss:$8 sps:$4 sm:$0xff]  }
  0xd9   :  { %3421 = vmatprep.subr.bf16.mxu0 %v4872_v39  ;;  %v4963_v39 = vld [vmem:[%s6568_s0 + $0xac] ss:$72 sps:$4 sm:$0xff]  }
  0xda   :  { %2907 = vmatmul.mubr.bf16.gmra.mrb[12].mxu1 %v4865_v40  ;;  %v4965_v40 = vld [vmem:[%s6568_s0 + $0xcc] ss:$72 sps:$4 sm:$0xff]  }
  0xdb   :  { %3359 = vmatmul.mubr.bf16.gmra.mrb[12].mxu0 %v4869_v42  ;;  %2970 = vmatpush1.bf16.msra.mxu1 %v4866_v41  ;;  %v4960_v41 = vld [vmem:[%s6567_s1 + $0x810] ss:$8 sps:$4 sm:$0xff]   ;;  %v4971_v42 = vld [vmem:[%s6567_s1 + $0x824] ss:$8 sps:$4 sm:$0xff]  }
  0xdc   :  { %3422 = vmatpush1.bf16.msra.mxu0 %v4870_v43  ;;  %2971 = vmatprep.subr.bf16.mxu1 %v4875_v44  ;;  %v4967_v43 = vld [vmem:[%s6568_s0 + $0xa8] ss:$72 sps:$4 sm:$0xff]  }
  0xdd   :  { %3423 = vmatprep.subr.bf16.mxu0 %v4878_v45  ;;  %2916 = vmatprep.mubr.bf16.mxu1 %v4879_v46  ;;  %v4968_v44 = vld [vmem:[%s6568_s0 + $0xc8] ss:$72 sps:$4 sm:$0xff]   ;;  %v4974_v46 = vld [vmem:[%s6567_s1 + $0x834] ss:$8 sps:$4 sm:$0xff]  }
  0xde   :  { %3368 = vmatprep.mubr.bf16.mxu0 %v4881_v47  ;;  %v4969_v45 = vld [vmem:[%s6567_s1 + $0x820] ss:$8 sps:$4 sm:$0xff]   ;;  %v4975_v47 = vld [vmem:[%s6568_s0 + $0x13c] ss:$72 sps:$4 sm:$0xff]  }
  0xdf   :  { %2972 = vmatpush1.bf16.msra.mxu1 %v4873_v48  ;;  %v4977_v48 = vld [vmem:[%s6568_s0 + $0x15c] ss:$72 sps:$4 sm:$0xff]  }
  0xe0   :  { %3424 = vmatpush1.bf16.msra.mxu0 %v4876_v49  ;;  %2973 = vmatprep.subr.bf16.mxu1 %v4886_v50  ;;  %v4972_v49 = vld [vmem:[%s6567_s1 + $0x830] ss:$8 sps:$4 sm:$0xff]   ;;  %v4983_v50 = vld [vmem:[%s6567_s1 + $0x844] ss:$8 sps:$4 sm:$0xff]  }
  0xe1   :  { %3425 = vmatprep.subr.bf16.mxu0 %v4890_v51  ;;  %v4979_v51 = vld [vmem:[%s6568_s0 + $0x138] ss:$72 sps:$4 sm:$0xff]  }
  0xe2   :  { %2917 = vmatmul.mubr.bf16.gmra.mrb[16].mxu1 %v4883_v52  ;;  %v4980_v52 = vld [vmem:[%s6568_s0 + $0x158] ss:$72 sps:$4 sm:$0xff]  }
  0xe3   :  { %3369 = vmatmul.mubr.bf16.gmra.mrb[16].mxu0 %v4887_v54  ;;  %2974 = vmatpush1.bf16.msra.mxu1 %v4884_v53  ;;  %v4981_v53 = vld [vmem:[%s6567_s1 + $0x840] ss:$8 sps:$4 sm:$0xff]   ;;  %v4986_v54 = vld [vmem:[%s6567_s1 + $0x854] ss:$8 sps:$4 sm:$0xff]  }
  0xe4   :  { %3426 = vmatpush1.bf16.msra.mxu0 %v4888_v55  ;;  %2975 = vmatprep.subr.bf16.mxu1 %v4893_v56  ;;  %v4987_v55 = vld [vmem:[%s6568_s0 + $0x1cc] ss:$72 sps:$4 sm:$0xff]  }
  0xe5   :  { %3427 = vmatprep.subr.bf16.mxu0 %v4896_v57  ;;  %2926 = vmatprep.mubr.bf16.mxu1 %v4897_v58  ;;  %v4989_v56 = vld [vmem:[%s6568_s0 + $0x1ec] ss:$72 sps:$4 sm:$0xff]   ;;  %v4984_v57 = vld [vmem:[%s6567_s1 + $0x850] ss:$8 sps:$4 sm:$0xff]  }
  0xe6   :  { %3378 = vmatprep.mubr.bf16.mxu0 %v4899_v59  ;;  %v4995_v58 = vld [vmem:[%s6567_s1 + $0x864] ss:$8 sps:$4 sm:$0xff]   ;;  %v4991_v59 = vld [vmem:[%s6568_s0 + $0x1c8] ss:$72 sps:$4 sm:$0xff]  }
  0xe7   :  { %2976 = vmatpush1.bf16.msra.mxu1 %v4891_v60  ;;  %v4992_v60 = vld [vmem:[%s6568_s0 + $0x1e8] ss:$72 sps:$4 sm:$0xff]  }
  0xe8   :  { %3428 = vmatpush1.bf16.msra.mxu0 %v4894_v61  ;;  %2977 = vmatprep.subr.bf16.mxu1 %v4904_v62  ;;  %v4993_v61 = vld [vmem:[%s6567_s1 + $0x860] ss:$8 sps:$4 sm:$0xff]   ;;  %v4998_v62 = vld [vmem:[%s6567_s1 + $0x874] ss:$8 sps:$4 sm:$0xff]  }
  0xe9   :  { %3429 = vmatprep.subr.bf16.mxu0 %v4908_v63  ;;  %v4999_v63 = vld [vmem:[%s6568_s0 + $0x25c] ss:$72 sps:$4 sm:$0xff]  }
  0xea   :  { %2927 = vmatmul.mubr.bf16.gmra.mrb[20].mxu1 %v4901_v0  ;;  %v5001_v0 = vld [vmem:[%s6568_s0 + $0x27c] ss:$72 sps:$4 sm:$0xff]  }
  0xeb   :  { %3379 = vmatmul.mubr.bf16.gmra.mrb[20].mxu0 %v4905_v2  ;;  %2978 = vmatpush1.bf16.msra.mxu1 %v4902_v1  ;;  %v4996_v1 = vld [vmem:[%s6567_s1 + $0x870] ss:$8 sps:$4 sm:$0xff]   ;;  %v5007_v2 = vld [vmem:[%s6567_s1 + $0x884] ss:$8 sps:$4 sm:$0xff]  }
  0xec   :  { %3430 = vmatpush1.bf16.msra.mxu0 %v4906_v3  ;;  %2979 = vmatprep.subr.bf16.mxu1 %v4911_v4  ;;  %v5003_v3 = vld [vmem:[%s6568_s0 + $0x258] ss:$72 sps:$4 sm:$0xff]  }
  0xed   :  { %3431 = vmatprep.subr.bf16.mxu0 %v4914_v5  ;;  %2936 = vmatprep.mubr.bf16.mxu1 %v4915_v6  ;;  %v5004_v4 = vld [vmem:[%s6568_s0 + $0x278] ss:$72 sps:$4 sm:$0xff]   ;;  %v5010_v6 = vld [vmem:[%s6567_s1 + $0x894] ss:$8 sps:$4 sm:$0xff]  }
  0xee   :  { %3388 = vmatprep.mubr.bf16.mxu0 %v4917_v7  ;;  %v5005_v5 = vld [vmem:[%s6567_s1 + $0x880] ss:$8 sps:$4 sm:$0xff]   ;;  %v5011_v7 = vld [vmem:[%s6568_s0 + $0x2ec] ss:$72 sps:$4 sm:$0xff]  }
  0xef   :  { %2980 = vmatpush1.bf16.msra.mxu1 %v4909_v8  ;;  %v5013_v8 = vld [vmem:[%s6568_s0 + $0x30c] ss:$72 sps:$4 sm:$0xff]  }
  0xf0   :  { %3432 = vmatpush1.bf16.msra.mxu0 %v4912_v9  ;;  %2981 = vmatprep.subr.bf16.mxu1 %v4922_v10  ;;  %v5008_v9 = vld [vmem:[%s6567_s1 + $0x890] ss:$8 sps:$4 sm:$0xff]   ;;  %v5019_v10 = vld [vmem:[%s6567_s1 + $0x8a4] ss:$8 sps:$4 sm:$0xff]  }
  0xf1   :  { %3433 = vmatprep.subr.bf16.mxu0 %v4926_v11  ;;  %v5015_v11 = vld [vmem:[%s6568_s0 + $0x2e8] ss:$72 sps:$4 sm:$0xff]  }
  0xf2   :  { %2937 = vmatmul.mubr.bf16.gmra.mrb[24].mxu1 %v4919_v12  ;;  %v5016_v12 = vld [vmem:[%s6568_s0 + $0x308] ss:$72 sps:$4 sm:$0xff]  }
  0xf3   :  { %3389 = vmatmul.mubr.bf16.gmra.mrb[24].mxu0 %v4923_v14  ;;  %2982 = vmatpush1.bf16.msra.mxu1 %v4920_v13  ;;  %v5017_v13 = vld [vmem:[%s6567_s1 + $0x8a0] ss:$8 sps:$4 sm:$0xff]   ;;  %v5022_v14 = vld [vmem:[%s6567_s1 + $0x8b4] ss:$8 sps:$4 sm:$0xff]  }
  0xf4   :  { %3434 = vmatpush1.bf16.msra.mxu0 %v4924_v15  ;;  %2983 = vmatprep.subr.bf16.mxu1 %v4929_v16  ;;  %v5023_v15 = vld [vmem:[%s6568_s0 + $0x37c] ss:$72 sps:$4 sm:$0xff]  }
  0xf5   :  { %3435 = vmatprep.subr.bf16.mxu0 %v4932_v17  ;;  %2946 = vmatprep.mubr.bf16.mxu1 %v4933_v18  ;;  %v5025_v16 = vld [vmem:[%s6568_s0 + $0x39c] ss:$72 sps:$4 sm:$0xff]   ;;  %v5020_v17 = vld [vmem:[%s6567_s1 + $0x8b0] ss:$8 sps:$4 sm:$0xff]  }
  0xf6   :  { %3398 = vmatprep.mubr.bf16.mxu0 %v4935_v19  ;;  %v5031_v18 = vld [vmem:[%s6567_s1 + $0x8c4] ss:$8 sps:$4 sm:$0xff]   ;;  %v5027_v19 = vld [vmem:[%s6568_s0 + $0x378] ss:$72 sps:$4 sm:$0xff]  }
  0xf7   :  { %2984 = vmatpush1.bf16.msra.mxu1 %v4927_v20  ;;  %v5028_v20 = vld [vmem:[%s6568_s0 + $0x398] ss:$72 sps:$4 sm:$0xff]  }
  0xf8   :  { %3436 = vmatpush1.bf16.msra.mxu0 %v4930_v21  ;;  %2985 = vmatprep.subr.bf16.mxu1 %v4940_v22  ;;  %v5029_v21 = vld [vmem:[%s6567_s1 + $0x8c0] ss:$8 sps:$4 sm:$0xff]   ;;  %v5034_v22 = vld [vmem:[%s6567_s1 + $0x8d4] ss:$8 sps:$4 sm:$0xff]  }
  0xf9   :  { %3437 = vmatprep.subr.bf16.mxu0 %v4944_v23  ;;  %v5035_v23 = vld [vmem:[%s6568_s0 + $0x40c] ss:$72 sps:$4 sm:$0xff]  }
  0xfa   :  { %2947 = vmatmul.mubr.bf16.gmra.mrb[28].mxu1 %v4937_v24  ;;  %v5037_v24 = vld [vmem:[%s6568_s0 + $0x42c] ss:$72 sps:$4 sm:$0xff]  }
  0xfb   :  { %3399 = vmatmul.mubr.bf16.gmra.mrb[28].mxu0 %v4941_v26  ;;  %2986 = vmatpush1.bf16.msra.mxu1 %v4938_v25  ;;  %v5032_v25 = vld [vmem:[%s6567_s1 + $0x8d0] ss:$8 sps:$4 sm:$0xff]   ;;  %v5043_v26 = vld [vmem:[%s6567_s1 + $0x8e4] ss:$8 sps:$4 sm:$0xff]  }
  0xfc   :  { %3438 = vmatpush1.bf16.msra.mxu0 %v4942_v27  ;;  %2987 = vmatprep.subr.bf16.mxu1 %v4947_v28  ;;  %v5039_v27 = vld [vmem:[%s6568_s0 + $0x408] ss:$72 sps:$4 sm:$0xff]  }
  0xfd   :  { %3439 = vmatprep.subr.bf16.mxu0 %v4950_v29  ;;  %2989 = vmatprep.mubr.bf16.mxu1 %v4953_v30  ;;  %v5040_v28 = vld [vmem:[%s6568_s0 + $0x428] ss:$72 sps:$4 sm:$0xff]   ;;  %v5046_v30 = vld [vmem:[%s6567_s1 + $0x8f4] ss:$8 sps:$4 sm:$0xff]  }
  0xfe   :  { %3441 = vmatprep.mubr.bf16.mxu0 %v4956_v31  ;;  %v5041_v29 = vld [vmem:[%s6567_s1 + $0x8e0] ss:$8 sps:$4 sm:$0xff]   ;;  %v5049_v31 = vld [vmem:[%s6568_s0 + $0x44] ss:$72 sps:$4 sm:$0xff]  }
  0xff   :  { %2988 = vmatpush1.bf16.msra.mxu1 %v4945_v32  ;;  %v5052_v32 = vld [vmem:[%s6568_s0 + $0x284] ss:$72 sps:$4 sm:$0xff]  }
 0x100   :  { %3440 = vmatpush1.bf16.msra.mxu0 %v4948_v33  ;;  %4103 = vmatprep.subr.bf16.mxu1 %v4959_v34  ;;  %v5044_v33 = vld [vmem:[%s6567_s1 + $0x8f0] ss:$8 sps:$4 sm:$0xff]  }
 0x101   :  { %3522 = vmatprep.subr.bf16.mxu0 %v4959_v34  ;;  %v5047_v34 = vld [vmem:[%s6568_s0 + $0x40] ss:$72 sps:$4 sm:$0xff]  }
 0x102   :  { %2990 = vmatmul.mubr.bf16.vlgmr.msra.gmra.mrb[0].mxu1 %v4951_v35  ;;  %v5050_v35 = vld [vmem:[%s6568_s0 + $0x280] ss:$72 sps:$4 sm:$0xff]  }
 0x103   :  { %3442 = vmatmul.mubr.bf16.vlgmr.msra.gmra.mrb[0].mxu0 %v4954_v36  ;;  %4119 = vmatpush1.bf16.msra.mxu1 %v4957_v37  ;;  %v5053_v36 = vld [vmem:[%s6568_s0 + $0xd4] ss:$72 sps:$4 sm:$0xff]  }
 0x104   :  { %3523 = vmatpush1.bf16.msra.mxu0 %v4957_v37  ;;  %4104 = vmatprep.subr.bf16.mxu1 %v4962_v38  ;;  %v5055_v37 = vld [vmem:[%s6568_s0 + $0x314] ss:$72 sps:$4 sm:$0xff]  }
 0x105   :  { %3524 = vmatprep.subr.bf16.mxu0 %v4962_v38  ;;  %2999 = vmatprep.mubr.bf16.mxu1 %v4963_v39  ;;  %v5057_v38 = vld [vmem:[%s6568_s0 + $0xd0] ss:$72 sps:$4 sm:$0xff]  }
 0x106   :  { %3451 = vmatprep.mubr.bf16.mxu0 %v4965_v40  ;;  %v5058_v39 = vld [vmem:[%s6568_s0 + $0x310] ss:$72 sps:$4 sm:$0xff]   ;;  %v5059_v40 = vld [vmem:[%s6568_s0 + $0x164] ss:$72 sps:$4 sm:$0xff]  }
 0x107   :  { %4120 = vmatpush1.bf16.msra.mxu1 %v4960_v41 }
 0x108   :  { %3525 = vmatpush1.bf16.msra.mxu0 %v4960_v41  ;;  %4105 = vmatprep.subr.bf16.mxu1 %v4971_v42  ;;  %v5061_v41 = vld [vmem:[%s6568_s0 + $0x3a4] ss:$72 sps:$4 sm:$0xff]  }
 0x109   :  { %3526 = vmatprep.subr.bf16.mxu0 %v4971_v42  ;;  %v5063_v42 = vld [vmem:[%s6568_s0 + $0x160] ss:$72 sps:$4 sm:$0xff]  }
 0x10a   :  { %3000 = vmatmul.mubr.bf16.gmra.mrb[4].mxu1 %v4967_v43  ;;  %v5064_v43 = vld [vmem:[%s6568_s0 + $0x3a0] ss:$72 sps:$4 sm:$0xff]  }
 0x10b   :  { %3452 = vmatmul.mubr.bf16.gmra.mrb[4].mxu0 %v4968_v44  ;;  %4121 = vmatpush1.bf16.msra.mxu1 %v4969_v45  ;;  %v5065_v44 = vld [vmem:[%s6568_s0 + $0x1f4] ss:$72 sps:$4 sm:$0xff]  }
 0x10c   :  { %3527 = vmatpush1.bf16.msra.mxu0 %v4969_v45  ;;  %4106 = vmatprep.subr.bf16.mxu1 %v4974_v46  ;;  %v5067_v45 = vld [vmem:[%s6568_s0 + $0x434] ss:$72 sps:$4 sm:$0xff]  }
 0x10d   :  { %3528 = vmatprep.subr.bf16.mxu0 %v4974_v46  ;;  %3009 = vmatprep.mubr.bf16.mxu1 %v4975_v47  ;;  %v5069_v46 = vld [vmem:[%s6568_s0 + $0x1f0] ss:$72 sps:$4 sm:$0xff]  }
 0x10e   :  { %3461 = vmatprep.mubr.bf16.mxu0 %v4977_v48  ;;  %v5070_v47 = vld [vmem:[%s6568_s0 + $0x430] ss:$72 sps:$4 sm:$0xff]  }
 0x10f   :  { %4122 = vmatpush1.bf16.msra.mxu1 %v4972_v49 }
 0x110   :  { %3529 = vmatpush1.bf16.msra.mxu0 %v4972_v49  ;;  %4107 = vmatprep.subr.bf16.mxu1 %v4983_v50 }
 0x111   :  { %3530 = vmatprep.subr.bf16.mxu0 %v4983_v50 }
 0x112   :  { %3010 = vmatmul.mubr.bf16.gmra.mrb[8].mxu1 %v4979_v51 }
 0x113   :  { %3462 = vmatmul.mubr.bf16.gmra.mrb[8].mxu0 %v4980_v52  ;;  %4123 = vmatpush1.bf16.msra.mxu1 %v4981_v53 }
 0x114   :  { %3531 = vmatpush1.bf16.msra.mxu0 %v4981_v53  ;;  %4108 = vmatprep.subr.bf16.mxu1 %v4986_v54 }
 0x115   :  { %3532 = vmatprep.subr.bf16.mxu0 %v4986_v54  ;;  %3019 = vmatprep.mubr.bf16.mxu1 %v4987_v55 }
 0x116   :  { %3471 = vmatprep.mubr.bf16.mxu0 %v4989_v56 }
 0x117   :  { %4124 = vmatpush1.bf16.msra.mxu1 %v4984_v57 }
 0x118   :  { %3533 = vmatpush1.bf16.msra.mxu0 %v4984_v57  ;;  %4109 = vmatprep.subr.bf16.mxu1 %v4995_v58 }
 0x119   :  { %3534 = vmatprep.subr.bf16.mxu0 %v4995_v58 }
 0x11a   :  { %3020 = vmatmul.mubr.bf16.gmra.mrb[12].mxu1 %v4991_v59  ;;  %v448_v59 = vlaneseq }
 0x11b   :  { %3472 = vmatmul.mubr.bf16.gmra.mrb[12].mxu0 %v4992_v60  ;;  %4125 = vmatpush1.bf16.msra.mxu1 %v4993_v61 }
 0x11c   :  { %3535 = vmatpush1.bf16.msra.mxu0 %v4993_v61  ;;  %4110 = vmatprep.subr.bf16.mxu1 %v4998_v62  ;;  %v449_v61 = vshrl.u32 %v448_v59, 7 }
 0x11d   :  { %3536 = vmatprep.subr.bf16.mxu0 %v4998_v62  ;;  %3029 = vmatprep.mubr.bf16.mxu1 %v4999_v63 }
 0x11e   :  { %3481 = vmatprep.mubr.bf16.mxu0 %v5001_v0 }
 0x11f   :  { %4126 = vmatpush1.bf16.msra.mxu1 %v4996_v1 }
 0x120   :  { %3537 = vmatpush1.bf16.msra.mxu0 %v4996_v1  ;;  %4111 = vmatprep.subr.bf16.mxu1 %v5007_v2  ;;  %v450_v1 = vsub.s32 0, %v449_v61 }
 0x121   :  { %3538 = vmatprep.subr.bf16.mxu0 %v5007_v2 }
 0x122   :  { %3030 = vmatmul.mubr.bf16.gmra.mrb[16].mxu1 %v5003_v3  ;;  %v446_v3 = vld [vmem:[%s6569_s2] sm:$0x3] }
 0x123   :  { %3482 = vmatmul.mubr.bf16.gmra.mrb[16].mxu0 %v5004_v4  ;;  %4127 = vmatpush1.bf16.msra.mxu1 %v5005_v5  ;;  %v454_v4 = vsub.s32 1, %v449_v61 }
 0x124   :  { %3539 = vmatpush1.bf16.msra.mxu0 %v5005_v5  ;;  %4112 = vmatprep.subr.bf16.mxu1 %v5010_v6  ;;  %v6422_v5 = vrot.slane %v446_v3, %v450_v1 }
 0x125   :  { %3540 = vmatprep.subr.bf16.mxu0 %v5010_v6  ;;  %3039 = vmatprep.mubr.bf16.mxu1 %v5011_v7  ;;  %v6424_v6 = vrot.slane %v446_v3, %v454_v4 }
 0x126   :  { %3491 = vmatprep.mubr.bf16.mxu0 %v5013_v8 }
 0x127   :  { %4128 = vmatpush1.bf16.msra.mxu1 %v5008_v9 }
 0x128   :  { %3541 = vmatpush1.bf16.msra.mxu0 %v5008_v9  ;;  %4113 = vmatprep.subr.bf16.mxu1 %v5019_v10 }
 0x129   :  { %3542 = vmatprep.subr.bf16.mxu0 %v5019_v10 }
 0x12a   :  { %3040 = vmatmul.mubr.bf16.gmra.mrb[20].mxu1 %v5015_v11 }
 0x12b   :  { %3492 = vmatmul.mubr.bf16.gmra.mrb[20].mxu0 %v5016_v12  ;;  %4129 = vmatpush1.bf16.msra.mxu1 %v5017_v13 }
 0x12c   :  { %3543 = vmatpush1.bf16.msra.mxu0 %v5017_v13  ;;  %4114 = vmatprep.subr.bf16.mxu1 %v5022_v14 }
 0x12d   :  { %3544 = vmatprep.subr.bf16.mxu0 %v5022_v14  ;;  %3049 = vmatprep.mubr.bf16.mxu1 %v5023_v15 }
 0x12e   :  { %3501 = vmatprep.mubr.bf16.mxu0 %v5025_v16 }
 0x12f   :  { %4130 = vmatpush1.bf16.msra.mxu1 %v5020_v17 }
 0x130   :  { %3545 = vmatpush1.bf16.msra.mxu0 %v5020_v17  ;;  %4115 = vmatprep.subr.bf16.mxu1 %v5031_v18 }
 0x131   :  { %3546 = vmatprep.subr.bf16.mxu0 %v5031_v18 }
 0x132   :  { %3050 = vmatmul.mubr.bf16.gmra.mrb[24].mxu1 %v5027_v19 }
 0x133   :  { %3502 = vmatmul.mubr.bf16.gmra.mrb[24].mxu0 %v5028_v20  ;;  %4131 = vmatpush1.bf16.msra.mxu1 %v5029_v21 }
 0x134   :  { %3547 = vmatpush1.bf16.msra.mxu0 %v5029_v21  ;;  %4116 = vmatprep.subr.bf16.mxu1 %v5034_v22 }
 0x135   :  { %3548 = vmatprep.subr.bf16.mxu0 %v5034_v22  ;;  %3059 = vmatprep.mubr.bf16.mxu1 %v5035_v23 }
 0x136   :  { %3511 = vmatprep.mubr.bf16.mxu0 %v5037_v24 }
 0x137   :  { %4132 = vmatpush1.bf16.msra.mxu1 %v5032_v25 }
 0x138   :  { %3549 = vmatpush1.bf16.msra.mxu0 %v5032_v25  ;;  %4117 = vmatprep.subr.bf16.mxu1 %v5043_v26 }
 0x139   :  { %3550 = vmatprep.subr.bf16.mxu0 %v5043_v26 }
 0x13a   :  { %3060 = vmatmul.mubr.bf16.gmra.mrb[28].mxu1 %v5039_v27 }
 0x13b   :  { %3512 = vmatmul.mubr.bf16.gmra.mrb[28].mxu0 %v5040_v28  ;;  %4133 = vmatpush1.bf16.msra.mxu1 %v5041_v29 }
 0x13c   :  { %3551 = vmatpush1.bf16.msra.mxu0 %v5041_v29  ;;  %4118 = vmatprep.subr.bf16.mxu1 %v5046_v30 }
 0x13d   :  { %3552 = vmatprep.subr.bf16.mxu0 %v5046_v30  ;;  %3554 = vmatprep.mubr.bf16.mxu0 %v5049_v31 }
 0x13e   :  { %3594 = vmatprep.mubr.bf16.mxu1 %v5052_v32 }
 0x13f   :  { %4134 = vmatpush1.bf16.msra.mxu1 %v5044_v33 }
 0x140   :  { %3553 = vmatpush1.bf16.msra.mxu0 %v5044_v33 }
 0x142   :  { %3595 = vmatmul.mubr.bf16.vlgmr.msra.gmra.mrb[32].mxu1 %v5050_v35 }
 0x143   :  { %3555 = vmatmul.mubr.bf16.vlgmr.msra.gmra.mrb[0].mxu0 %v5047_v34  ;;  %3604 = vmatprep.mubr.bf16.mxu1 %v5055_v37 }
 0x144   :  { %3564 = vmatprep.mubr.bf16.mxu0 %v5053_v36 }
 0x14a   :  { %3605 = vmatmul.mubr.bf16.gmra.mrb[36].mxu1 %v5058_v39 }
 0x14b   :  { %3565 = vmatmul.mubr.bf16.gmra.mrb[4].mxu0 %v5057_v38  ;;  %3614 = vmatprep.mubr.bf16.mxu1 %v5061_v41 }
 0x14c   :  { %3574 = vmatprep.mubr.bf16.mxu0 %v5059_v40 }
 0x152   :  { %3615 = vmatmul.mubr.bf16.gmra.mrb[40].mxu1 %v5064_v43 }
 0x153   :  { %3575 = vmatmul.mubr.bf16.gmra.mrb[8].mxu0 %v5063_v42  ;;  %3624 = vmatprep.mubr.bf16.mxu1 %v5067_v45 }
 0x154   :  { %3584 = vmatprep.mubr.bf16.mxu0 %v5065_v44 }
 0x15a   :  { %3625 = vmatmul.mubr.bf16.gmra.mrb[44].mxu1 %v5070_v47 }
 0x15b   :  { %3585 = vmatmul.mubr.bf16.gmra.mrb[12].mxu0 %v5069_v46 }
 0x1d5   :  { %v6387_v48 = vpop.f32.mrb[0].mxu1 }
 0x1d6   :  { %v6389_v49 = vpop.f32.mrb[1].mxu1 }
 0x1d7   :  { %v6391_v50 = vpop.f32.mrb[2].mxu1 }
 0x1d8   :  { %v6393_v51 = vpop.f32.mrb[3].mxu1 }
 0x1dd   :  { %v6395_v52 = vpop.f32.mrb[4].mxu1 }
 0x1de   :  { %v6397_v53 = vpop.f32.mrb[5].mxu1 }
 0x1df   :  { %v6399_v54 = vpop.f32.mrb[6].mxu1 }
 0x1e0   :  { %v6401_v55 = vpop.f32.mrb[7].mxu1 }
 0x1e5   :  { %v6403_v56 = vpop.f32.mrb[8].mxu1 }
 0x1e6   :  { %v6405_v57 = vpop.f32.mrb[9].mxu1 }
 0x1e7   :  { %v6407_v58 = vpop.f32.mrb[10].mxu1 }
 0x1e8   :  { %v6409_v60 = vpop.f32.mrb[11].mxu1 }
 0x1ed   :  { %v6411_v62 = vpop.f32.mrb[12].mxu1 }
 0x1ee   :  { %v6413_v63 = vpop.f32.mrb[13].mxu1 }
 0x1ef   :  { %v6415_v0 = vpop.f32.mrb[14].mxu1 }
 0x1f0   :  { %v6417_v2 = vpop.f32.mrb[15].mxu1 }
 0x1f5   :  { %v3031_v7 = vpop.f32.mrb[16].mxu1 }
 0x1f6   :  { %v3483_v8 = vpop.f32.mrb[16].mxu0  ;;  %v4167_v9 = vadd.f32 %v3031_v7, %v6422_v5  ;;  %v3033_v10 = vpop.f32.mrb[17].mxu1 }
 0x1f7   :  { %v3485_v11 = vpop.f32.mrb[17].mxu0  ;;  %v4170_v12 = vadd.f32 %v3033_v10, %v6424_v6  ;;  %v3035_v13 = vpop.f32.mrb[18].mxu1 }
 0x1f8   :  { %v3487_v14 = vpop.f32.mrb[18].mxu0  ;;  %v4168_v15 = vadd.f32 %v4167_v9, %v3483_v8  ;;  %v4173_v16 = vadd.f32 %v3035_v13, %v6422_v5  ;;  %v3037_v17 = vpop.f32.mrb[19].mxu1 }
 0x1f9   :  { %v3489_v18 = vpop.f32.mrb[19].mxu0  ;;  %v6429_v19 = vadd.f32 %v4170_v12, %v3485_v11  ;;  %v4176_v20 = vadd.f32 %v3037_v17, %v6424_v6 }
 0x1fa   :  { %v6432_v21 = vadd.f32 %v4173_v16, %v3487_v14 }
 0x1fb   :  { %v6434_v22 = vadd.f32 %v4176_v20, %v3489_v18 }
 0x1fd   :  { %v3041_v23 = vpop.f32.mrb[20].mxu1 }
 0x1fe   :  { %v3493_v24 = vpop.f32.mrb[20].mxu0  ;;  %v4179_v25 = vadd.f32 %v3041_v23, %v6422_v5  ;;  %v3043_v26 = vpop.f32.mrb[21].mxu1 }
 0x1ff   :  { %v3495_v27 = vpop.f32.mrb[21].mxu0  ;;  %v4182_v28 = vadd.f32 %v3043_v26, %v6424_v6  ;;  %v3045_v29 = vpop.f32.mrb[22].mxu1 }
 0x200   :  { %v3497_v30 = vpop.f32.mrb[22].mxu0  ;;  %v6438_v31 = vadd.f32 %v4179_v25, %v3493_v24  ;;  %v4185_v32 = vadd.f32 %v3045_v29, %v6422_v5  ;;  %v3047_v33 = vpop.f32.mrb[23].mxu1  ;;  %v4135_v29 = vadd.f32 %v6387_v48, %v6422_v5 }
 0x201   :  { %v3499_v34 = vpop.f32.mrb[23].mxu0  ;;  %v6441_v35 = vadd.f32 %v4182_v28, %v3495_v27  ;;  %v4188_v36 = vadd.f32 %v3047_v33, %v6424_v6 }
 0x202   :  { %v6444_v37 = vadd.f32 %v4185_v32, %v3497_v30  ;;  %v4137_v30 = vadd.f32 %v6389_v49, %v6424_v6 }
 0x203   :  { %v6446_v38 = vadd.f32 %v4188_v36, %v3499_v34  ;;  %v4139_v34 = vadd.f32 %v6391_v50, %v6422_v5 }
 0x205   :  { %v3051_v39 = vpop.f32.mrb[24].mxu1 }
 0x206   :  { %v3503_v40 = vpop.f32.mrb[24].mxu0  ;;  %v4191_v41 = vadd.f32 %v3051_v39, %v6422_v5  ;;  %v3053_v42 = vpop.f32.mrb[25].mxu1 }
 0x207   :  { %v3505_v43 = vpop.f32.mrb[25].mxu0  ;;  %v4194_v44 = vadd.f32 %v3053_v42, %v6424_v6  ;;  %v3055_v45 = vpop.f32.mrb[26].mxu1  ;;  %v4141_v42 = vadd.f32 %v6393_v51, %v6424_v6  ;;  %v4143_v51 = vadd.f32 %v6395_v52, %v6422_v5 }
 0x208   :  { %v3507_v46 = vpop.f32.mrb[26].mxu0  ;;  %v6450_v47 = vadd.f32 %v4191_v41, %v3503_v40  ;;  %v4197_v59 = vadd.f32 %v3055_v45, %v6422_v5  ;;  %v3057_v61 = vpop.f32.mrb[27].mxu1 }
 0x209   :  { %v3509_v1 = vpop.f32.mrb[27].mxu0  ;;  %v6453_v3 = vadd.f32 %v4194_v44, %v3505_v43  ;;  %v4200_v4 = vadd.f32 %v3057_v61, %v6424_v6 }
 0x20a   :  { %v6456_v7 = vadd.f32 %v4197_v59, %v3507_v46 }
 0x20b   :  { %v6458_v8 = vadd.f32 %v4200_v4, %v3509_v1 }
 0x20d   :  { %v3061_v9 = vpop.f32.mrb[28].mxu1 }
 0x20e   :  { %v3513_v10 = vpop.f32.mrb[28].mxu0  ;;  %v4203_v11 = vadd.f32 %v3061_v9, %v6422_v5  ;;  %v3063_v12 = vpop.f32.mrb[29].mxu1 }
 0x20f   :  { %v3515_v13 = vpop.f32.mrb[29].mxu0  ;;  %v4206_v14 = vadd.f32 %v3063_v12, %v6424_v6  ;;  %v3065_v16 = vpop.f32.mrb[30].mxu1 }
 0x210   :  { %v3517_v17 = vpop.f32.mrb[30].mxu0  ;;  %v6462_v18 = vadd.f32 %v4203_v11, %v3513_v10  ;;  %v4209_v20 = vadd.f32 %v3065_v16, %v6422_v5  ;;  %v3067_v23 = vpop.f32.mrb[31].mxu1 }
 0x211   :  { %v3519_v24 = vpop.f32.mrb[31].mxu0  ;;  %v6465_v25 = vadd.f32 %v4206_v14, %v3515_v13  ;;  %v4212_v26 = vadd.f32 %v3067_v23, %v6424_v6 }
 0x212   :  { %v6468_v27 = vadd.f32 %v4209_v20, %v3517_v17 }
 0x213   :  { %v6470_v28 = vadd.f32 %v4212_v26, %v3519_v24 }
 0x215   :  { %v3596_v33 = vpop.f32.mrb[32].mxu1 }
 0x216   :  { %v3556_v32 = vpop.f32.mrb[0].mxu0  ;;  %v4169_v39 = vadd.f32 %v4168_v15, %v3596_v33  ;;  %v3598_v41 = vpop.f32.mrb[33].mxu1 }
 0x217   :  { %v4136_v36 = vadd.f32 %v4135_v29, %v3556_v32  ;;  %v3558_v40 = vpop.f32.mrb[1].mxu0  ;;  %v4172_v44 = vadd.f32 %v6429_v19, %v3598_v41  ;;  %v3600_v48 = vpop.f32.mrb[34].mxu1  ;;  %v4145_v19 = vadd.f32 %v6397_v53, %v6424_v6  ;;  %v4149_v53 = vadd.f32 %v6401_v55, %v6424_v6 }
 0x218   :  { %v4138_v43 = vadd.f32 %v4137_v30, %v3558_v40  ;;  %v3560_v45 = vpop.f32.mrb[2].mxu0  ;;  %v4175_v49 = vadd.f32 %v6432_v21, %v3600_v48  ;;  %v3602_v61 = vpop.f32.mrb[35].mxu1  ;;  %v4151_v55 = vadd.f32 %v6403_v56, %v6422_v5 }
 0x219   :  { %v4140_v46 = vadd.f32 %v4139_v34, %v3560_v45  ;;  %v3562_v59 = vpop.f32.mrb[3].mxu0  ;;  %v4178_v50 = vadd.f32 %v6434_v22, %v3602_v61  ;;  %v4147_v22 = vadd.f32 %v6399_v54, %v6422_v5 }
 0x21a   :  { %v4142_v1 = vadd.f32 %v4141_v42, %v3562_v59  ;;  %v3643_v15 = vpack.c.bf16 %v4175_v49, %v4169_v39 }
 0x21b   :  { %v3635_v4 = vpack.c.bf16 %v4140_v46, %v4136_v36  ;;  %v3644_v10 = vpack.c.bf16 %v4178_v50, %v4172_v44 }
 0x21c   :  { %v3636_v9 = vpack.c.bf16 %v4142_v1, %v4138_v43  ;;  %3659 = vst [vmem:[%s6570_s3 + $0x40] sm:$0xff] %v3643_v15 }
 0x21d   :  { %3651 = vst [vmem:[%s6570_s3] sm:$0xff] %v3635_v4  ;;  %3660 = vst [vmem:[%s6570_s3 + $0x48] sm:$0xff] %v3644_v10  ;;  %v3606_v21 = vpop.f32.mrb[36].mxu1 }
 0x21e   :  { %3652 = vst [vmem:[%s6570_s3 + $0x8] sm:$0xff] %v3636_v9  ;;  %v3566_v52 = vpop.f32.mrb[4].mxu0  ;;  %v4181_v12 = vadd.f32 %v6438_v31, %v3606_v21  ;;  %v3608_v14 = vpop.f32.mrb[37].mxu1 }
 0x21f   :  { %v4144_v11 = vadd.f32 %v4143_v51, %v3566_v52  ;;  %v3568_v13 = vpop.f32.mrb[5].mxu0  ;;  %v4184_v17 = vadd.f32 %v6441_v35, %v3608_v14  ;;  %v3610_v23 = vpop.f32.mrb[38].mxu1  ;;  %v4153_v35 = vadd.f32 %v6405_v57, %v6424_v6  ;;  %v4157_v57 = vadd.f32 %v6409_v60, %v6424_v6 }
 0x220   :  { %v4146_v16 = vadd.f32 %v4145_v19, %v3568_v13  ;;  %v3570_v20 = vpop.f32.mrb[6].mxu0  ;;  %v4187_v26 = vadd.f32 %v6444_v37, %v3610_v23  ;;  %v3612_v30 = vpop.f32.mrb[39].mxu1  ;;  %v4159_v60 = vadd.f32 %v6411_v62, %v6422_v5 }
 0x221   :  { %v4148_v24 = vadd.f32 %v4147_v22, %v3570_v20  ;;  %v3572_v29 = vpop.f32.mrb[7].mxu0  ;;  %v4190_v54 = vadd.f32 %v6446_v38, %v3612_v30  ;;  %v4155_v38 = vadd.f32 %v6407_v58, %v6422_v5 }
 0x222   :  { %v4150_v32 = vadd.f32 %v4149_v53, %v3572_v29  ;;  %v3645_v31 = vpack.c.bf16 %v4187_v26, %v4181_v12 }
 0x223   :  { %v3637_v33 = vpack.c.bf16 %v4148_v24, %v4144_v11  ;;  %v3646_v36 = vpack.c.bf16 %v4190_v54, %v4184_v17 }
 0x224   :  { %v3638_v34 = vpack.c.bf16 %v4150_v32, %v4146_v16  ;;  %3661 = vst [vmem:[%s6570_s3 + $0x50] sm:$0xff] %v3645_v31 }
 0x225   :  { %3653 = vst [vmem:[%s6570_s3 + $0x10] sm:$0xff] %v3637_v33  ;;  %3662 = vst [vmem:[%s6570_s3 + $0x58] sm:$0xff] %v3646_v36  ;;  %v3616_v37 = vpop.f32.mrb[40].mxu1 }
 0x226   :  { %3654 = vst [vmem:[%s6570_s3 + $0x18] sm:$0xff] %v3638_v34  ;;  %v3576_v56 = vpop.f32.mrb[8].mxu0  ;;  %v4193_v40 = vadd.f32 %v6450_v47, %v3616_v37  ;;  %v3618_v42 = vpop.f32.mrb[41].mxu1 }
 0x227   :  { %v4152_v39 = vadd.f32 %v4151_v55, %v3576_v56  ;;  %v3578_v41 = vpop.f32.mrb[9].mxu0  ;;  %v4196_v44 = vadd.f32 %v6453_v3, %v3618_v42  ;;  %v3620_v48 = vpop.f32.mrb[42].mxu1  ;;  %v4161_v3 = vadd.f32 %v6413_v63, %v6424_v6  ;;  %v4165_v63 = vadd.f32 %v6417_v2, %v6424_v6 }
 0x228   :  { %v4154_v43 = vadd.f32 %v4153_v35, %v3578_v41  ;;  %v3580_v45 = vpop.f32.mrb[10].mxu0  ;;  %v4199_v49 = vadd.f32 %v6456_v7, %v3620_v48  ;;  %v3622_v61 = vpop.f32.mrb[43].mxu1 }
 0x229   :  { %v4156_v46 = vadd.f32 %v4155_v38, %v3580_v45  ;;  %v3582_v59 = vpop.f32.mrb[11].mxu0  ;;  %v4202_v58 = vadd.f32 %v6458_v8, %v3622_v61  ;;  %v4163_v8 = vadd.f32 %v6415_v0, %v6422_v5 }
 0x22a   :  { %v4158_v1 = vadd.f32 %v4157_v57, %v3582_v59  ;;  %v3647_v47 = vpack.c.bf16 %v4199_v49, %v4193_v40 }
 0x22b   :  { %v3639_v50 = vpack.c.bf16 %v4156_v46, %v4152_v39  ;;  %v3648_v15 = vpack.c.bf16 %v4202_v58, %v4196_v44 }
 0x22c   :  { %v3640_v4 = vpack.c.bf16 %v4158_v1, %v4154_v43  ;;  %3663 = vst [vmem:[%s6570_s3 + $0x60] sm:$0xff] %v3647_v47 }
 0x22d   :  { %3655 = vst [vmem:[%s6570_s3 + $0x20] sm:$0xff] %v3639_v50  ;;  %3664 = vst [vmem:[%s6570_s3 + $0x68] sm:$0xff] %v3648_v15  ;;  %v3626_v7 = vpop.f32.mrb[44].mxu1 }
 0x22e   :  { %3656 = vst [vmem:[%s6570_s3 + $0x28] sm:$0xff] %v3640_v4  ;;  %v3586_v62 = vpop.f32.mrb[12].mxu0  ;;  %v4205_v10 = vadd.f32 %v6462_v18, %v3626_v7  ;;  %v3628_v19 = vpop.f32.mrb[45].mxu1 }
 0x22f   :  { %v4160_v9 = vadd.f32 %v4159_v60, %v3586_v62  ;;  %v3588_v51 = vpop.f32.mrb[13].mxu0  ;;  %v4208_v21 = vadd.f32 %v6465_v25, %v3628_v19  ;;  %v3630_v11 = vpop.f32.mrb[46].mxu1 }
 0x230   :  { %v4162_v52 = vadd.f32 %v4161_v3, %v3588_v51  ;;  %v3590_v22 = vpop.f32.mrb[14].mxu0  ;;  %v4211_v13 = vadd.f32 %v6468_v27, %v3630_v11  ;;  %v3632_v53 = vpop.f32.mrb[47].mxu1 }
 0x231   :  { %v4164_v12 = vadd.f32 %v4163_v8, %v3590_v22  ;;  %v3592_v14 = vpop.f32.mrb[15].mxu0  ;;  %v4214_v0 = vadd.f32 %v6470_v28, %v3632_v53 }
 0x232   :  { %v4166_v16 = vadd.f32 %v4165_v63, %v3592_v14  ;;  %v3649_v18 = vpack.c.bf16 %v4211_v13, %v4205_v10 }
 0x233   :  { %v3641_v5 = vpack.c.bf16 %v4164_v12, %v4160_v9  ;;  %v3650_v20 = vpack.c.bf16 %v4214_v0, %v4208_v21 }
 0x234   :  { %v3642_v17 = vpack.c.bf16 %v4166_v16, %v4162_v52  ;;  %3665 = vst [vmem:[%s6570_s3 + $0x70] sm:$0xff] %v3649_v18 }
 0x235   :  { %3657 = vst [vmem:[%s6570_s3 + $0x30] sm:$0xff] %v3641_v5  ;;  %3666 = vst [vmem:[%s6570_s3 + $0x78] sm:$0xff] %v3650_v20 }
 0x236   :  { %3658 = vst [vmem:[%s6570_s3 + $0x38] sm:$0xff] %v3642_v17 }

</bundles_post_ra>
